<compile_context>
chip_gen: v7x
topology: tpu7x:2x2x1
jax: 0.10.0
libtpu: 0.0.40
codegen_flags: <defaults>
</compile_context>

<pallas_src>
import math

import jax
import jax.numpy as jnp
from jax.experimental import pallas as pl
from jax.experimental.pallas import tpu as pltpu

NEG_INF = -1e30  # masks padded logit columns inside the in-kernel softmax

D_BERT = 768          # BERT pooler_output width
D_FC1 = 2742          # text_enc_fc1 out features
D_FC1_PAD = 2816      # 22 * 128
D_TEXT = 128          # text_enc_fc2 out features
HIDDEN = 64           # args.hidden_dim (2*hidden must equal 128 for the torch code to run)
LANE = 128


def _round_up(x, m):
    return (x + m - 1) // m * m


def _softmax_rows(logits):
    # Exact softmax: padded columns carry a -1e30 bias so exp underflows to 0
    # and they contribute no probability mass.
    m = jnp.max(logits, axis=-1, keepdims=True)
    e = jnp.exp(logits - m)
    return e / jnp.sum(e, axis=-1, keepdims=True)


def eann_kernel(x_ref, w1_ref, b1_ref, w2_ref, b2_ref,
                wh_ref, bh_ref, wd2_ref, bd2_ref,
                class_ref, domain_ref, text_ref):
    # FC1: (TB, 768)bf16 @ (768, 2816)bf16 -> f32 acc; bias + relu
    # (dropout p=0.4 is identity at eval).
    h1 = jnp.dot(x_ref[...], w1_ref[...], preferred_element_type=jnp.float32)
    h1 = jnp.maximum(h1 + b1_ref[...], 0.0)

    # FC2: (TB, 2816)bf16 @ (2816, 128)bf16 -> f32; bias + relu -> text feature.
    text = jnp.dot(h1.astype(jnp.bfloat16), w2_ref[...],
                   preferred_element_type=jnp.float32)
    text = jnp.maximum(text + b2_ref[...], 0.0)                 # (TB, 128) f32
    text_ref[...] = text

    # Fused heads: [classifer_fc1 | discriminator_fc1] as one (128, 256) dot.
    # grad_reverse is identity in the forward pass.
    head = jnp.dot(text, wh_ref[...],
                   preferred_element_type=jnp.float32) + bh_ref[...]
    c_logits = head[:, :LANE]     # padded class cols carry NEG_INF bias -> exp()=0
    d_h = head[:, LANE:]          # nn.LeakyReLU(True): slope==1.0 -> identity

    d_logits = jnp.dot(d_h, wd2_ref[...],
                       preferred_element_type=jnp.float32) + bd2_ref[...]
    class_ref[...] = _softmax_rows(c_logits)
    domain_ref[...] = _softmax_rows(d_logits)


def init_params(key, event_num):
    """Deterministic torch-Linear-style init (U(-1/sqrt(fan_in), 1/sqrt(fan_in)))."""
    def linear(k, fan_in, fan_out):
        kw, kb = jax.random.split(k)
        bound = 1.0 / math.sqrt(fan_in)
        w = jax.random.uniform(kw, (fan_in, fan_out), jnp.float32, -bound, bound)
        b = jax.random.uniform(kb, (fan_out,), jnp.float32, -bound, bound)
        return w, b

    ks = jax.random.split(key, 5)
    w1, b1 = linear(ks[0], D_BERT, D_FC1)          # text_enc_fc1
    w2, b2 = linear(ks[1], D_FC1, D_TEXT)          # text_enc_fc2
    wc, bc = linear(ks[2], 2 * HIDDEN, 2)          # classifer_fc1
    wd1, bd1 = linear(ks[3], 2 * HIDDEN, HIDDEN)   # discriminator_fc1
    wd2, bd2 = linear(ks[4], HIDDEN, event_num)    # discriminator_fc2

    ev_pad = _round_up(event_num, LANE)

    def pad2(w, rows, cols, dtype=jnp.float32):
        out = jnp.zeros((rows, cols), jnp.float32).at[:w.shape[0], :w.shape[1]].set(w)
        return out.astype(dtype)

    def pad_bias(b, cols, fill=0.0):
        return jnp.full((1, cols), fill, jnp.float32).at[0, :b.shape[0]].set(b)

    # Fused head weight/bias: lanes [0,128) = class head, [128,256) = domain fc1.
    # NOTE: load-bearing padding -- zero weight columns + NEG_INF bias lanes make
    # the padded logits underflow to exactly 0 after exp inside the softmax.
    wh = jnp.zeros((D_TEXT, 2 * LANE), jnp.float32)
    wh = wh.at[:, :2].set(wc).at[:, LANE:LANE + HIDDEN].set(wd1)
    bh = jnp.full((1, 2 * LANE), NEG_INF, jnp.float32)
    bh = bh.at[0, :2].set(bc).at[0, LANE:].set(0.0).at[0, LANE:LANE + HIDDEN].set(bd1)

    packed = dict(
        w1=pad2(w1, D_BERT, D_FC1_PAD, jnp.bfloat16), b1=pad_bias(b1, D_FC1_PAD),
        w2=pad2(w2, D_FC1_PAD, D_TEXT, jnp.bfloat16), b2=pad_bias(b2, D_TEXT),
        wh=wh, bh=bh,
        wd2=pad2(wd2, LANE, ev_pad), bd2=pad_bias(bd2, ev_pad, NEG_INF),
        event_num=event_num, ev_pad=ev_pad,
    )
    raw = dict(w1=w1, b1=b1, w2=w2, b2=b2, wc=wc, bc=bc,
               wd1=wd1, bd1=bd1, wd2=wd2, bd2=bd2)
    return packed, raw


def eann_forward(pooler_output, packed, *, tb=None):
    """pooler_output: (B, 768) float32 — the BERT pooled text feature.

    tb: optional batch-tile override.  Default 128 (good on v5e); on v6e/v7x
    with large batches pass tb=256 to feed the 256-wide MXU.
    """
    B = pooler_output.shape[0]
    Bp0 = _round_up(max(B, 8), 8)
    TB = tb if tb is not None else min(128, Bp0)
    # v7x has 2 TensorCores: give the "parallel" batch axis >= 2 tiles when the
    # batch allows it (negligible extra grid-step cost on 1-TC v5e/v6e).
    if tb is None and Bp0 // TB < 2 and Bp0 >= 16 and Bp0 % 16 == 0:
        TB = Bp0 // 2
    Bp = _round_up(Bp0, TB)

    # bf16 cast for the MXU; skip the zero-pad copy entirely when B is already
    # tile-aligned (avoids an extra un-hidden HBM materialization per call).
    x = pooler_output.astype(jnp.bfloat16)
    if Bp != B:
        x = jnp.zeros((Bp, D_BERT), jnp.bfloat16).at[:B].set(x)

    ev_pad = packed["ev_pad"]
    grid = (Bp // TB,)

    flops = 2 * Bp * (D_BERT * D_FC1_PAD + D_FC1_PAD * D_TEXT
                      + D_TEXT * 2 * LANE + LANE * ev_pad)
    # Weights are VMEM-resident: fetched from HBM exactly once per call.
    bytes_accessed = int(
        Bp * D_BERT * 2
        + packed["w1"].size * 2 + packed["w2"].size * 2
        + (packed["b1"].size + packed["b2"].size + packed["wh"].size
           + packed["bh"].size + packed["wd2"].size + packed["bd2"].size) * 4
        + Bp * (LANE + ev_pad + D_TEXT) * 4)
    cost = pl.CostEstimate(flops=flops,
                           transcendentals=Bp * (LANE + ev_pad),
                           bytes_accessed=bytes_accessed)

    out_shapes = (
        jax.ShapeDtypeStruct((Bp, LANE), jnp.float32),    # class_output (padded)
        jax.ShapeDtypeStruct((Bp, ev_pad), jnp.float32),  # domain_output (padded)
        jax.ShapeDtypeStruct((Bp, D_TEXT), jnp.float32),  # text feature
    )
    class_p, domain_p, text_p = pl.pallas_call(
        eann_kernel,
        out_shape=out_shapes,
        grid=grid,
        in_specs=[
            pl.BlockSpec((TB, D_BERT), lambda b: (b, 0)),          # x batch tile
            pl.BlockSpec((D_BERT, D_FC1_PAD), lambda b: (0, 0)),   # w1 (bf16, VMEM-resident)
            pl.BlockSpec((1, D_FC1_PAD), lambda b: (0, 0)),        # b1 (resident)
            pl.BlockSpec((D_FC1_PAD, D_TEXT), lambda b: (0, 0)),   # w2 (bf16, VMEM-resident)
            pl.BlockSpec((1, D_TEXT), lambda b: (0, 0)),           # b2 (resident)
            pl.BlockSpec((D_TEXT, 2 * LANE), lambda b: (0, 0)),    # fused head W (resident)
            pl.BlockSpec((1, 2 * LANE), lambda b: (0, 0)),         # fused head bias
            pl.BlockSpec((LANE, ev_pad), lambda b: (0, 0)),        # wd2 (resident)
            pl.BlockSpec((1, ev_pad), lambda b: (0, 0)),           # bd2 (resident)
        ],
        out_specs=[
            pl.BlockSpec((TB, LANE), lambda b: (b, 0)),
            pl.BlockSpec((TB, ev_pad), lambda b: (b, 0)),
            pl.BlockSpec((TB, D_TEXT), lambda b: (b, 0)),
        ],
        compiler_params=pltpu.CompilerParams(
            dimension_semantics=("parallel",),
            vmem_limit_bytes=32 * 1024 * 1024),   # ~13 MiB used; safe even on v7x (64 MiB)
        cost_estimate=cost,
    )(x, packed["w1"], packed["b1"], packed["w2"], packed["b2"],
      packed["wh"], packed["bh"], packed["wd2"], packed["bd2"])

    class_output = class_p[:B, :2]
    domain_output = domain_p[:B, :packed["event_num"]]
    text = text_p[:B, :]
    return class_output, domain_output, text


def eann_reference(pooler_output, raw):
    """Pure-JAX reference with the same precision policy (bf16 weights, f32 math)."""
    x = pooler_output.astype(jnp.bfloat16)
    w1 = raw["w1"].astype(jnp.bfloat16)
    w2 = raw["w2"].astype(jnp.bfloat16)
    h1 = jnp.maximum(jnp.dot(x, w1, preferred_element_type=jnp.float32) + raw["b1"], 0.0)
    text = jnp.maximum(jnp.dot(h1.astype(jnp.bfloat16), w2,
                               preferred_element_type=jnp.float32) + raw["b2"], 0.0)
    c = jax.nn.softmax(text @ raw["wc"] + raw["bc"], axis=1)
    dh = text @ raw["wd1"] + raw["bd1"]        # LeakyReLU(True): identity
    d = jax.nn.softmax(dh @ raw["wd2"] + raw["bd2"], axis=1)
    return c, d, text


if __name__ == "__main__":
    B = 4
    EVENT_NUM = 10

    key = jax.random.PRNGKey(0)
    k_param, k_pool = jax.random.split(key)

    packed, raw = init_params(k_param, EVENT_NUM)

    # TODO(synk): BertModel('bert-base-chinese') backbone has no clean Pallas
    # equivalent here; the (B, 768) pooler_output is synthesized deterministically.
    pooler_output = jax.random.normal(k_pool, (B, D_BERT), jnp.float32)

    # TODO(synk): torchvision ResNet50 vision branch is not implemented; its
    # output (and the unused torch.cat((text, image), 1)) does not affect any
    # of the module's returned tensors.

    class_out, domain_out, text_feat = eann_forward(pooler_output, packed)
    jax.block_until_ready((class_out, domain_out, text_feat))

    assert class_out.shape == (B, 2)
    assert domain_out.shape == (B, EVENT_NUM)
    assert text_feat.shape == (B, D_TEXT)
    # exact softmax division -> row sums are exact to f32 rounding
    assert jnp.allclose(jnp.sum(class_out, axis=1), 1.0, atol=1e-3)
    assert jnp.allclose(jnp.sum(domain_out, axis=1), 1.0, atol=1e-3)
    assert bool(jnp.all(text_feat >= 0.0))  # post-ReLU feature

    # compare against matched-precision pure-JAX reference
    c_ref, d_ref, t_ref = eann_reference(pooler_output, raw)
    assert jnp.allclose(class_out, c_ref, atol=1e-2)
    assert jnp.allclose(domain_out, d_ref, atol=1e-2)
    assert jnp.allclose(text_feat, t_ref, atol=1e-2)

    print("KERNEL_OK")
</pallas_src>

<mosaic_0001>
module attributes {stable_mosaic.version = 11 : i64} {
  func.func @eann_kernel(%arg0: i32, %arg1: memref<8x768xbf16, #tpu.memory_space<vmem>>, %arg2: memref<768x2816xbf16, #tpu.memory_space<vmem>>, %arg3: memref<1x2816xf32, #tpu.memory_space<vmem>>, %arg4: memref<2816x128xbf16, #tpu.memory_space<vmem>>, %arg5: memref<1x128xf32, #tpu.memory_space<vmem>>, %arg6: memref<128x256xf32, #tpu.memory_space<vmem>>, %arg7: memref<1x256xf32, #tpu.memory_space<vmem>>, %arg8: memref<128x128xf32, #tpu.memory_space<vmem>>, %arg9: memref<1x128xf32, #tpu.memory_space<vmem>>, %arg10: memref<8x128xf32, #tpu.memory_space<vmem>>, %arg11: memref<8x128xf32, #tpu.memory_space<vmem>>, %arg12: memref<8x128xf32, #tpu.memory_space<vmem>>) attributes {dimension_semantics = [#tpu.dimension_semantics<parallel>], iteration_bounds = array<i64: 1>, scalar_prefetch = 0 : i64, scratch_operands = 0 : i64, tpu.core_type = #tpu.core_type<tc>, window_params = [{transform_indices = @transform_0, window_bounds = array<i64: 8, 768>}, {pipeline_mode = #tpu.pipeline_mode<synchronous>, transform_indices = @transform_1, window_bounds = array<i64: 768, 2816>}, {pipeline_mode = #tpu.pipeline_mode<synchronous>, transform_indices = @transform_2, window_bounds = array<i64: 1, 2816>}, {pipeline_mode = #tpu.pipeline_mode<synchronous>, transform_indices = @transform_3, window_bounds = array<i64: 2816, 128>}, {pipeline_mode = #tpu.pipeline_mode<synchronous>, transform_indices = @transform_4, window_bounds = array<i64: 1, 128>}, {pipeline_mode = #tpu.pipeline_mode<synchronous>, transform_indices = @transform_5, window_bounds = array<i64: 128, 256>}, {pipeline_mode = #tpu.pipeline_mode<synchronous>, transform_indices = @transform_6, window_bounds = array<i64: 1, 256>}, {pipeline_mode = #tpu.pipeline_mode<synchronous>, transform_indices = @transform_7, window_bounds = array<i64: 128, 128>}, {pipeline_mode = #tpu.pipeline_mode<synchronous>, transform_indices = @transform_8, window_bounds = array<i64: 1, 128>}, {transform_indices = @transform_9, window_bounds = array<i64: 8, 128>}, {transform_indices = @transform_10, window_bounds = array<i64: 8, 128>}, {transform_indices = @transform_11, window_bounds = array<i64: 8, 128>}]} {
    %c0 = arith.constant 0 : index
    %c0_0 = arith.constant 0 : index
    %0 = vector.load %arg1[%c0, %c0_0] : memref<8x768xbf16, #tpu.memory_space<vmem>>, vector<8x768xbf16>
    %c0_1 = arith.constant 0 : index
    %c0_2 = arith.constant 0 : index
    %1 = vector.load %arg2[%c0_1, %c0_2] : memref<768x2816xbf16, #tpu.memory_space<vmem>>, vector<768x2816xbf16>
    %cst = arith.constant dense<0.000000e+00> : vector<8x2816xf32>
    %2 = tpu.matmul %0, %1, %cst {dimension_numbers = #tpu.dot_dimension_numbers<[1], [0], [0], [1], [0, 0, 1, 1], [], []>} : vector<8x768xbf16>, vector<768x2816xbf16>, vector<8x2816xf32> -> vector<8x2816xf32>
    %c0_3 = arith.constant 0 : index
    %c0_4 = arith.constant 0 : index
    %3 = vector.load %arg3[%c0_3, %c0_4] : memref<1x2816xf32, #tpu.memory_space<vmem>>, vector<1x2816xf32>
    %4 = vector.broadcast %3 : vector<1x2816xf32> to vector<8x2816xf32>
    %5 = arith.addf %2, %4 : vector<8x2816xf32>
    %cst_5 = arith.constant 0.000000e+00 : f32
    %6 = vector.broadcast %cst_5 : f32 to vector<8x2816xf32>
    %7 = arith.maximumf %5, %6 : vector<8x2816xf32>
    %8 = arith.truncf %7 : vector<8x2816xf32> to vector<8x2816xbf16>
    %c0_6 = arith.constant 0 : index
    %c0_7 = arith.constant 0 : index
    %9 = vector.load %arg4[%c0_6, %c0_7] : memref<2816x128xbf16, #tpu.memory_space<vmem>>, vector<2816x128xbf16>
    %cst_8 = arith.constant dense<0.000000e+00> : vector<8x128xf32>
    %10 = tpu.matmul %8, %9, %cst_8 {dimension_numbers = #tpu.dot_dimension_numbers<[1], [0], [0], [1], [0, 0, 1, 1], [], []>} : vector<8x2816xbf16>, vector<2816x128xbf16>, vector<8x128xf32> -> vector<8x128xf32>
    %c0_9 = arith.constant 0 : index
    %c0_10 = arith.constant 0 : index
    %11 = vector.load %arg5[%c0_9, %c0_10] : memref<1x128xf32, #tpu.memory_space<vmem>>, vector<1x128xf32>
    %12 = vector.broadcast %11 : vector<1x128xf32> to vector<8x128xf32>
    %13 = arith.addf %10, %12 : vector<8x128xf32>
    %cst_11 = arith.constant 0.000000e+00 : f32
    %14 = vector.broadcast %cst_11 : f32 to vector<8x128xf32>
    %15 = arith.maximumf %13, %14 : vector<8x128xf32>
    %c0_12 = arith.constant 0 : index
    %c0_13 = arith.constant 0 : index
    %16 = vector.load %arg12[%c0_12, %c0_13] : memref<8x128xf32, #tpu.memory_space<vmem>>, vector<8x128xf32>
    tpu.vector_store %arg12[%c0_12, %c0_13], %15 {strides = array<i32>} : memref<8x128xf32, #tpu.memory_space<vmem>>, vector<8x128xf32>,
    %c0_14 = arith.constant 0 : index
    %c0_15 = arith.constant 0 : index
    %17 = vector.load %arg6[%c0_14, %c0_15] : memref<128x256xf32, #tpu.memory_space<vmem>>, vector<128x256xf32>
    %cst_16 = arith.constant dense<0.000000e+00> : vector<8x256xf32>
    %18 = tpu.matmul %15, %17, %cst_16 {dimension_numbers = #tpu.dot_dimension_numbers<[1], [0], [0], [1], [0, 0, 1, 1], [], []>} : vector<8x128xf32>, vector<128x256xf32>, vector<8x256xf32> -> vector<8x256xf32>
    %c0_17 = arith.constant 0 : index
    %c0_18 = arith.constant 0 : index
    %19 = vector.load %arg7[%c0_17, %c0_18] : memref<1x256xf32, #tpu.memory_space<vmem>>, vector<1x256xf32>
    %20 = vector.broadcast %19 : vector<1x256xf32> to vector<8x256xf32>
    %21 = arith.addf %18, %20 : vector<8x256xf32>
    %22 = vector.extract_strided_slice %21 {offsets = [0, 0], sizes = [8, 128], strides = [1, 1]} : vector<8x256xf32> to vector<8x128xf32>
    %23 = vector.extract_strided_slice %21 {offsets = [0, 128], sizes = [8, 128], strides = [1, 1]} : vector<8x256xf32> to vector<8x128xf32>
    %c0_19 = arith.constant 0 : index
    %c0_20 = arith.constant 0 : index
    %24 = vector.load %arg8[%c0_19, %c0_20] : memref<128x128xf32, #tpu.memory_space<vmem>>, vector<128x128xf32>
    %cst_21 = arith.constant dense<0.000000e+00> : vector<8x128xf32>
    %25 = tpu.matmul %23, %24, %cst_21 {dimension_numbers = #tpu.dot_dimension_numbers<[1], [0], [0], [1], [0, 0, 1, 1], [], []>} : vector<8x128xf32>, vector<128x128xf32>, vector<8x128xf32> -> vector<8x128xf32>
    %c0_22 = arith.constant 0 : index
    %c0_23 = arith.constant 0 : index
    %26 = vector.load %arg9[%c0_22, %c0_23] : memref<1x128xf32, #tpu.memory_space<vmem>>, vector<1x128xf32>
    %27 = vector.broadcast %26 : vector<1x128xf32> to vector<8x128xf32>
    %28 = arith.addf %25, %27 : vector<8x128xf32>
    %cst_24 = arith.constant dense<0xFF800000> : vector<8xf32>
    %29 = vector.multi_reduction <maximumf>, %22, %cst_24 [1] : vector<8x128xf32> to vector<8xf32>
    %30 = vector.shape_cast %29 : vector<8xf32> to vector<8x1xf32>
    %31 = vector.broadcast %30 : vector<8x1xf32> to vector<8x128xf32>
    %32 = arith.subf %22, %31 : vector<8x128xf32>
    %33 = math.exp %32 : vector<8x128xf32>
    %cst_25 = arith.constant dense<0.000000e+00> : vector<8xf32>
    %34 = vector.multi_reduction <add>, %33, %cst_25 [1] : vector<8x128xf32> to vector<8xf32>
    %35 = vector.shape_cast %34 : vector<8xf32> to vector<8x1xf32>
    %36 = vector.broadcast %35 : vector<8x1xf32> to vector<8x128xf32>
    %37 = arith.divf %33, %36 : vector<8x128xf32>
    %c0_26 = arith.constant 0 : index
    %c0_27 = arith.constant 0 : index
    %38 = vector.load %arg10[%c0_26, %c0_27] : memref<8x128xf32, #tpu.memory_space<vmem>>, vector<8x128xf32>
    tpu.vector_store %arg10[%c0_26, %c0_27], %37 {strides = array<i32>} : memref<8x128xf32, #tpu.memory_space<vmem>>, vector<8x128xf32>,
    %cst_28 = arith.constant dense<0xFF800000> : vector<8xf32>
    %39 = vector.multi_reduction <maximumf>, %28, %cst_28 [1] : vector<8x128xf32> to vector<8xf32>
    %40 = vector.shape_cast %39 : vector<8xf32> to vector<8x1xf32>
    %41 = vector.broadcast %40 : vector<8x1xf32> to vector<8x128xf32>
    %42 = arith.subf %28, %41 : vector<8x128xf32>
    %43 = math.exp %42 : vector<8x128xf32>
    %cst_29 = arith.constant dense<0.000000e+00> : vector<8xf32>
    %44 = vector.multi_reduction <add>, %43, %cst_29 [1] : vector<8x128xf32> to vector<8xf32>
    %45 = vector.shape_cast %44 : vector<8xf32> to vector<8x1xf32>
    %46 = vector.broadcast %45 : vector<8x1xf32> to vector<8x128xf32>
    %47 = arith.divf %43, %46 : vector<8x128xf32>
    %c0_30 = arith.constant 0 : index
    %c0_31 = arith.constant 0 : index
    %48 = vector.load %arg11[%c0_30, %c0_31] : memref<8x128xf32, #tpu.memory_space<vmem>>, vector<8x128xf32>
    tpu.vector_store %arg11[%c0_30, %c0_31], %47 {strides = array<i32>} : memref<8x128xf32, #tpu.memory_space<vmem>>, vector<8x128xf32>,
    return
  }
  func.func @transform_0(%arg0: i32) -> (i32, i32) {
    %c0_i32 = arith.constant 0 : i32
    %c0_i32_0 = arith.constant 0 : i32
    return %arg0, %c0_i32 : i32, i32
  }
  func.func @transform_1(%arg0: i32) -> (i32, i32) {
    %c0_i32 = arith.constant 0 : i32
    %c0_i32_0 = arith.constant 0 : i32
    %c0_i32_1 = arith.constant 0 : i32
    return %c0_i32, %c0_i32_0 : i32, i32
  }
  func.func @transform_2(%arg0: i32) -> (i32, i32) {
    %c0_i32 = arith.constant 0 : i32
    %c0_i32_0 = arith.constant 0 : i32
    %c0_i32_1 = arith.constant 0 : i32
    return %c0_i32, %c0_i32_0 : i32, i32
  }
  func.func @transform_3(%arg0: i32) -> (i32, i32) {
    %c0_i32 = arith.constant 0 : i32
    %c0_i32_0 = arith.constant 0 : i32
    %c0_i32_1 = arith.constant 0 : i32
    return %c0_i32, %c0_i32_0 : i32, i32
  }
  func.func @transform_4(%arg0: i32) -> (i32, i32) {
    %c0_i32 = arith.constant 0 : i32
    %c0_i32_0 = arith.constant 0 : i32
    %c0_i32_1 = arith.constant 0 : i32
    return %c0_i32, %c0_i32_0 : i32, i32
  }
  func.func @transform_5(%arg0: i32) -> (i32, i32) {
    %c0_i32 = arith.constant 0 : i32
    %c0_i32_0 = arith.constant 0 : i32
    %c0_i32_1 = arith.constant 0 : i32
    return %c0_i32, %c0_i32_0 : i32, i32
  }
  func.func @transform_6(%arg0: i32) -> (i32, i32) {
    %c0_i32 = arith.constant 0 : i32
    %c0_i32_0 = arith.constant 0 : i32
    %c0_i32_1 = arith.constant 0 : i32
    return %c0_i32, %c0_i32_0 : i32, i32
  }
  func.func @transform_7(%arg0: i32) -> (i32, i32) {
    %c0_i32 = arith.constant 0 : i32
    %c0_i32_0 = arith.constant 0 : i32
    %c0_i32_1 = arith.constant 0 : i32
    return %c0_i32, %c0_i32_0 : i32, i32
  }
  func.func @transform_8(%arg0: i32) -> (i32, i32) {
    %c0_i32 = arith.constant 0 : i32
    %c0_i32_0 = arith.constant 0 : i32
    %c0_i32_1 = arith.constant 0 : i32
    return %c0_i32, %c0_i32_0 : i32, i32
  }
  func.func @transform_9(%arg0: i32) -> (i32, i32) {
    %c0_i32 = arith.constant 0 : i32
    %c0_i32_0 = arith.constant 0 : i32
    return %arg0, %c0_i32 : i32, i32
  }
  func.func @transform_10(%arg0: i32) -> (i32, i32) {
    %c0_i32 = arith.constant 0 : i32
    %c0_i32_0 = arith.constant 0 : i32
    return %arg0, %c0_i32 : i32, i32
  }
  func.func @transform_11(%arg0: i32) -> (i32, i32) {
    %c0_i32 = arith.constant 0 : i32
    %c0_i32_0 = arith.constant 0 : i32
    return %arg0, %c0_i32 : i32, i32
  }
}

</mosaic_0001>

<bundles_post_ra>
// kernel: tpu_custom_call.1
= control target key start
LH: loop header
LB: loop body
LE: loop exit
PB: predicated region body
PF: predicated region fallthrough
CT: control target
= control target key end

     0   :  { %17 = vsyncpa [#allocation3], 0  ;;  %s14392_s0 = inlined_call_operand.hbm [shape: bf16[8,768], index: 0, kind: input, shape index: {}]   ;;  %s14393_s1 = inlined_call_operand.hbm [shape: bf16[768,2816], index: 1, kind: input, shape index: {}]   ;;  %s14394_s2 = inlined_call_operand.hbm [shape: f32[1,2816], index: 2, kind: input, shape index: {}]   ;;  %s14395_s3 = inlined_call_operand.hbm [shape: bf16[2816,128], index: 3, kind: input, shape index: {}]   ;;  %s14396_s4 = inlined_call_operand.hbm [shape: f32[1,128], index: 4, kind: input, shape index: {}]   ;;  %s14397_s5 = inlined_call_operand.hbm [shape: f32[128,256], index: 5, kind: input, shape index: {}]   ;;  %s14398_s6 = inlined_call_operand.hbm [shape: f32[1,256], index: 6, kind: input, shape index: {}]   ;;  %s14399_s7 = inlined_call_operand.hbm [shape: f32[128,128], index: 7, kind: input, shape index: {}]   ;;  %s14400_s8 = inlined_call_operand.hbm [shape: f32[1,128], index: 8, kind: input, shape index: {}]   ;;  %s14401_s9 = inlined_call_operand.hbm [shape: f32[8,128], index: 9, kind: output, shape index: {0}]   ;;  %s14402_s10 = inlined_call_operand.hbm [shape: f32[8,128], index: 10, kind: output, shape index: {1}]   ;;  %s14403_s11 = inlined_call_operand.hbm [shape: f32[8,128], index: 11, kind: output, shape index: {2}]  }
   0x1   :  { %18 = vsyncpa [#allocation6], 0 }
   0x2   :  { %19 = vsyncpa [#allocation9], 0 }
   0x3   :  { %20 = vsyncpa [#allocation12], 0 }
   0x4   :  { %21 = vsyncpa [#allocation15], 0 }
   0x5   :  { %22 = vsyncpa [#allocation4], 0 }
   0x6   :  { %23 = vsyncpa [#allocation19], 0  ;;  %s13929_s17 = smov [#allocation5]   ;;  %s13651_s21 = scalar_lea.hbm %s14393_s1, 135168 }
   0x7   :  { %s39_s18 = sshll.u32 %s13929_s17, 4  ;;  %p13652_p0 = scmp.ne.s32.totalorder %s14393_s1, %s13651_s21  ;;  %s40_s18 = int_to_ptr.vmem [resolvable:$true] %s39_s18 }
   0x8   :  { %p13655_p1 = scmp.lt.u32.totalorder %s13651_s21, %s14393_s1 }
   0xa   :  { %p13657_p2 = pnand %p13655_p1, %p13652_p0 }
   0xc   :  { %13660 = shalt.err (!%p13657_p2)
}
   0xd   :  { %s13661_s26 = scalar_lea.vmem %s40_s18, 135168  ;;  %p13666_p4 = scmp.lt.s32.totalorder %s40_s18, %s40_s18 }
   0xe   :  { %p13662_p3 = scmp.ne.s32.totalorder %s40_s18, %s13661_s26  ;;  %p13667_p5 = scmp.lt.s32.totalorder %s13661_s26, %s13661_s26 }
  0x10   :  { %p13668_p6 = por %p13667_p5, %p13666_p4 }
  0x12   :  { %p13669_p7 = pnand %p13668_p6, %p13662_p3 }
  0x14   :  { %13672 = shalt.err (!%p13669_p7)
}
  0x15   :  { %s13930_s27 = smov 1408   ;;  %s13931_s28 = smov 88  }
  0x16   :  { %45 = dma.hbm_to_vmem [thread:$0]  %s14393_s1, 135168, %s40_s18, [#allocation6], %s13930_s27, %s13930_s27, %s13931_s28  }
  0x17   :  { %s13932_s12 = smov [#allocation8]   ;;  %s13673_s16 = scalar_lea.hbm %s14395_s3, 22528 }
  0x18   :  { %s61_s13 = sshll.u32 %s13932_s12, 4  ;;  %p13674_p8 = scmp.ne.s32.totalorder %s14395_s3, %s13673_s16  ;;  %s62_s13 = int_to_ptr.vmem [resolvable:$true] %s61_s13 }
  0x19   :  { %p13677_p9 = scmp.lt.u32.totalorder %s13673_s16, %s14395_s3 }
  0x1b   :  { %p13679_p10 = pnand %p13677_p9, %p13674_p8 }
  0x1d   :  { %13682 = shalt.err (!%p13679_p10)
}
  0x1e   :  { %s13683_s22 = scalar_lea.vmem %s62_s13, 22528  ;;  %p13688_p12 = scmp.lt.s32.totalorder %s62_s13, %s62_s13 }
  0x1f   :  { %p13684_p11 = scmp.ne.s32.totalorder %s62_s13, %s13683_s22  ;;  %p13689_p13 = scmp.lt.s32.totalorder %s13683_s22, %s13683_s22 }
  0x21   :  { %p13690_p0 = por %p13689_p13, %p13688_p12 }
  0x23   :  { %p13691_p1 = pnand %p13690_p0, %p13684_p11 }
  0x25   :  { %13694 = shalt.err (!%p13691_p1)
}
  0x26   :  { %s13933_s1 = smov 64   ;;  %s13934_s18 = smov 4  }
  0x27   :  { %67 = dma.hbm_to_vmem [thread:$0]  %s14395_s3, 22528, %s62_s13, [#allocation9], %s13933_s1, %s13933_s1, %s13934_s18  }
  0x28   :  { %s13935_s25 = smov [#allocation11]   ;;  %s13695_s29 = scalar_lea.hbm %s14397_s5, 4096 }
  0x29   :  { %s83_s26 = sshll.u32 %s13935_s25, 4  ;;  %p13696_p2 = scmp.ne.s32.totalorder %s14397_s5, %s13695_s29  ;;  %s84_s26 = int_to_ptr.vmem [resolvable:$true] %s83_s26 }
  0x2a   :  { %p13699_p3 = scmp.lt.u32.totalorder %s13695_s29, %s14397_s5 }
  0x2c   :  { %p13701_p4 = pnand %p13699_p3, %p13696_p2 }
  0x2e   :  { %13704 = shalt.err (!%p13701_p4)
}
  0x2f   :  { %s13705_s16 = scalar_lea.vmem %s84_s26, 4096  ;;  %p13710_p6 = scmp.lt.s32.totalorder %s84_s26, %s84_s26 }
  0x30   :  { %p13706_p5 = scmp.ne.s32.totalorder %s84_s26, %s13705_s16  ;;  %p13711_p7 = scmp.lt.s32.totalorder %s13705_s16, %s13705_s16 }
  0x32   :  { %p13712_p8 = por %p13711_p7, %p13710_p6 }
  0x34   :  { %p13713_p9 = pnand %p13712_p8, %p13706_p5 }
  0x36   :  { %13716 = shalt.err (!%p13713_p9)
}
  0x37   :  { %s13936_s3 = smov 256   ;;  %s13937_s13 = smov 16  }
  0x38   :  { %89 = dma.hbm_to_vmem [thread:$0]  %s14397_s5, 4096, %s84_s26, [#allocation12], %s13936_s3, %s13936_s3, %s13937_s13  }
  0x39   :  { %s13938_s20 = smov [#allocation14]   ;;  %s13717_s18 = scalar_lea.hbm %s14399_s7, 2048 }
  0x3a   :  { %s105_s21 = sshll.u32 %s13938_s20, 4  ;;  %p13718_p10 = scmp.ne.s32.totalorder %s14399_s7, %s13717_s18  ;;  %s106_s21 = int_to_ptr.vmem [resolvable:$true] %s105_s21 }
  0x3b   :  { %p13721_p11 = scmp.lt.u32.totalorder %s13717_s18, %s14399_s7 }
  0x3d   :  { %p13723_p12 = pnand %p13721_p11, %p13718_p10 }
  0x3f   :  { %13726 = shalt.err (!%p13723_p12)
}
  0x40   :  { %s13727_s28 = scalar_lea.vmem %s106_s21, 2048  ;;  %p13732_p0 = scmp.lt.s32.totalorder %s106_s21, %s106_s21 }
  0x41   :  { %p13728_p13 = scmp.ne.s32.totalorder %s106_s21, %s13727_s28  ;;  %p13733_p1 = scmp.lt.s32.totalorder %s13727_s28, %s13727_s28 }
  0x43   :  { %p13734_p2 = por %p13733_p1, %p13732_p0 }
  0x45   :  { %p13735_p3 = pnand %p13734_p2, %p13728_p13 }
  0x47   :  { %13738 = shalt.err (!%p13735_p3)
}
  0x48   :  { %s13939_s5 = smov 128   ;;  %s13940_s26 = smov 8  }
  0x49   :  { %111 = dma.hbm_to_vmem [thread:$0]  %s14399_s7, 2048, %s106_s21, [#allocation15], %s13939_s5, %s13939_s5, %s13940_s26  }
  0x4a   :  { %s13941_s12 = smov [#allocation2]   ;;  %s13942_s15 = smov [#allocation7]  }
  0x4b   :  { %s30_s14 = sshll.u32 %s13941_s12, 4  ;;  %s52_s16 = sshll.u32 %s13942_s15, 4  ;;  %s31_s14 = int_to_ptr.vmem [resolvable:$true] %s30_s14  ;;  %s53_s16 = int_to_ptr.vmem [resolvable:$true] %s52_s16 }
  0x4c   :  { %s13739_s17 = scalar_lea.hbm %s14392_s0, 384 }
  0x4d   :  { %p13740_p4 = scmp.ne.s32.totalorder %s14392_s0, %s13739_s17  ;;  %p13743_p5 = scmp.lt.u32.totalorder %s13739_s17, %s14392_s0 }
  0x4f   :  { %p13745_p6 = pnand %p13743_p5, %p13740_p4 }
  0x51   :  { %13748 = shalt.err (!%p13745_p6)
}
  0x52   :  { %s13749_s7 = scalar_lea.vmem %s31_s14, 384  ;;  %p13754_p8 = scmp.lt.s32.totalorder %s31_s14, %s31_s14 }
  0x53   :  { %p13750_p7 = scmp.ne.s32.totalorder %s31_s14, %s13749_s7  ;;  %p13755_p9 = scmp.lt.s32.totalorder %s13749_s7, %s13749_s7 }
  0x55   :  { %p13756_p10 = por %p13755_p9, %p13754_p8 }
  0x57   :  { %p13757_p11 = pnand %p13756_p10, %p13750_p7 }
  0x59   :  { %13760 = shalt.err (!%p13757_p11)
}
  0x5a   :  { %33 = dma.hbm_to_vmem [thread:$0]  %s14392_s0, 384, %s31_s14, [#allocation3]  }
  0x5b   :  { %s13761_s25 = scalar_lea.hbm %s14394_s2, 352 }
  0x5c   :  { %p13762_p12 = scmp.ne.s32.totalorder %s14394_s2, %s13761_s25  ;;  %p13765_p13 = scmp.lt.u32.totalorder %s13761_s25, %s14394_s2 }
  0x5e   :  { %p13767_p0 = pnand %p13765_p13, %p13762_p12 }
  0x60   :  { %13770 = shalt.err (!%p13767_p0)
}
  0x61   :  { %s13771_s29 = scalar_lea.vmem %s53_s16, 352  ;;  %p13776_p2 = scmp.lt.s32.totalorder %s53_s16, %s53_s16 }
  0x62   :  { %p13772_p1 = scmp.ne.s32.totalorder %s53_s16, %s13771_s29  ;;  %p13777_p3 = scmp.lt.s32.totalorder %s13771_s29, %s13771_s29 }
  0x64   :  { %p13778_p4 = por %p13777_p3, %p13776_p2 }
  0x66   :  { %p13779_p5 = pnand %p13778_p4, %p13772_p1 }
  0x68   :  { %13782 = shalt.err (!%p13779_p5)
}
  0x69   :  { %55 = dma.hbm_to_vmem [thread:$0]  %s14394_s2, 352, %s53_s16, [#allocation6]  }
  0x6a   :  { %s13943_s12 = smov [#allocation10]   ;;  %s13944_s15 = smov [#allocation13]  }
  0x6b   :  { %s74_s14 = sshll.u32 %s13943_s12, 4  ;;  %s96_s3 = sshll.u32 %s13944_s15, 4  ;;  %s75_s14 = int_to_ptr.vmem [resolvable:$true] %s74_s14  ;;  %s97_s3 = int_to_ptr.vmem [resolvable:$true] %s96_s3 }
  0x6c   :  { %s13783_s19 = scalar_lea.hbm %s14396_s4, 16 }
  0x6d   :  { %p13784_p6 = scmp.ne.s32.totalorder %s14396_s4, %s13783_s19  ;;  %p13787_p7 = scmp.lt.u32.totalorder %s13783_s19, %s14396_s4 }
  0x6f   :  { %p13789_p8 = pnand %p13787_p7, %p13784_p6 }
  0x71   :  { %13792 = shalt.err (!%p13789_p8)
}
  0x72   :  { %s13793_s2 = scalar_lea.vmem %s75_s14, 16  ;;  %s13797_s16 = scalar_lea.vmem %s75_s14, 32 }
  0x73   :  { %p13794_p9 = scmp.ne.s32.totalorder %s75_s14, %s13793_s2  ;;  %p13798_p10 = scmp.lt.s32.totalorder %s75_s14, %s75_s14 }
  0x74   :  { %p13799_p11 = scmp.lt.s32.totalorder %s13797_s16, %s13793_s2 }
  0x76   :  { %p13800_p12 = por %p13799_p11, %p13798_p10 }
  0x78   :  { %p13801_p13 = pnand %p13800_p12, %p13794_p9 }
  0x7a   :  { %13804 = shalt.err (!%p13801_p13)
}
  0x7b   :  { %77 = dma.hbm_to_vmem [thread:$0]  %s14396_s4, 16, %s75_s14, [#allocation9]  }
  0x7c   :  { %s13805_s25 = scalar_lea.hbm %s14398_s6, 32 }
  0x7d   :  { %p13806_p0 = scmp.ne.s32.totalorder %s14398_s6, %s13805_s25  ;;  %p13809_p1 = scmp.lt.u32.totalorder %s13805_s25, %s14398_s6 }
  0x7f   :  { %p13811_p2 = pnand %p13809_p1, %p13806_p0 }
  0x81   :  { %13814 = shalt.err (!%p13811_p2)
}
  0x82   :  { %s13815_s29 = scalar_lea.vmem %s97_s3, 32  ;;  %p13820_p4 = scmp.lt.s32.totalorder %s97_s3, %s97_s3 }
  0x83   :  { %p13816_p3 = scmp.ne.s32.totalorder %s97_s3, %s13815_s29  ;;  %p13821_p5 = scmp.lt.s32.totalorder %s13815_s29, %s13815_s29 }
  0x85   :  { %p13822_p6 = por %p13821_p5, %p13820_p4 }
  0x87   :  { %p13823_p7 = pnand %p13822_p6, %p13816_p3 }
  0x89   :  { %13826 = shalt.err (!%p13823_p7)
}
  0x8a   :  { %99 = dma.hbm_to_vmem [thread:$0]  %s14398_s6, 32, %s97_s3, [#allocation12]  }
  0x8b   :  { %s13945_s30 = smov [#allocation16]   ;;  %s13827_s13 = scalar_lea.hbm %s14400_s8, 16 }
  0x8c   :  { %s118_s12 = sshll.u32 %s13945_s30, 4  ;;  %p13828_p8 = scmp.ne.s32.totalorder %s14400_s8, %s13827_s13  ;;  %s119_s12 = int_to_ptr.vmem [resolvable:$true] %s118_s12 }
  0x8d   :  { %p13831_p9 = scmp.lt.u32.totalorder %s13827_s13, %s14400_s8 }
  0x8f   :  { %p13833_p10 = pnand %p13831_p9, %p13828_p8 }
  0x91   :  { %13836 = shalt.err (!%p13833_p10)
}
  0x92   :  { %s13837_s1 = scalar_lea.vmem %s119_s12, 16  ;;  %s13841_s6 = scalar_lea.vmem %s119_s12, 32 }
  0x93   :  { %p13838_p11 = scmp.ne.s32.totalorder %s119_s12, %s13837_s1  ;;  %p13842_p12 = scmp.lt.s32.totalorder %s119_s12, %s119_s12 }
  0x94   :  { %p13843_p13 = scmp.lt.s32.totalorder %s13841_s6, %s13837_s1 }
  0x96   :  { %p13844_p0 = por %p13843_p13, %p13842_p12 }
  0x98   :  { %p13845_p1 = pnand %p13844_p0, %p13838_p11 }
  0x9a   :  { %13848 = shalt.err (!%p13845_p1)
}
  0x9b   :  { %121 = dma.hbm_to_vmem [thread:$0]  %s14400_s8, 16, %s119_s12, [#allocation15]  }
  0x9c   :  { %13915 = dma.done.wait [#allocation3], 384  }
  0x9d   :  { %13916 = vsyncadd [#allocation3], 4294966912 }
  0x9e   :  { %13917 = dma.done.wait [#allocation6], 135520  }
  0x9f   :  { %13918 = vsyncadd [#allocation6], 4294831776 }
  0xa0   :  { %13919 = dma.done.wait [#allocation9], 22544  }
  0xa1   :  { %13920 = vsyncadd [#allocation9], 4294944752 }
  0xa2   :  { %13921 = dma.done.wait [#allocation12], 4128  }
  0xa3   :  { %13922 = vsyncadd [#allocation12], 4294963168 }
  0xa4   :  { %13923 = dma.done.wait [#allocation15], 2064  }
  0xa5   :  { %13924 = vsyncadd [#allocation15], 4294965232  ;;  %v11877_v0 = vld [vmem:[#allocation5 + $0x4] ss:$88 sps:$4 sm:$0xff]   ;;  %v11881_v2 = vld [vmem:[#allocation5] ss:$88 sps:$4 sm:$0xff]  }
  0xa6   :  { %v11879_v1 = vld [vmem:[#allocation5 + $0xc] ss:$88 sps:$4 sm:$0xff]   ;;  %6626 = vmatprep.subr.bf16.mxu0 %v11877_v0  ;;  %v11882_v3 = vld [vmem:[#allocation5 + $0x8] ss:$88 sps:$4 sm:$0xff]   ;;  %v11885_v5 = vld [vmem:[#allocation5 + $0xbc] ss:$88 sps:$4 sm:$0xff]  }
  0xa7   :  { %6749 = vmatprep.subr.bf16.mxu1 %v11879_v1  ;;  %v11883_v4 = vld [vmem:[#allocation5 + $0xb4] ss:$88 sps:$4 sm:$0xff]   ;;  %6627 = vmatpush1.bf16.msra.mxu0 %v11881_v2  ;;  %v11887_v6 = vld [vmem:[#allocation5 + $0xb0] ss:$88 sps:$4 sm:$0xff]   ;;  %v11889_v8 = vld [vmem:[#allocation5 + $0x164] ss:$88 sps:$4 sm:$0xff]  }
  0xa8   :  { %6750 = vmatpush1.bf16.msra.mxu1 %v11882_v3  ;;  %6628 = vmatprep.subr.bf16.mxu0 %v11883_v4  ;;  %v11888_v7 = vld [vmem:[#allocation5 + $0xb8] ss:$88 sps:$4 sm:$0xff]   ;;  %v11891_v9 = vld [vmem:[#allocation5 + $0x16c] ss:$88 sps:$4 sm:$0xff]   ;;  %v11894_v11 = vld [vmem:[#allocation5 + $0x168] ss:$88 sps:$4 sm:$0xff]  }
  0xa9   :  { %6751 = vmatprep.subr.bf16.mxu1 %v11885_v5  ;;  %v11893_v10 = vld [vmem:[#allocation5 + $0x160] ss:$88 sps:$4 sm:$0xff]   ;;  %v11895_v12 = vld [vmem:[#allocation5 + $0x214] ss:$88 sps:$4 sm:$0xff]   ;;  %v11899_v14 = vld [vmem:[#allocation5 + $0x210] ss:$88 sps:$4 sm:$0xff]  }
  0xaa   :  { %v11897_v13 = vld [vmem:[#allocation5 + $0x21c] ss:$88 sps:$4 sm:$0xff]   ;;  %v11900_v15 = vld [vmem:[#allocation5 + $0x218] ss:$88 sps:$4 sm:$0xff]   ;;  %v11903_v17 = vld [vmem:[#allocation5 + $0x2cc] ss:$88 sps:$4 sm:$0xff]  }
  0xab   :  { %6629 = vmatpush1.bf16.msra.mxu0 %v11887_v6  ;;  %v11901_v16 = vld [vmem:[#allocation5 + $0x2c4] ss:$88 sps:$4 sm:$0xff]   ;;  %v11905_v18 = vld [vmem:[#allocation5 + $0x2c0] ss:$88 sps:$4 sm:$0xff]   ;;  %v11907_v20 = vld [vmem:[#allocation5 + $0x374] ss:$88 sps:$4 sm:$0xff]  }
  0xac   :  { %6752 = vmatpush1.bf16.msra.mxu1 %v11888_v7  ;;  %6630 = vmatprep.subr.bf16.mxu0 %v11889_v8  ;;  %v11906_v19 = vld [vmem:[#allocation5 + $0x2c8] ss:$88 sps:$4 sm:$0xff]   ;;  %v11909_v21 = vld [vmem:[#allocation5 + $0x37c] ss:$88 sps:$4 sm:$0xff]   ;;  %v11912_v23 = vld [vmem:[#allocation5 + $0x378] ss:$88 sps:$4 sm:$0xff]  }
  0xad   :  { %6753 = vmatprep.subr.bf16.mxu1 %v11891_v9  ;;  %v11911_v22 = vld [vmem:[#allocation5 + $0x370] ss:$88 sps:$4 sm:$0xff]   ;;  %v11913_v24 = vld [vmem:[#allocation5 + $0x424] ss:$88 sps:$4 sm:$0xff]   ;;  %v11917_v26 = vld [vmem:[#allocation5 + $0x420] ss:$88 sps:$4 sm:$0xff]  }
  0xae   :  { %v11915_v25 = vld [vmem:[#allocation5 + $0x42c] ss:$88 sps:$4 sm:$0xff]   ;;  %v11918_v27 = vld [vmem:[#allocation5 + $0x428] ss:$88 sps:$4 sm:$0xff]   ;;  %v11921_v29 = vld [vmem:[#allocation5 + $0x4dc] ss:$88 sps:$4 sm:$0xff]  }
  0xaf   :  { %6631 = vmatpush1.bf16.msra.mxu0 %v11893_v10  ;;  %v11919_v28 = vld [vmem:[#allocation5 + $0x4d4] ss:$88 sps:$4 sm:$0xff]   ;;  %v11923_v30 = vld [vmem:[#allocation5 + $0x4d0] ss:$88 sps:$4 sm:$0xff]   ;;  %v11925_v32 = vld [vmem:[#allocation5 + $0x584] ss:$88 sps:$4 sm:$0xff]  }
  0xb0   :  { %6754 = vmatpush1.bf16.msra.mxu1 %v11894_v11  ;;  %6632 = vmatprep.subr.bf16.mxu0 %v11895_v12  ;;  %v11924_v31 = vld [vmem:[#allocation5 + $0x4d8] ss:$88 sps:$4 sm:$0xff]   ;;  %v11927_v33 = vld [vmem:[#allocation5 + $0x58c] ss:$88 sps:$4 sm:$0xff]   ;;  %v11930_v35 = vld [vmem:[#allocation5 + $0x588] ss:$88 sps:$4 sm:$0xff]  }
  0xb1   :  { %6755 = vmatprep.subr.bf16.mxu1 %v11897_v13  ;;  %v11929_v34 = vld [vmem:[#allocation5 + $0x580] ss:$88 sps:$4 sm:$0xff]   ;;  %v11931_v36 = vld [vmem:[#allocation5 + $0x634] ss:$88 sps:$4 sm:$0xff]   ;;  %v11935_v38 = vld [vmem:[#allocation5 + $0x630] ss:$88 sps:$4 sm:$0xff]  }
  0xb2   :  { %v11933_v37 = vld [vmem:[#allocation5 + $0x63c] ss:$88 sps:$4 sm:$0xff]   ;;  %v11936_v39 = vld [vmem:[#allocation5 + $0x638] ss:$88 sps:$4 sm:$0xff]   ;;  %v11939_v41 = vld [vmem:[#allocation5 + $0x6ec] ss:$88 sps:$4 sm:$0xff]  }
  0xb3   :  { %6633 = vmatpush1.bf16.msra.mxu0 %v11899_v14  ;;  %v11937_v40 = vld [vmem:[#allocation5 + $0x6e4] ss:$88 sps:$4 sm:$0xff]   ;;  %v11941_v42 = vld [vmem:[#allocation5 + $0x6e0] ss:$88 sps:$4 sm:$0xff]   ;;  %v11943_v44 = vld [vmem:[#allocation5 + $0x794] ss:$88 sps:$4 sm:$0xff]  }
  0xb4   :  { %6756 = vmatpush1.bf16.msra.mxu1 %v11900_v15  ;;  %6634 = vmatprep.subr.bf16.mxu0 %v11901_v16  ;;  %v11942_v43 = vld [vmem:[#allocation5 + $0x6e8] ss:$88 sps:$4 sm:$0xff]   ;;  %v11945_v45 = vld [vmem:[#allocation5 + $0x79c] ss:$88 sps:$4 sm:$0xff]   ;;  %v11948_v49 = vld [vmem:[#allocation5 + $0x798] ss:$88 sps:$4 sm:$0xff]  }
  0xb5   :  { %6757 = vmatprep.subr.bf16.mxu1 %v11903_v17  ;;  %v150_v46 = vld [vmem:[#allocation2] sm:$0xff]  ;;  %v11949_v50 = vld [vmem:[#allocation5 + $0x844] ss:$88 sps:$4 sm:$0xff]   ;;  %v11953_v52 = vld [vmem:[#allocation5 + $0x840] ss:$88 sps:$4 sm:$0xff]   ;;  %vm13948_vm0 = vmmov 0  }
  0xb6   :  { %v11947_v47 = vld [vmem:[#allocation5 + $0x790] ss:$88 sps:$4 sm:$0xff]   ;;  %v14120_v48 = vcombine.high %v150_v46, %v150_v46  ;;  %v11951_v51 = vld [vmem:[#allocation5 + $0x84c] ss:$88 sps:$4 sm:$0xff]   ;;  %v11957_v55 = vld [vmem:[#allocation5 + $0x8fc] ss:$88 sps:$4 sm:$0xff]   ;;  %v14124_v5 = vcombine.low %v150_v46, %v150_v46 }
  0xb7   :  { %6635 = vmatpush1.bf16.msra.mxu0 %v11905_v18  ;;  %v11954_v53 = vld [vmem:[#allocation5 + $0x848] ss:$88 sps:$4 sm:$0xff]   ;;  %v11955_v54 = vld [vmem:[#allocation5 + $0x8f4] ss:$88 sps:$4 sm:$0xff]   ;;  %v11960_v57 = vld [vmem:[#allocation5 + $0x8f8] ss:$88 sps:$4 sm:$0xff]  }
  0xb8   :  { %6758 = vmatpush1.bf16.msra.mxu1 %v11906_v19  ;;  %6636 = vmatprep.subr.bf16.mxu0 %v11907_v20  ;;  %v11959_v56 = vld [vmem:[#allocation5 + $0x8f0] ss:$88 sps:$4 sm:$0xff]   ;;  %v11961_v58 = vld [vmem:[#allocation5 + $0x9a4] ss:$88 sps:$4 sm:$0xff]   ;;  %v11965_v60 = vld [vmem:[#allocation5 + $0x9a0] ss:$88 sps:$4 sm:$0xff]  }
  0xb9   :  { %6759 = vmatprep.subr.bf16.mxu1 %v11909_v21  ;;  %6658 = vmatprep.mubr.bf16.mxu0 %v14120_v48  ;;  %v11963_v59 = vld [vmem:[#allocation5 + $0x9ac] ss:$88 sps:$4 sm:$0xff]   ;;  %v11966_v61 = vld [vmem:[#allocation5 + $0x9a8] ss:$88 sps:$4 sm:$0xff]   ;;  %v11969_v63 = vld [vmem:[#allocation5 + $0xa5c] ss:$88 sps:$4 sm:$0xff]  }
  0xba   :  { %6781 = vmatprep.mubr.bf16.mxu1 %v14120_v48  ;;  %v11967_v62 = vld [vmem:[#allocation5 + $0xa54] ss:$88 sps:$4 sm:$0xff]   ;;  %v11971_v0 = vld [vmem:[#allocation5 + $0xa50] ss:$88 sps:$4 sm:$0xff]   ;;  %v11976_v2 = vld [vmem:[#allocation5 + $0xb04] ss:$88 sps:$4 sm:$0xff]  }
  0xbb   :  { %6637 = vmatpush1.bf16.msra.mxu0 %v11911_v22  ;;  %v11972_v1 = vld [vmem:[#allocation5 + $0xa58] ss:$88 sps:$4 sm:$0xff]   ;;  %v11979_v3 = vld [vmem:[#allocation5 + $0xb0c] ss:$88 sps:$4 sm:$0xff]   ;;  %v11977_v6 = vld [vmem:[#allocation5 + $0xb08] ss:$88 sps:$4 sm:$0xff]  }
  0xbc   :  { %6760 = vmatpush1.bf16.msra.mxu1 %v11912_v23  ;;  %6638 = vmatprep.subr.bf16.mxu0 %v11913_v24  ;;  %v11974_v4 = vld [vmem:[#allocation5 + $0xb00] ss:$88 sps:$4 sm:$0xff]   ;;  %v11983_v7 = vld [vmem:[#allocation5 + $0xbb4] ss:$88 sps:$4 sm:$0xff]   ;;  %v11981_v9 = vld [vmem:[#allocation5 + $0xbb0] ss:$88 sps:$4 sm:$0xff]  }
  0xbd   :  { %6761 = vmatprep.subr.bf16.mxu1 %v11915_v25  ;;  %v11986_v8 = vld [vmem:[#allocation5 + $0xbbc] ss:$88 sps:$4 sm:$0xff]   ;;  %v11984_v10 = vld [vmem:[#allocation5 + $0xbb8] ss:$88 sps:$4 sm:$0xff]   ;;  %v11992_v12 = vld [vmem:[#allocation5 + $0xc6c] ss:$88 sps:$4 sm:$0xff]  }
  0xbe   :  { %v11989_v11 = vld [vmem:[#allocation5 + $0xc64] ss:$88 sps:$4 sm:$0xff]   ;;  %v11987_v13 = vld [vmem:[#allocation5 + $0xc60] ss:$88 sps:$4 sm:$0xff]   ;;  %v11995_v15 = vld [vmem:[#allocation5 + $0xd14] ss:$88 sps:$4 sm:$0xff]  }
  0xbf   :  { %6639 = vmatpush1.bf16.msra.mxu0 %v11917_v26  ;;  %v11990_v14 = vld [vmem:[#allocation5 + $0xc68] ss:$88 sps:$4 sm:$0xff]   ;;  %v11998_v16 = vld [vmem:[#allocation5 + $0xd1c] ss:$88 sps:$4 sm:$0xff]   ;;  %v11996_v18 = vld [vmem:[#allocation5 + $0xd18] ss:$88 sps:$4 sm:$0xff]  }
  0xc0   :  { %6762 = vmatpush1.bf16.msra.mxu1 %v11918_v27  ;;  %6640 = vmatprep.subr.bf16.mxu0 %v11919_v28  ;;  %v11993_v17 = vld [vmem:[#allocation5 + $0xd10] ss:$88 sps:$4 sm:$0xff]   ;;  %v12001_v19 = vld [vmem:[#allocation5 + $0xdc4] ss:$88 sps:$4 sm:$0xff]   ;;  %v11999_v21 = vld [vmem:[#allocation5 + $0xdc0] ss:$88 sps:$4 sm:$0xff]  }
  0xc1   :  { %6763 = vmatprep.subr.bf16.mxu1 %v11921_v29  ;;  %v12004_v20 = vld [vmem:[#allocation5 + $0xdcc] ss:$88 sps:$4 sm:$0xff]   ;;  %v12002_v22 = vld [vmem:[#allocation5 + $0xdc8] ss:$88 sps:$4 sm:$0xff]   ;;  %v12010_v24 = vld [vmem:[#allocation5 + $0xe7c] ss:$88 sps:$4 sm:$0xff]  }
  0xc2   :  { %v12007_v23 = vld [vmem:[#allocation5 + $0xe74] ss:$88 sps:$4 sm:$0xff]   ;;  %v12005_v25 = vld [vmem:[#allocation5 + $0xe70] ss:$88 sps:$4 sm:$0xff]   ;;  %v12013_v27 = vld [vmem:[#allocation5 + $0xf24] ss:$88 sps:$4 sm:$0xff]  }
  0xc3   :  { %6641 = vmatpush1.bf16.msra.mxu0 %v11923_v30  ;;  %v12008_v26 = vld [vmem:[#allocation5 + $0xe78] ss:$88 sps:$4 sm:$0xff]   ;;  %v12016_v28 = vld [vmem:[#allocation5 + $0xf2c] ss:$88 sps:$4 sm:$0xff]   ;;  %s13949_s8 = smov [#allocation18]   ;;  %s13950_s16 = smov [#allocation20]  }
  0xc4   :  { %6764 = vmatpush1.bf16.msra.mxu1 %v11924_v31  ;;  %6642 = vmatprep.subr.bf16.mxu0 %v11925_v32  ;;  %v14128_v29 = vld [vmem:[#allocation2 + $0x8] sm:$0xff]  ;;  %v12011_v31 = vld [vmem:[#allocation5 + $0xf20] ss:$88 sps:$4 sm:$0xff]   ;;  %v12040_v46 = vld [vmem:[#allocation5 + $0x11ec] ss:$88 sps:$4 sm:$0xff]   ;;  %s10124_s2 = sshll.u32 %s13949_s8, 4  ;;  %s10125_s2 = int_to_ptr.vmem [resolvable:$true] %s10124_s2 }
  0xc5   :  { %6765 = vmatprep.subr.bf16.mxu1 %v11927_v33  ;;  %v14132_v30 = vcombine.high %v14128_v29, %v14128_v29  ;;  %v12014_v32 = vld [vmem:[#allocation5 + $0xf28] ss:$88 sps:$4 sm:$0xff]   ;;  %v12019_v33 = vld [vmem:[#allocation5 + $0xfd4] ss:$88 sps:$4 sm:$0xff]   ;;  %s10134_s21 = sshll.u32 %s13950_s16, 4  ;;  %s13951_s18 = smov [#allocation17]   ;;  %s14342_s21 = int_to_ptr.vmem [resolvable:$true] %s10134_s21 }
  0xc6   :  { %s10114_s23 = sshll.u32 %s13951_s18, 4  ;;  %s13849_s24 = scalar_lea.vmem %s10125_s2, 128  ;;  %s14344_s23 = int_to_ptr.vmem [resolvable:$true] %s10114_s23 }
  0xc7   :  { %6643 = vmatpush1.bf16.msra.mxu0 %v11929_v34  ;;  %v12022_v34 = vld [vmem:[#allocation5 + $0xfdc] ss:$88 sps:$4 sm:$0xff]   ;;  %p13850_p2 = scmp.ne.s32.totalorder %s10125_s2, %s13849_s24  ;;  %p13854_p3 = scmp.lt.s32.totalorder %s10125_s2, %s10125_s2 }
  0xc8   :  { %6766 = vmatpush1.bf16.msra.mxu1 %v11930_v35  ;;  %6644 = vmatprep.subr.bf16.mxu0 %v11931_v36  ;;  %v12017_v35 = vld [vmem:[#allocation5 + $0xfd0] ss:$88 sps:$4 sm:$0xff]   ;;  %p13855_p4 = scmp.lt.s32.totalorder %s13849_s24, %s13849_s24 }
  0xc9   :  { %6767 = vmatprep.subr.bf16.mxu1 %v11933_v37  ;;  %v12020_v36 = vld [vmem:[#allocation5 + $0xfd8] ss:$88 sps:$4 sm:$0xff]   ;;  %v12025_v37 = vld [vmem:[#allocation5 + $0x1084] ss:$88 sps:$4 sm:$0xff]  }
  0xca   :  { %p13856_p5 = por %p13855_p4, %p13854_p3 }
  0xcb   :  { %6645 = vmatpush1.bf16.msra.mxu0 %v11935_v38  ;;  %v12028_v38 = vld [vmem:[#allocation5 + $0x108c] ss:$88 sps:$4 sm:$0xff]  }
  0xcc   :  { %6768 = vmatpush1.bf16.msra.mxu1 %v11936_v39  ;;  %6646 = vmatprep.subr.bf16.mxu0 %v11937_v40  ;;  %v12023_v39 = vld [vmem:[#allocation5 + $0x1080] ss:$88 sps:$4 sm:$0xff]   ;;  %p13857_p6 = pnand %p13856_p5, %p13850_p2 }
  0xcd   :  { %6769 = vmatprep.subr.bf16.mxu1 %v11939_v41  ;;  %v12026_v40 = vld [vmem:[#allocation5 + $0x1088] ss:$88 sps:$4 sm:$0xff]   ;;  %v12031_v41 = vld [vmem:[#allocation5 + $0x1134] ss:$88 sps:$4 sm:$0xff]  }
  0xcf   :  { %6647 = vmatpush1.bf16.msra.mxu0 %v11941_v42  ;;  %v12034_v42 = vld [vmem:[#allocation5 + $0x113c] ss:$88 sps:$4 sm:$0xff]  }
  0xd0   :  { %6770 = vmatpush1.bf16.msra.mxu1 %v11942_v43  ;;  %6648 = vmatprep.subr.bf16.mxu0 %v11943_v44  ;;  %v12029_v43 = vld [vmem:[#allocation5 + $0x1130] ss:$88 sps:$4 sm:$0xff]  }
  0xd1   :  { %6771 = vmatprep.subr.bf16.mxu1 %v11945_v45  ;;  %v12032_v44 = vld [vmem:[#allocation5 + $0x1138] ss:$88 sps:$4 sm:$0xff]   ;;  %v12037_v45 = vld [vmem:[#allocation5 + $0x11e4] ss:$88 sps:$4 sm:$0xff]  }
  0xd3   :  { %6649 = vmatpush1.bf16.msra.mxu0 %v11947_v47  ;;  %v12035_v47 = vld [vmem:[#allocation5 + $0x11e0] ss:$88 sps:$4 sm:$0xff]  }
  0xd4   :  { %6772 = vmatpush1.bf16.msra.mxu1 %v11948_v49  ;;  %6650 = vmatprep.subr.bf16.mxu0 %v11949_v50  ;;  %v12038_v49 = vld [vmem:[#allocation5 + $0x11e8] ss:$88 sps:$4 sm:$0xff]   ;;  %v12043_v50 = vld [vmem:[#allocation5 + $0x1294] ss:$88 sps:$4 sm:$0xff]  }
  0xd5   :  { %6773 = vmatprep.subr.bf16.mxu1 %v11951_v51  ;;  %v12046_v51 = vld [vmem:[#allocation5 + $0x129c] ss:$88 sps:$4 sm:$0xff]  }
  0xd7   :  { %6651 = vmatpush1.bf16.msra.mxu0 %v11953_v52  ;;  %v12041_v52 = vld [vmem:[#allocation5 + $0x1290] ss:$88 sps:$4 sm:$0xff]  }
  0xd8   :  { %6774 = vmatpush1.bf16.msra.mxu1 %v11954_v53  ;;  %6652 = vmatprep.subr.bf16.mxu0 %v11955_v54  ;;  %v12044_v53 = vld [vmem:[#allocation5 + $0x1298] ss:$88 sps:$4 sm:$0xff]   ;;  %v12049_v54 = vld [vmem:[#allocation5 + $0x1344] ss:$88 sps:$4 sm:$0xff]  }
  0xd9   :  { %6775 = vmatprep.subr.bf16.mxu1 %v11957_v55  ;;  %v12052_v55 = vld [vmem:[#allocation5 + $0x134c] ss:$88 sps:$4 sm:$0xff]  }
  0xdb   :  { %6653 = vmatpush1.bf16.msra.mxu0 %v11959_v56  ;;  %v12047_v56 = vld [vmem:[#allocation5 + $0x1340] ss:$88 sps:$4 sm:$0xff]  }
  0xdc   :  { %6776 = vmatpush1.bf16.msra.mxu1 %v11960_v57  ;;  %6654 = vmatprep.subr.bf16.mxu0 %v11961_v58  ;;  %v12050_v57 = vld [vmem:[#allocation5 + $0x1348] ss:$88 sps:$4 sm:$0xff]   ;;  %v12055_v58 = vld [vmem:[#allocation5 + $0x13f4] ss:$88 sps:$4 sm:$0xff]  }
  0xdd   :  { %6777 = vmatprep.subr.bf16.mxu1 %v11963_v59  ;;  %v12058_v59 = vld [vmem:[#allocation5 + $0x13fc] ss:$88 sps:$4 sm:$0xff]  }
  0xdf   :  { %6655 = vmatpush1.bf16.msra.mxu0 %v11965_v60  ;;  %v12053_v60 = vld [vmem:[#allocation5 + $0x13f0] ss:$88 sps:$4 sm:$0xff]  }
  0xe0   :  { %6778 = vmatpush1.bf16.msra.mxu1 %v11966_v61  ;;  %6656 = vmatprep.subr.bf16.mxu0 %v11967_v62  ;;  %v12056_v61 = vld [vmem:[#allocation5 + $0x13f8] ss:$88 sps:$4 sm:$0xff]   ;;  %v12061_v62 = vld [vmem:[#allocation5 + $0x14a4] ss:$88 sps:$4 sm:$0xff]  }
  0xe1   :  { %6779 = vmatprep.subr.bf16.mxu1 %v11969_v63  ;;  %v12064_v63 = vld [vmem:[#allocation5 + $0x14ac] ss:$88 sps:$4 sm:$0xff]  }
  0xe3   :  { %6657 = vmatpush1.bf16.msra.mxu0 %v11971_v0  ;;  %v12059_v0 = vld [vmem:[#allocation5 + $0x14a0] ss:$88 sps:$4 sm:$0xff]  }
  0xe4   :  { %6780 = vmatpush1.bf16.msra.mxu1 %v11972_v1  ;;  %6667 = vmatprep.subr.bf16.mxu0 %v11976_v2  ;;  %v12062_v1 = vld [vmem:[#allocation5 + $0x14a8] ss:$88 sps:$4 sm:$0xff]   ;;  %v12067_v2 = vld [vmem:[#allocation5 + $0x1554] ss:$88 sps:$4 sm:$0xff]  }
  0xe5   :  { %6790 = vmatprep.subr.bf16.mxu1 %v11979_v3  ;;  %v12070_v3 = vld [vmem:[#allocation5 + $0x155c] ss:$88 sps:$4 sm:$0xff]  }
  0xe6   :  { %6659 = vmatmul.mubr.bf16.vlgmr.msra.gmra.mrb[0].mxu0 %v14124_v5 }
  0xe7   :  { %6782 = vmatmul.mubr.bf16.vlgmr.msra.gmra.mrb[0].mxu1 %v14124_v5  ;;  %6668 = vmatpush1.bf16.msra.mxu0 %v11974_v4  ;;  %v12065_v4 = vld [vmem:[#allocation5 + $0x1550] ss:$88 sps:$4 sm:$0xff]  }
  0xe8   :  { %6791 = vmatpush1.bf16.msra.mxu1 %v11977_v6  ;;  %6669 = vmatprep.subr.bf16.mxu0 %v11983_v7  ;;  %v12068_v6 = vld [vmem:[#allocation5 + $0x1558] ss:$88 sps:$4 sm:$0xff]   ;;  %v12074_v7 = vld [vmem:[#allocation5 + $0x1604] ss:$88 sps:$4 sm:$0xff]  }
  0xe9   :  { %6792 = vmatprep.subr.bf16.mxu1 %v11986_v8  ;;  %6699 = vmatprep.mubr.bf16.mxu0 %v14132_v30  ;;  %v12077_v8 = vld [vmem:[#allocation5 + $0x160c] ss:$88 sps:$4 sm:$0xff]  }
  0xea   :  { %6822 = vmatprep.mubr.bf16.mxu1 %v14132_v30 }
  0xeb   :  { %6670 = vmatpush1.bf16.msra.mxu0 %v11981_v9  ;;  %v12072_v9 = vld [vmem:[#allocation5 + $0x1600] ss:$88 sps:$4 sm:$0xff]  }
  0xec   :  { %6793 = vmatpush1.bf16.msra.mxu1 %v11984_v10  ;;  %6671 = vmatprep.subr.bf16.mxu0 %v11989_v11  ;;  %v14138_v10 = vcombine.low %v14128_v29, %v14128_v29  ;;  %v12075_v11 = vld [vmem:[#allocation5 + $0x1608] ss:$88 sps:$4 sm:$0xff]  }
  0xed   :  { %6794 = vmatprep.subr.bf16.mxu1 %v11992_v12  ;;  %v12081_v12 = vld [vmem:[#allocation5 + $0x16b4] ss:$88 sps:$4 sm:$0xff]   ;;  %v12100_v29 = vld [vmem:[#allocation5 + $0x18c8] ss:$88 sps:$4 sm:$0xff]  }
  0xef   :  { %6672 = vmatpush1.bf16.msra.mxu0 %v11987_v13  ;;  %v14140_v13 = vld [vmem:[#allocation2 + $0x10] sm:$0xff] }
  0xf0   :  { %6795 = vmatpush1.bf16.msra.mxu1 %v11990_v14  ;;  %6673 = vmatprep.subr.bf16.mxu0 %v11995_v15  ;;  %v12084_v14 = vld [vmem:[#allocation5 + $0x16bc] ss:$88 sps:$4 sm:$0xff]   ;;  %v14144_v15 = vcombine.high %v14140_v13, %v14140_v13 }
  0xf1   :  { %6796 = vmatprep.subr.bf16.mxu1 %v11998_v16  ;;  %v12079_v16 = vld [vmem:[#allocation5 + $0x16b0] ss:$88 sps:$4 sm:$0xff]  }
  0xf3   :  { %6674 = vmatpush1.bf16.msra.mxu0 %v11993_v17  ;;  %v12082_v17 = vld [vmem:[#allocation5 + $0x16b8] ss:$88 sps:$4 sm:$0xff]  }
  0xf4   :  { %6797 = vmatpush1.bf16.msra.mxu1 %v11996_v18  ;;  %6675 = vmatprep.subr.bf16.mxu0 %v12001_v19  ;;  %v12087_v18 = vld [vmem:[#allocation5 + $0x1764] ss:$88 sps:$4 sm:$0xff]  }
  0xf5   :  { %6798 = vmatprep.subr.bf16.mxu1 %v12004_v20  ;;  %v12090_v19 = vld [vmem:[#allocation5 + $0x176c] ss:$88 sps:$4 sm:$0xff]   ;;  %v12085_v20 = vld [vmem:[#allocation5 + $0x1760] ss:$88 sps:$4 sm:$0xff]  }
  0xf7   :  { %6676 = vmatpush1.bf16.msra.mxu0 %v11999_v21  ;;  %v12088_v21 = vld [vmem:[#allocation5 + $0x1768] ss:$88 sps:$4 sm:$0xff]  }
  0xf8   :  { %6799 = vmatpush1.bf16.msra.mxu1 %v12002_v22  ;;  %6677 = vmatprep.subr.bf16.mxu0 %v12007_v23  ;;  %v12093_v22 = vld [vmem:[#allocation5 + $0x1814] ss:$88 sps:$4 sm:$0xff]  }
  0xf9   :  { %6800 = vmatprep.subr.bf16.mxu1 %v12010_v24  ;;  %v12096_v23 = vld [vmem:[#allocation5 + $0x181c] ss:$88 sps:$4 sm:$0xff]   ;;  %v12091_v24 = vld [vmem:[#allocation5 + $0x1810] ss:$88 sps:$4 sm:$0xff]  }
  0xfb   :  { %6678 = vmatpush1.bf16.msra.mxu0 %v12005_v25  ;;  %v12094_v25 = vld [vmem:[#allocation5 + $0x1818] ss:$88 sps:$4 sm:$0xff]  }
  0xfc   :  { %6801 = vmatpush1.bf16.msra.mxu1 %v12008_v26  ;;  %6679 = vmatprep.subr.bf16.mxu0 %v12013_v27  ;;  %v12099_v26 = vld [vmem:[#allocation5 + $0x18c4] ss:$88 sps:$4 sm:$0xff]  }
  0xfd   :  { %6802 = vmatprep.subr.bf16.mxu1 %v12016_v28  ;;  %v12102_v27 = vld [vmem:[#allocation5 + $0x18cc] ss:$88 sps:$4 sm:$0xff]   ;;  %v12097_v28 = vld [vmem:[#allocation5 + $0x18c0] ss:$88 sps:$4 sm:$0xff]  }
  0xff   :  { %6680 = vmatpush1.bf16.msra.mxu0 %v12011_v31  ;;  %v12105_v31 = vld [vmem:[#allocation5 + $0x1974] ss:$88 sps:$4 sm:$0xff]  }
 0x100   :  { %6803 = vmatpush1.bf16.msra.mxu1 %v12014_v32  ;;  %6681 = vmatprep.subr.bf16.mxu0 %v12019_v33  ;;  %v12108_v32 = vld [vmem:[#allocation5 + $0x197c] ss:$88 sps:$4 sm:$0xff]   ;;  %v12103_v33 = vld [vmem:[#allocation5 + $0x1970] ss:$88 sps:$4 sm:$0xff]  }
 0x101   :  { %6804 = vmatprep.subr.bf16.mxu1 %v12022_v34  ;;  %v12106_v34 = vld [vmem:[#allocation5 + $0x1978] ss:$88 sps:$4 sm:$0xff]  }
 0x103   :  { %6682 = vmatpush1.bf16.msra.mxu0 %v12017_v35  ;;  %v12111_v35 = vld [vmem:[#allocation5 + $0x1a24] ss:$88 sps:$4 sm:$0xff]  }
 0x104   :  { %6805 = vmatpush1.bf16.msra.mxu1 %v12020_v36  ;;  %6683 = vmatprep.subr.bf16.mxu0 %v12025_v37  ;;  %v12114_v36 = vld [vmem:[#allocation5 + $0x1a2c] ss:$88 sps:$4 sm:$0xff]   ;;  %v12109_v37 = vld [vmem:[#allocation5 + $0x1a20] ss:$88 sps:$4 sm:$0xff]  }
 0x105   :  { %6806 = vmatprep.subr.bf16.mxu1 %v12028_v38  ;;  %v12112_v38 = vld [vmem:[#allocation5 + $0x1a28] ss:$88 sps:$4 sm:$0xff]  }
 0x107   :  { %6684 = vmatpush1.bf16.msra.mxu0 %v12023_v39  ;;  %v12117_v39 = vld [vmem:[#allocation5 + $0x1ad4] ss:$88 sps:$4 sm:$0xff]  }
 0x108   :  { %6807 = vmatpush1.bf16.msra.mxu1 %v12026_v40  ;;  %6685 = vmatprep.subr.bf16.mxu0 %v12031_v41  ;;  %v12120_v40 = vld [vmem:[#allocation5 + $0x1adc] ss:$88 sps:$4 sm:$0xff]   ;;  %v12115_v41 = vld [vmem:[#allocation5 + $0x1ad0] ss:$88 sps:$4 sm:$0xff]  }
 0x109   :  { %6808 = vmatprep.subr.bf16.mxu1 %v12034_v42  ;;  %v12118_v42 = vld [vmem:[#allocation5 + $0x1ad8] ss:$88 sps:$4 sm:$0xff]  }
 0x10b   :  { %6686 = vmatpush1.bf16.msra.mxu0 %v12029_v43  ;;  %v12123_v43 = vld [vmem:[#allocation5 + $0x1b84] ss:$88 sps:$4 sm:$0xff]  }
 0x10c   :  { %6809 = vmatpush1.bf16.msra.mxu1 %v12032_v44  ;;  %6687 = vmatprep.subr.bf16.mxu0 %v12037_v45  ;;  %v12126_v44 = vld [vmem:[#allocation5 + $0x1b8c] ss:$88 sps:$4 sm:$0xff]   ;;  %v12121_v45 = vld [vmem:[#allocation5 + $0x1b80] ss:$88 sps:$4 sm:$0xff]  }
 0x10d   :  { %6810 = vmatprep.subr.bf16.mxu1 %v12040_v46  ;;  %v12124_v46 = vld [vmem:[#allocation5 + $0x1b88] ss:$88 sps:$4 sm:$0xff]  }
 0x10f   :  { %6688 = vmatpush1.bf16.msra.mxu0 %v12035_v47  ;;  %v12129_v47 = vld [vmem:[#allocation5 + $0x1c34] ss:$88 sps:$4 sm:$0xff]  }
 0x110   :  { %6811 = vmatpush1.bf16.msra.mxu1 %v12038_v49  ;;  %6689 = vmatprep.subr.bf16.mxu0 %v12043_v50  ;;  %v12132_v49 = vld [vmem:[#allocation5 + $0x1c3c] ss:$88 sps:$4 sm:$0xff]   ;;  %v12127_v50 = vld [vmem:[#allocation5 + $0x1c30] ss:$88 sps:$4 sm:$0xff]  }
 0x111   :  { %6812 = vmatprep.subr.bf16.mxu1 %v12046_v51  ;;  %v12130_v51 = vld [vmem:[#allocation5 + $0x1c38] ss:$88 sps:$4 sm:$0xff]  }
 0x113   :  { %6690 = vmatpush1.bf16.msra.mxu0 %v12041_v52  ;;  %v12135_v52 = vld [vmem:[#allocation5 + $0x1ce4] ss:$88 sps:$4 sm:$0xff]  }
 0x114   :  { %6813 = vmatpush1.bf16.msra.mxu1 %v12044_v53  ;;  %6691 = vmatprep.subr.bf16.mxu0 %v12049_v54  ;;  %v12138_v53 = vld [vmem:[#allocation5 + $0x1cec] ss:$88 sps:$4 sm:$0xff]   ;;  %v12133_v54 = vld [vmem:[#allocation5 + $0x1ce0] ss:$88 sps:$4 sm:$0xff]  }
 0x115   :  { %6814 = vmatprep.subr.bf16.mxu1 %v12052_v55  ;;  %v12136_v55 = vld [vmem:[#allocation5 + $0x1ce8] ss:$88 sps:$4 sm:$0xff]  }
 0x117   :  { %6692 = vmatpush1.bf16.msra.mxu0 %v12047_v56  ;;  %v12141_v56 = vld [vmem:[#allocation5 + $0x1d94] ss:$88 sps:$4 sm:$0xff]  }
 0x118   :  { %6815 = vmatpush1.bf16.msra.mxu1 %v12050_v57  ;;  %6693 = vmatprep.subr.bf16.mxu0 %v12055_v58  ;;  %v12144_v57 = vld [vmem:[#allocation5 + $0x1d9c] ss:$88 sps:$4 sm:$0xff]   ;;  %v12139_v58 = vld [vmem:[#allocation5 + $0x1d90] ss:$88 sps:$4 sm:$0xff]  }
 0x119   :  { %6816 = vmatprep.subr.bf16.mxu1 %v12058_v59  ;;  %v12142_v59 = vld [vmem:[#allocation5 + $0x1d98] ss:$88 sps:$4 sm:$0xff]  }
 0x11b   :  { %6694 = vmatpush1.bf16.msra.mxu0 %v12053_v60  ;;  %v12147_v60 = vld [vmem:[#allocation5 + $0x1e44] ss:$88 sps:$4 sm:$0xff]  }
 0x11c   :  { %6817 = vmatpush1.bf16.msra.mxu1 %v12056_v61  ;;  %6695 = vmatprep.subr.bf16.mxu0 %v12061_v62  ;;  %v12150_v61 = vld [vmem:[#allocation5 + $0x1e4c] ss:$88 sps:$4 sm:$0xff]   ;;  %v12145_v62 = vld [vmem:[#allocation5 + $0x1e40] ss:$88 sps:$4 sm:$0xff]  }
 0x11d   :  { %6818 = vmatprep.subr.bf16.mxu1 %v12064_v63  ;;  %v12148_v63 = vld [vmem:[#allocation5 + $0x1e48] ss:$88 sps:$4 sm:$0xff]  }
 0x11f   :  { %6696 = vmatpush1.bf16.msra.mxu0 %v12059_v0  ;;  %v12153_v0 = vld [vmem:[#allocation5 + $0x1ef4] ss:$88 sps:$4 sm:$0xff]  }
 0x120   :  { %6819 = vmatpush1.bf16.msra.mxu1 %v12062_v1  ;;  %6697 = vmatprep.subr.bf16.mxu0 %v12067_v2  ;;  %v12156_v1 = vld [vmem:[#allocation5 + $0x1efc] ss:$88 sps:$4 sm:$0xff]   ;;  %v12151_v2 = vld [vmem:[#allocation5 + $0x1ef0] ss:$88 sps:$4 sm:$0xff]  }
 0x121   :  { %6820 = vmatprep.subr.bf16.mxu1 %v12070_v3  ;;  %v12154_v3 = vld [vmem:[#allocation5 + $0x1ef8] ss:$88 sps:$4 sm:$0xff]  }
 0x123   :  { %6698 = vmatpush1.bf16.msra.mxu0 %v12065_v4  ;;  %v12159_v4 = vld [vmem:[#allocation5 + $0x1fa4] ss:$88 sps:$4 sm:$0xff]  }
 0x124   :  { %6821 = vmatpush1.bf16.msra.mxu1 %v12068_v6  ;;  %6708 = vmatprep.subr.bf16.mxu0 %v12074_v7  ;;  %v12162_v6 = vld [vmem:[#allocation5 + $0x1fac] ss:$88 sps:$4 sm:$0xff]   ;;  %v12157_v7 = vld [vmem:[#allocation5 + $0x1fa0] ss:$88 sps:$4 sm:$0xff]  }
 0x125   :  { %6831 = vmatprep.subr.bf16.mxu1 %v12077_v8  ;;  %v12160_v8 = vld [vmem:[#allocation5 + $0x1fa8] ss:$88 sps:$4 sm:$0xff]  }
 0x126   :  { %6700 = vmatmul.mubr.bf16.vlgmr.msra.gmra.mrb[0].mxu0 %v14138_v10 }
 0x127   :  { %6823 = vmatmul.mubr.bf16.vlgmr.msra.gmra.mrb[0].mxu1 %v14138_v10  ;;  %6709 = vmatpush1.bf16.msra.mxu0 %v12072_v9  ;;  %v12165_v9 = vld [vmem:[#allocation5 + $0x2054] ss:$88 sps:$4 sm:$0xff]  }
 0x128   :  { %6832 = vmatpush1.bf16.msra.mxu1 %v12075_v11  ;;  %6710 = vmatprep.subr.bf16.mxu0 %v12081_v12  ;;  %v12168_v11 = vld [vmem:[#allocation5 + $0x205c] ss:$88 sps:$4 sm:$0xff]   ;;  %v12163_v12 = vld [vmem:[#allocation5 + $0x2050] ss:$88 sps:$4 sm:$0xff]  }
 0x129   :  { %6833 = vmatprep.subr.bf16.mxu1 %v12084_v14  ;;  %6740 = vmatprep.mubr.bf16.mxu0 %v14144_v15  ;;  %v12166_v14 = vld [vmem:[#allocation5 + $0x2058] ss:$88 sps:$4 sm:$0xff]  }
 0x12a   :  { %6863 = vmatprep.mubr.bf16.mxu1 %v14144_v15 }
 0x12b   :  { %6711 = vmatpush1.bf16.msra.mxu0 %v12079_v16  ;;  %v12173_v16 = vld [vmem:[#allocation5 + $0x14] ss:$88 sps:$4 sm:$0xff]  }
 0x12c   :  { %6834 = vmatpush1.bf16.msra.mxu1 %v12082_v17  ;;  %6712 = vmatprep.subr.bf16.mxu0 %v12087_v18  ;;  %v12176_v17 = vld [vmem:[#allocation5 + $0x1c] ss:$88 sps:$4 sm:$0xff]   ;;  %v14152_v18 = vcombine.low %v14140_v13, %v14140_v13 }
 0x12d   :  { %6835 = vmatprep.subr.bf16.mxu1 %v12090_v19  ;;  %v12171_v19 = vld [vmem:[#allocation5 + $0x10] ss:$88 sps:$4 sm:$0xff]   ;;  %v12188_v13 = vld [vmem:[#allocation5 + $0x17c] ss:$88 sps:$4 sm:$0xff]  }
 0x12f   :  { %6713 = vmatpush1.bf16.msra.mxu0 %v12085_v20  ;;  %v12174_v20 = vld [vmem:[#allocation5 + $0x18] ss:$88 sps:$4 sm:$0xff]  }
 0x130   :  { %6836 = vmatpush1.bf16.msra.mxu1 %v12088_v21  ;;  %6714 = vmatprep.subr.bf16.mxu0 %v12093_v22  ;;  %v12179_v21 = vld [vmem:[#allocation5 + $0xc4] ss:$88 sps:$4 sm:$0xff]  }
 0x131   :  { %6837 = vmatprep.subr.bf16.mxu1 %v12096_v23  ;;  %v12182_v22 = vld [vmem:[#allocation5 + $0xcc] ss:$88 sps:$4 sm:$0xff]   ;;  %v12177_v23 = vld [vmem:[#allocation5 + $0xc0] ss:$88 sps:$4 sm:$0xff]  }
 0x133   :  { %6715 = vmatpush1.bf16.msra.mxu0 %v12091_v24  ;;  %v12180_v24 = vld [vmem:[#allocation5 + $0xc8] ss:$88 sps:$4 sm:$0xff]  }
 0x134   :  { %6838 = vmatpush1.bf16.msra.mxu1 %v12094_v25  ;;  %6716 = vmatprep.subr.bf16.mxu0 %v12099_v26  ;;  %v12185_v25 = vld [vmem:[#allocation5 + $0x174] ss:$88 sps:$4 sm:$0xff]   ;;  %v12183_v26 = vld [vmem:[#allocation5 + $0x170] ss:$88 sps:$4 sm:$0xff]  }
 0x135   :  { %6839 = vmatprep.subr.bf16.mxu1 %v12102_v27  ;;  %v12186_v27 = vld [vmem:[#allocation5 + $0x178] ss:$88 sps:$4 sm:$0xff]  }
 0x137   :  { %6717 = vmatpush1.bf16.msra.mxu0 %v12097_v28  ;;  %v12191_v28 = vld [vmem:[#allocation5 + $0x224] ss:$88 sps:$4 sm:$0xff]  }
 0x138   :  { %6840 = vmatpush1.bf16.msra.mxu1 %v12100_v29  ;;  %6718 = vmatprep.subr.bf16.mxu0 %v12105_v31  ;;  %v12194_v29 = vld [vmem:[#allocation5 + $0x22c] ss:$88 sps:$4 sm:$0xff]   ;;  %v12189_v31 = vld [vmem:[#allocation5 + $0x220] ss:$88 sps:$4 sm:$0xff]  }
 0x139   :  { %6841 = vmatprep.subr.bf16.mxu1 %v12108_v32  ;;  %v12192_v32 = vld [vmem:[#allocation5 + $0x228] ss:$88 sps:$4 sm:$0xff]  }
 0x13b   :  { %6719 = vmatpush1.bf16.msra.mxu0 %v12103_v33  ;;  %v12197_v33 = vld [vmem:[#allocation5 + $0x2d4] ss:$88 sps:$4 sm:$0xff]  }
 0x13c   :  { %6842 = vmatpush1.bf16.msra.mxu1 %v12106_v34  ;;  %6720 = vmatprep.subr.bf16.mxu0 %v12111_v35  ;;  %v12200_v34 = vld [vmem:[#allocation5 + $0x2dc] ss:$88 sps:$4 sm:$0xff]   ;;  %v12195_v35 = vld [vmem:[#allocation5 + $0x2d0] ss:$88 sps:$4 sm:$0xff]  }
 0x13d   :  { %6843 = vmatprep.subr.bf16.mxu1 %v12114_v36  ;;  %v12198_v36 = vld [vmem:[#allocation5 + $0x2d8] ss:$88 sps:$4 sm:$0xff]  }
 0x13f   :  { %6721 = vmatpush1.bf16.msra.mxu0 %v12109_v37  ;;  %v12203_v37 = vld [vmem:[#allocation5 + $0x384] ss:$88 sps:$4 sm:$0xff]  }
 0x140   :  { %6844 = vmatpush1.bf16.msra.mxu1 %v12112_v38  ;;  %6722 = vmatprep.subr.bf16.mxu0 %v12117_v39  ;;  %v12206_v38 = vld [vmem:[#allocation5 + $0x38c] ss:$88 sps:$4 sm:$0xff]   ;;  %v12201_v39 = vld [vmem:[#allocation5 + $0x380] ss:$88 sps:$4 sm:$0xff]  }
 0x141   :  { %6845 = vmatprep.subr.bf16.mxu1 %v12120_v40  ;;  %v12204_v40 = vld [vmem:[#allocation5 + $0x388] ss:$88 sps:$4 sm:$0xff]  }
 0x143   :  { %6723 = vmatpush1.bf16.msra.mxu0 %v12115_v41  ;;  %v12209_v41 = vld [vmem:[#allocation5 + $0x434] ss:$88 sps:$4 sm:$0xff]  }
 0x144   :  { %6846 = vmatpush1.bf16.msra.mxu1 %v12118_v42  ;;  %6724 = vmatprep.subr.bf16.mxu0 %v12123_v43  ;;  %v12212_v42 = vld [vmem:[#allocation5 + $0x43c] ss:$88 sps:$4 sm:$0xff]   ;;  %v12207_v43 = vld [vmem:[#allocation5 + $0x430] ss:$88 sps:$4 sm:$0xff]  }
 0x145   :  { %6847 = vmatprep.subr.bf16.mxu1 %v12126_v44  ;;  %v12210_v44 = vld [vmem:[#allocation5 + $0x438] ss:$88 sps:$4 sm:$0xff]  }
 0x147   :  { %6725 = vmatpush1.bf16.msra.mxu0 %v12121_v45  ;;  %v12215_v45 = vld [vmem:[#allocation5 + $0x4e4] ss:$88 sps:$4 sm:$0xff]  }
 0x148   :  { %6848 = vmatpush1.bf16.msra.mxu1 %v12124_v46  ;;  %6726 = vmatprep.subr.bf16.mxu0 %v12129_v47  ;;  %v12218_v46 = vld [vmem:[#allocation5 + $0x4ec] ss:$88 sps:$4 sm:$0xff]   ;;  %v12213_v47 = vld [vmem:[#allocation5 + $0x4e0] ss:$88 sps:$4 sm:$0xff]  }
 0x149   :  { %6849 = vmatprep.subr.bf16.mxu1 %v12132_v49  ;;  %v12216_v49 = vld [vmem:[#allocation5 + $0x4e8] ss:$88 sps:$4 sm:$0xff]  }
 0x14b   :  { %6727 = vmatpush1.bf16.msra.mxu0 %v12127_v50  ;;  %v12221_v50 = vld [vmem:[#allocation5 + $0x594] ss:$88 sps:$4 sm:$0xff]  }
 0x14c   :  { %6850 = vmatpush1.bf16.msra.mxu1 %v12130_v51  ;;  %6728 = vmatprep.subr.bf16.mxu0 %v12135_v52  ;;  %v12224_v51 = vld [vmem:[#allocation5 + $0x59c] ss:$88 sps:$4 sm:$0xff]   ;;  %v12219_v52 = vld [vmem:[#allocation5 + $0x590] ss:$88 sps:$4 sm:$0xff]  }
 0x14d   :  { %6851 = vmatprep.subr.bf16.mxu1 %v12138_v53  ;;  %v12222_v53 = vld [vmem:[#allocation5 + $0x598] ss:$88 sps:$4 sm:$0xff]  }
 0x14f   :  { %6729 = vmatpush1.bf16.msra.mxu0 %v12133_v54  ;;  %v12227_v54 = vld [vmem:[#allocation5 + $0x644] ss:$88 sps:$4 sm:$0xff]  }
 0x150   :  { %6852 = vmatpush1.bf16.msra.mxu1 %v12136_v55  ;;  %6730 = vmatprep.subr.bf16.mxu0 %v12141_v56  ;;  %v12230_v55 = vld [vmem:[#allocation5 + $0x64c] ss:$88 sps:$4 sm:$0xff]   ;;  %v12225_v56 = vld [vmem:[#allocation5 + $0x640] ss:$88 sps:$4 sm:$0xff]  }
 0x151   :  { %6853 = vmatprep.subr.bf16.mxu1 %v12144_v57  ;;  %v12228_v57 = vld [vmem:[#allocation5 + $0x648] ss:$88 sps:$4 sm:$0xff]  }
 0x153   :  { %6731 = vmatpush1.bf16.msra.mxu0 %v12139_v58  ;;  %v12233_v58 = vld [vmem:[#allocation5 + $0x6f4] ss:$88 sps:$4 sm:$0xff]  }
 0x154   :  { %6854 = vmatpush1.bf16.msra.mxu1 %v12142_v59  ;;  %6732 = vmatprep.subr.bf16.mxu0 %v12147_v60  ;;  %v12236_v59 = vld [vmem:[#allocation5 + $0x6fc] ss:$88 sps:$4 sm:$0xff]   ;;  %v12231_v60 = vld [vmem:[#allocation5 + $0x6f0] ss:$88 sps:$4 sm:$0xff]  }
 0x155   :  { %6855 = vmatprep.subr.bf16.mxu1 %v12150_v61  ;;  %v12234_v61 = vld [vmem:[#allocation5 + $0x6f8] ss:$88 sps:$4 sm:$0xff]  }
 0x157   :  { %6733 = vmatpush1.bf16.msra.mxu0 %v12145_v62  ;;  %v12239_v62 = vld [vmem:[#allocation5 + $0x7a4] ss:$88 sps:$4 sm:$0xff]  }
 0x158   :  { %6856 = vmatpush1.bf16.msra.mxu1 %v12148_v63  ;;  %6734 = vmatprep.subr.bf16.mxu0 %v12153_v0  ;;  %v12242_v63 = vld [vmem:[#allocation5 + $0x7ac] ss:$88 sps:$4 sm:$0xff]   ;;  %v12237_v0 = vld [vmem:[#allocation5 + $0x7a0] ss:$88 sps:$4 sm:$0xff]  }
 0x159   :  { %6857 = vmatprep.subr.bf16.mxu1 %v12156_v1  ;;  %v12240_v1 = vld [vmem:[#allocation5 + $0x7a8] ss:$88 sps:$4 sm:$0xff]  }
 0x15b   :  { %6735 = vmatpush1.bf16.msra.mxu0 %v12151_v2  ;;  %v12245_v2 = vld [vmem:[#allocation5 + $0x854] ss:$88 sps:$4 sm:$0xff]  }
 0x15c   :  { %6858 = vmatpush1.bf16.msra.mxu1 %v12154_v3  ;;  %6736 = vmatprep.subr.bf16.mxu0 %v12159_v4  ;;  %v12248_v3 = vld [vmem:[#allocation5 + $0x85c] ss:$88 sps:$4 sm:$0xff]   ;;  %v12243_v4 = vld [vmem:[#allocation5 + $0x850] ss:$88 sps:$4 sm:$0xff]  }
 0x15d   :  { %6859 = vmatprep.subr.bf16.mxu1 %v12162_v6  ;;  %v12246_v6 = vld [vmem:[#allocation5 + $0x858] ss:$88 sps:$4 sm:$0xff]  }
 0x15f   :  { %6737 = vmatpush1.bf16.msra.mxu0 %v12157_v7  ;;  %v12251_v7 = vld [vmem:[#allocation5 + $0x904] ss:$88 sps:$4 sm:$0xff]  }
 0x160   :  { %6860 = vmatpush1.bf16.msra.mxu1 %v12160_v8  ;;  %6738 = vmatprep.subr.bf16.mxu0 %v12165_v9  ;;  %v12254_v8 = vld [vmem:[#allocation5 + $0x90c] ss:$88 sps:$4 sm:$0xff]   ;;  %v12249_v9 = vld [vmem:[#allocation5 + $0x900] ss:$88 sps:$4 sm:$0xff]  }
 0x161   :  { %6861 = vmatprep.subr.bf16.mxu1 %v12168_v11  ;;  %v12252_v11 = vld [vmem:[#allocation5 + $0x908] ss:$88 sps:$4 sm:$0xff]  }
 0x163   :  { %6739 = vmatpush1.bf16.msra.mxu0 %v12163_v12  ;;  %v12257_v12 = vld [vmem:[#allocation5 + $0x9b4] ss:$88 sps:$4 sm:$0xff]  }
 0x164   :  { %6862 = vmatpush1.bf16.msra.mxu1 %v12166_v14  ;;  %6872 = vmatprep.subr.bf16.mxu0 %v12173_v16  ;;  %v12260_v14 = vld [vmem:[#allocation5 + $0x9bc] ss:$88 sps:$4 sm:$0xff]   ;;  %v12255_v16 = vld [vmem:[#allocation5 + $0x9b0] ss:$88 sps:$4 sm:$0xff]  }
 0x165   :  { %6995 = vmatprep.subr.bf16.mxu1 %v12176_v17  ;;  %v12258_v17 = vld [vmem:[#allocation5 + $0x9b8] ss:$88 sps:$4 sm:$0xff]  }
 0x166   :  { %6741 = vmatmul.mubr.bf16.vlgmr.msra.gmra.mrb[0].mxu0 %v14152_v18 }
 0x167   :  { %6864 = vmatmul.mubr.bf16.vlgmr.msra.gmra.mrb[0].mxu1 %v14152_v18  ;;  %6873 = vmatpush1.bf16.msra.mxu0 %v12171_v19  ;;  %v12263_v19 = vld [vmem:[#allocation5 + $0xa64] ss:$88 sps:$4 sm:$0xff]  }
 0x168   :  { %6996 = vmatpush1.bf16.msra.mxu1 %v12174_v20  ;;  %6874 = vmatprep.subr.bf16.mxu0 %v12179_v21  ;;  %v12266_v20 = vld [vmem:[#allocation5 + $0xa6c] ss:$88 sps:$4 sm:$0xff]   ;;  %v12261_v21 = vld [vmem:[#allocation5 + $0xa60] ss:$88 sps:$4 sm:$0xff]  }
 0x169   :  { %6997 = vmatprep.subr.bf16.mxu1 %v12182_v22  ;;  %6904 = vmatprep.mubr.bf16.mxu0 %v14120_v48  ;;  %v12264_v22 = vld [vmem:[#allocation5 + $0xa68] ss:$88 sps:$4 sm:$0xff]  }
 0x16a   :  { %7027 = vmatprep.mubr.bf16.mxu1 %v14120_v48 }
 0x16b   :  { %6875 = vmatpush1.bf16.msra.mxu0 %v12177_v23  ;;  %v12269_v23 = vld [vmem:[#allocation5 + $0xb14] ss:$88 sps:$4 sm:$0xff]  }
 0x16c   :  { %6998 = vmatpush1.bf16.msra.mxu1 %v12180_v24  ;;  %6876 = vmatprep.subr.bf16.mxu0 %v12185_v25  ;;  %v12272_v24 = vld [vmem:[#allocation5 + $0xb1c] ss:$88 sps:$4 sm:$0xff]   ;;  %v12267_v25 = vld [vmem:[#allocation5 + $0xb10] ss:$88 sps:$4 sm:$0xff]  }
 0x16d   :  { %6999 = vmatprep.subr.bf16.mxu1 %v12188_v13  ;;  %v12270_v13 = vld [vmem:[#allocation5 + $0xb18] ss:$88 sps:$4 sm:$0xff]  }
 0x16f   :  { %6877 = vmatpush1.bf16.msra.mxu0 %v12183_v26  ;;  %v12275_v26 = vld [vmem:[#allocation5 + $0xbc4] ss:$88 sps:$4 sm:$0xff]  }
 0x170   :  { %7000 = vmatpush1.bf16.msra.mxu1 %v12186_v27  ;;  %6878 = vmatprep.subr.bf16.mxu0 %v12191_v28  ;;  %v12278_v27 = vld [vmem:[#allocation5 + $0xbcc] ss:$88 sps:$4 sm:$0xff]   ;;  %v12273_v28 = vld [vmem:[#allocation5 + $0xbc0] ss:$88 sps:$4 sm:$0xff]  }
 0x171   :  { %7001 = vmatprep.subr.bf16.mxu1 %v12194_v29  ;;  %v12276_v29 = vld [vmem:[#allocation5 + $0xbc8] ss:$88 sps:$4 sm:$0xff]  }
 0x173   :  { %6879 = vmatpush1.bf16.msra.mxu0 %v12189_v31  ;;  %v12281_v31 = vld [vmem:[#allocation5 + $0xc74] ss:$88 sps:$4 sm:$0xff]  }
 0x174   :  { %7002 = vmatpush1.bf16.msra.mxu1 %v12192_v32  ;;  %6880 = vmatprep.subr.bf16.mxu0 %v12197_v33  ;;  %v12284_v32 = vld [vmem:[#allocation5 + $0xc7c] ss:$88 sps:$4 sm:$0xff]   ;;  %v12279_v33 = vld [vmem:[#allocation5 + $0xc70] ss:$88 sps:$4 sm:$0xff]  }
 0x175   :  { %7003 = vmatprep.subr.bf16.mxu1 %v12200_v34  ;;  %v12282_v34 = vld [vmem:[#allocation5 + $0xc78] ss:$88 sps:$4 sm:$0xff]  }
 0x177   :  { %6881 = vmatpush1.bf16.msra.mxu0 %v12195_v35  ;;  %v12287_v35 = vld [vmem:[#allocation5 + $0xd24] ss:$88 sps:$4 sm:$0xff]  }
 0x178   :  { %7004 = vmatpush1.bf16.msra.mxu1 %v12198_v36  ;;  %6882 = vmatprep.subr.bf16.mxu0 %v12203_v37  ;;  %v12290_v36 = vld [vmem:[#allocation5 + $0xd2c] ss:$88 sps:$4 sm:$0xff]   ;;  %v12285_v37 = vld [vmem:[#allocation5 + $0xd20] ss:$88 sps:$4 sm:$0xff]  }
 0x179   :  { %7005 = vmatprep.subr.bf16.mxu1 %v12206_v38  ;;  %v12288_v38 = vld [vmem:[#allocation5 + $0xd28] ss:$88 sps:$4 sm:$0xff]  }
 0x17b   :  { %6883 = vmatpush1.bf16.msra.mxu0 %v12201_v39  ;;  %v12293_v39 = vld [vmem:[#allocation5 + $0xdd4] ss:$88 sps:$4 sm:$0xff]  }
 0x17c   :  { %7006 = vmatpush1.bf16.msra.mxu1 %v12204_v40  ;;  %6884 = vmatprep.subr.bf16.mxu0 %v12209_v41  ;;  %v12296_v40 = vld [vmem:[#allocation5 + $0xddc] ss:$88 sps:$4 sm:$0xff]   ;;  %v12291_v41 = vld [vmem:[#allocation5 + $0xdd0] ss:$88 sps:$4 sm:$0xff]  }
 0x17d   :  { %7007 = vmatprep.subr.bf16.mxu1 %v12212_v42  ;;  %v12294_v42 = vld [vmem:[#allocation5 + $0xdd8] ss:$88 sps:$4 sm:$0xff]  }
 0x17f   :  { %6885 = vmatpush1.bf16.msra.mxu0 %v12207_v43  ;;  %v12299_v43 = vld [vmem:[#allocation5 + $0xe84] ss:$88 sps:$4 sm:$0xff]  }
 0x180   :  { %7008 = vmatpush1.bf16.msra.mxu1 %v12210_v44  ;;  %6886 = vmatprep.subr.bf16.mxu0 %v12215_v45  ;;  %v12302_v44 = vld [vmem:[#allocation5 + $0xe8c] ss:$88 sps:$4 sm:$0xff]   ;;  %v12297_v45 = vld [vmem:[#allocation5 + $0xe80] ss:$88 sps:$4 sm:$0xff]  }
 0x181   :  { %7009 = vmatprep.subr.bf16.mxu1 %v12218_v46  ;;  %v12300_v46 = vld [vmem:[#allocation5 + $0xe88] ss:$88 sps:$4 sm:$0xff]  }
 0x183   :  { %6887 = vmatpush1.bf16.msra.mxu0 %v12213_v47  ;;  %v12305_v47 = vld [vmem:[#allocation5 + $0xf34] ss:$88 sps:$4 sm:$0xff]  }
 0x184   :  { %7010 = vmatpush1.bf16.msra.mxu1 %v12216_v49  ;;  %6888 = vmatprep.subr.bf16.mxu0 %v12221_v50  ;;  %v12308_v49 = vld [vmem:[#allocation5 + $0xf3c] ss:$88 sps:$4 sm:$0xff]   ;;  %v12303_v50 = vld [vmem:[#allocation5 + $0xf30] ss:$88 sps:$4 sm:$0xff]  }
 0x185   :  { %7011 = vmatprep.subr.bf16.mxu1 %v12224_v51  ;;  %v12306_v51 = vld [vmem:[#allocation5 + $0xf38] ss:$88 sps:$4 sm:$0xff]  }
 0x187   :  { %6889 = vmatpush1.bf16.msra.mxu0 %v12219_v52  ;;  %v12311_v52 = vld [vmem:[#allocation5 + $0xfe4] ss:$88 sps:$4 sm:$0xff]  }
 0x188   :  { %7012 = vmatpush1.bf16.msra.mxu1 %v12222_v53  ;;  %6890 = vmatprep.subr.bf16.mxu0 %v12227_v54  ;;  %v12314_v53 = vld [vmem:[#allocation5 + $0xfec] ss:$88 sps:$4 sm:$0xff]   ;;  %v12309_v54 = vld [vmem:[#allocation5 + $0xfe0] ss:$88 sps:$4 sm:$0xff]  }
 0x189   :  { %7013 = vmatprep.subr.bf16.mxu1 %v12230_v55  ;;  %v12312_v55 = vld [vmem:[#allocation5 + $0xfe8] ss:$88 sps:$4 sm:$0xff]  }
 0x18b   :  { %6891 = vmatpush1.bf16.msra.mxu0 %v12225_v56  ;;  %v12317_v56 = vld [vmem:[#allocation5 + $0x1094] ss:$88 sps:$4 sm:$0xff]  }
 0x18c   :  { %7014 = vmatpush1.bf16.msra.mxu1 %v12228_v57  ;;  %6892 = vmatprep.subr.bf16.mxu0 %v12233_v58  ;;  %v12320_v57 = vld [vmem:[#allocation5 + $0x109c] ss:$88 sps:$4 sm:$0xff]   ;;  %v12315_v58 = vld [vmem:[#allocation5 + $0x1090] ss:$88 sps:$4 sm:$0xff]  }
 0x18d   :  { %7015 = vmatprep.subr.bf16.mxu1 %v12236_v59  ;;  %v12318_v59 = vld [vmem:[#allocation5 + $0x1098] ss:$88 sps:$4 sm:$0xff]  }
 0x18f   :  { %6893 = vmatpush1.bf16.msra.mxu0 %v12231_v60  ;;  %v12323_v60 = vld [vmem:[#allocation5 + $0x1144] ss:$88 sps:$4 sm:$0xff]  }
 0x190   :  { %7016 = vmatpush1.bf16.msra.mxu1 %v12234_v61  ;;  %6894 = vmatprep.subr.bf16.mxu0 %v12239_v62  ;;  %v12326_v61 = vld [vmem:[#allocation5 + $0x114c] ss:$88 sps:$4 sm:$0xff]   ;;  %v12321_v62 = vld [vmem:[#allocation5 + $0x1140] ss:$88 sps:$4 sm:$0xff]  }
 0x191   :  { %7017 = vmatprep.subr.bf16.mxu1 %v12242_v63  ;;  %v12324_v63 = vld [vmem:[#allocation5 + $0x1148] ss:$88 sps:$4 sm:$0xff]  }
 0x193   :  { %6895 = vmatpush1.bf16.msra.mxu0 %v12237_v0  ;;  %v12329_v0 = vld [vmem:[#allocation5 + $0x11f4] ss:$88 sps:$4 sm:$0xff]  }
 0x194   :  { %7018 = vmatpush1.bf16.msra.mxu1 %v12240_v1  ;;  %6896 = vmatprep.subr.bf16.mxu0 %v12245_v2  ;;  %v12332_v1 = vld [vmem:[#allocation5 + $0x11fc] ss:$88 sps:$4 sm:$0xff]   ;;  %v12327_v2 = vld [vmem:[#allocation5 + $0x11f0] ss:$88 sps:$4 sm:$0xff]  }
 0x195   :  { %7019 = vmatprep.subr.bf16.mxu1 %v12248_v3  ;;  %v12330_v3 = vld [vmem:[#allocation5 + $0x11f8] ss:$88 sps:$4 sm:$0xff]  }
 0x197   :  { %6897 = vmatpush1.bf16.msra.mxu0 %v12243_v4  ;;  %v12335_v4 = vld [vmem:[#allocation5 + $0x12a4] ss:$88 sps:$4 sm:$0xff]  }
 0x198   :  { %7020 = vmatpush1.bf16.msra.mxu1 %v12246_v6  ;;  %6898 = vmatprep.subr.bf16.mxu0 %v12251_v7  ;;  %v12338_v6 = vld [vmem:[#allocation5 + $0x12ac] ss:$88 sps:$4 sm:$0xff]   ;;  %v12333_v7 = vld [vmem:[#allocation5 + $0x12a0] ss:$88 sps:$4 sm:$0xff]  }
 0x199   :  { %7021 = vmatprep.subr.bf16.mxu1 %v12254_v8  ;;  %v12336_v8 = vld [vmem:[#allocation5 + $0x12a8] ss:$88 sps:$4 sm:$0xff]  }
 0x19b   :  { %6899 = vmatpush1.bf16.msra.mxu0 %v12249_v9  ;;  %v12341_v9 = vld [vmem:[#allocation5 + $0x1354] ss:$88 sps:$4 sm:$0xff]  }
 0x19c   :  { %7022 = vmatpush1.bf16.msra.mxu1 %v12252_v11  ;;  %6900 = vmatprep.subr.bf16.mxu0 %v12257_v12  ;;  %v12344_v11 = vld [vmem:[#allocation5 + $0x135c] ss:$88 sps:$4 sm:$0xff]   ;;  %v12339_v12 = vld [vmem:[#allocation5 + $0x1350] ss:$88 sps:$4 sm:$0xff]  }
 0x19d   :  { %7023 = vmatprep.subr.bf16.mxu1 %v12260_v14  ;;  %v12342_v14 = vld [vmem:[#allocation5 + $0x1358] ss:$88 sps:$4 sm:$0xff]  }
 0x19f   :  { %6901 = vmatpush1.bf16.msra.mxu0 %v12255_v16  ;;  %v12347_v16 = vld [vmem:[#allocation5 + $0x1404] ss:$88 sps:$4 sm:$0xff]  }
 0x1a0   :  { %7024 = vmatpush1.bf16.msra.mxu1 %v12258_v17  ;;  %6902 = vmatprep.subr.bf16.mxu0 %v12263_v19  ;;  %v12350_v17 = vld [vmem:[#allocation5 + $0x140c] ss:$88 sps:$4 sm:$0xff]   ;;  %v12345_v19 = vld [vmem:[#allocation5 + $0x1400] ss:$88 sps:$4 sm:$0xff]  }
 0x1a1   :  { %7025 = vmatprep.subr.bf16.mxu1 %v12266_v20  ;;  %v12348_v20 = vld [vmem:[#allocation5 + $0x1408] ss:$88 sps:$4 sm:$0xff]  }
 0x1a3   :  { %6903 = vmatpush1.bf16.msra.mxu0 %v12261_v21  ;;  %v12353_v21 = vld [vmem:[#allocation5 + $0x14b4] ss:$88 sps:$4 sm:$0xff]  }
 0x1a4   :  { %7026 = vmatpush1.bf16.msra.mxu1 %v12264_v22  ;;  %6913 = vmatprep.subr.bf16.mxu0 %v12269_v23  ;;  %v12356_v22 = vld [vmem:[#allocation5 + $0x14bc] ss:$88 sps:$4 sm:$0xff]   ;;  %v12351_v23 = vld [vmem:[#allocation5 + $0x14b0] ss:$88 sps:$4 sm:$0xff]  }
 0x1a5   :  { %7036 = vmatprep.subr.bf16.mxu1 %v12272_v24  ;;  %v12354_v24 = vld [vmem:[#allocation5 + $0x14b8] ss:$88 sps:$4 sm:$0xff]  }
 0x1a6   :  { %6905 = vmatmul.mubr.bf16.vlgmr.msra.gmra.mrb[4].mxu0 %v14124_v5 }
 0x1a7   :  { %7028 = vmatmul.mubr.bf16.vlgmr.msra.gmra.mrb[4].mxu1 %v14124_v5  ;;  %6914 = vmatpush1.bf16.msra.mxu0 %v12267_v25  ;;  %v12359_v25 = vld [vmem:[#allocation5 + $0x1564] ss:$88 sps:$4 sm:$0xff]  }
 0x1a8   :  { %7037 = vmatpush1.bf16.msra.mxu1 %v12270_v13  ;;  %6915 = vmatprep.subr.bf16.mxu0 %v12275_v26  ;;  %v12362_v13 = vld [vmem:[#allocation5 + $0x156c] ss:$88 sps:$4 sm:$0xff]   ;;  %v12357_v26 = vld [vmem:[#allocation5 + $0x1560] ss:$88 sps:$4 sm:$0xff]  }
 0x1a9   :  { %7038 = vmatprep.subr.bf16.mxu1 %v12278_v27  ;;  %6945 = vmatprep.mubr.bf16.mxu0 %v14132_v30  ;;  %v12360_v27 = vld [vmem:[#allocation5 + $0x1568] ss:$88 sps:$4 sm:$0xff]  }
 0x1aa   :  { %7068 = vmatprep.mubr.bf16.mxu1 %v14132_v30 }
 0x1ab   :  { %6916 = vmatpush1.bf16.msra.mxu0 %v12273_v28  ;;  %v12365_v28 = vld [vmem:[#allocation5 + $0x1614] ss:$88 sps:$4 sm:$0xff]  }
 0x1ac   :  { %7039 = vmatpush1.bf16.msra.mxu1 %v12276_v29  ;;  %6917 = vmatprep.subr.bf16.mxu0 %v12281_v31  ;;  %v12368_v29 = vld [vmem:[#allocation5 + $0x161c] ss:$88 sps:$4 sm:$0xff]   ;;  %v12363_v31 = vld [vmem:[#allocation5 + $0x1610] ss:$88 sps:$4 sm:$0xff]  }
 0x1ad   :  { %7040 = vmatprep.subr.bf16.mxu1 %v12284_v32  ;;  %v12366_v32 = vld [vmem:[#allocation5 + $0x1618] ss:$88 sps:$4 sm:$0xff]  }
 0x1af   :  { %6918 = vmatpush1.bf16.msra.mxu0 %v12279_v33  ;;  %v12371_v33 = vld [vmem:[#allocation5 + $0x16c4] ss:$88 sps:$4 sm:$0xff]  }
 0x1b0   :  { %7041 = vmatpush1.bf16.msra.mxu1 %v12282_v34  ;;  %6919 = vmatprep.subr.bf16.mxu0 %v12287_v35  ;;  %v12374_v34 = vld [vmem:[#allocation5 + $0x16cc] ss:$88 sps:$4 sm:$0xff]   ;;  %v12369_v35 = vld [vmem:[#allocation5 + $0x16c0] ss:$88 sps:$4 sm:$0xff]  }
 0x1b1   :  { %7042 = vmatprep.subr.bf16.mxu1 %v12290_v36  ;;  %v12372_v36 = vld [vmem:[#allocation5 + $0x16c8] ss:$88 sps:$4 sm:$0xff]  }
 0x1b3   :  { %6920 = vmatpush1.bf16.msra.mxu0 %v12285_v37  ;;  %v12377_v37 = vld [vmem:[#allocation5 + $0x1774] ss:$88 sps:$4 sm:$0xff]  }
 0x1b4   :  { %7043 = vmatpush1.bf16.msra.mxu1 %v12288_v38  ;;  %6921 = vmatprep.subr.bf16.mxu0 %v12293_v39  ;;  %v12380_v38 = vld [vmem:[#allocation5 + $0x177c] ss:$88 sps:$4 sm:$0xff]   ;;  %v12375_v39 = vld [vmem:[#allocation5 + $0x1770] ss:$88 sps:$4 sm:$0xff]  }
 0x1b5   :  { %7044 = vmatprep.subr.bf16.mxu1 %v12296_v40  ;;  %v12378_v40 = vld [vmem:[#allocation5 + $0x1778] ss:$88 sps:$4 sm:$0xff]  }
 0x1b7   :  { %6922 = vmatpush1.bf16.msra.mxu0 %v12291_v41  ;;  %v12383_v41 = vld [vmem:[#allocation5 + $0x1824] ss:$88 sps:$4 sm:$0xff]  }
 0x1b8   :  { %7045 = vmatpush1.bf16.msra.mxu1 %v12294_v42  ;;  %6923 = vmatprep.subr.bf16.mxu0 %v12299_v43  ;;  %v12386_v42 = vld [vmem:[#allocation5 + $0x182c] ss:$88 sps:$4 sm:$0xff]   ;;  %v12381_v43 = vld [vmem:[#allocation5 + $0x1820] ss:$88 sps:$4 sm:$0xff]  }
 0x1b9   :  { %7046 = vmatprep.subr.bf16.mxu1 %v12302_v44  ;;  %v12384_v44 = vld [vmem:[#allocation5 + $0x1828] ss:$88 sps:$4 sm:$0xff]  }
 0x1bb   :  { %6924 = vmatpush1.bf16.msra.mxu0 %v12297_v45  ;;  %v12389_v45 = vld [vmem:[#allocation5 + $0x18d4] ss:$88 sps:$4 sm:$0xff]  }
 0x1bc   :  { %7047 = vmatpush1.bf16.msra.mxu1 %v12300_v46  ;;  %6925 = vmatprep.subr.bf16.mxu0 %v12305_v47  ;;  %v12392_v46 = vld [vmem:[#allocation5 + $0x18dc] ss:$88 sps:$4 sm:$0xff]   ;;  %v12387_v47 = vld [vmem:[#allocation5 + $0x18d0] ss:$88 sps:$4 sm:$0xff]  }
 0x1bd   :  { %7048 = vmatprep.subr.bf16.mxu1 %v12308_v49  ;;  %v12390_v49 = vld [vmem:[#allocation5 + $0x18d8] ss:$88 sps:$4 sm:$0xff]  }
 0x1bf   :  { %6926 = vmatpush1.bf16.msra.mxu0 %v12303_v50  ;;  %v12395_v50 = vld [vmem:[#allocation5 + $0x1984] ss:$88 sps:$4 sm:$0xff]  }
 0x1c0   :  { %7049 = vmatpush1.bf16.msra.mxu1 %v12306_v51  ;;  %6927 = vmatprep.subr.bf16.mxu0 %v12311_v52  ;;  %v12398_v51 = vld [vmem:[#allocation5 + $0x198c] ss:$88 sps:$4 sm:$0xff]   ;;  %v12393_v52 = vld [vmem:[#allocation5 + $0x1980] ss:$88 sps:$4 sm:$0xff]  }
 0x1c1   :  { %7050 = vmatprep.subr.bf16.mxu1 %v12314_v53  ;;  %v12396_v53 = vld [vmem:[#allocation5 + $0x1988] ss:$88 sps:$4 sm:$0xff]  }
 0x1c3   :  { %6928 = vmatpush1.bf16.msra.mxu0 %v12309_v54  ;;  %v12401_v54 = vld [vmem:[#allocation5 + $0x1a34] ss:$88 sps:$4 sm:$0xff]  }
 0x1c4   :  { %7051 = vmatpush1.bf16.msra.mxu1 %v12312_v55  ;;  %6929 = vmatprep.subr.bf16.mxu0 %v12317_v56  ;;  %v12404_v55 = vld [vmem:[#allocation5 + $0x1a3c] ss:$88 sps:$4 sm:$0xff]   ;;  %v12399_v56 = vld [vmem:[#allocation5 + $0x1a30] ss:$88 sps:$4 sm:$0xff]  }
 0x1c5   :  { %7052 = vmatprep.subr.bf16.mxu1 %v12320_v57  ;;  %v12402_v57 = vld [vmem:[#allocation5 + $0x1a38] ss:$88 sps:$4 sm:$0xff]  }
 0x1c7   :  { %6930 = vmatpush1.bf16.msra.mxu0 %v12315_v58  ;;  %v12407_v58 = vld [vmem:[#allocation5 + $0x1ae4] ss:$88 sps:$4 sm:$0xff]  }
 0x1c8   :  { %7053 = vmatpush1.bf16.msra.mxu1 %v12318_v59  ;;  %6931 = vmatprep.subr.bf16.mxu0 %v12323_v60  ;;  %v12410_v59 = vld [vmem:[#allocation5 + $0x1aec] ss:$88 sps:$4 sm:$0xff]   ;;  %v12405_v60 = vld [vmem:[#allocation5 + $0x1ae0] ss:$88 sps:$4 sm:$0xff]  }
 0x1c9   :  { %7054 = vmatprep.subr.bf16.mxu1 %v12326_v61  ;;  %v12408_v61 = vld [vmem:[#allocation5 + $0x1ae8] ss:$88 sps:$4 sm:$0xff]  }
 0x1cb   :  { %6932 = vmatpush1.bf16.msra.mxu0 %v12321_v62  ;;  %v12413_v62 = vld [vmem:[#allocation5 + $0x1b94] ss:$88 sps:$4 sm:$0xff]  }
 0x1cc   :  { %7055 = vmatpush1.bf16.msra.mxu1 %v12324_v63  ;;  %6933 = vmatprep.subr.bf16.mxu0 %v12329_v0  ;;  %v12416_v63 = vld [vmem:[#allocation5 + $0x1b9c] ss:$88 sps:$4 sm:$0xff]   ;;  %v12411_v0 = vld [vmem:[#allocation5 + $0x1b90] ss:$88 sps:$4 sm:$0xff]  }
 0x1cd   :  { %7056 = vmatprep.subr.bf16.mxu1 %v12332_v1  ;;  %v12414_v1 = vld [vmem:[#allocation5 + $0x1b98] ss:$88 sps:$4 sm:$0xff]  }
 0x1cf   :  { %6934 = vmatpush1.bf16.msra.mxu0 %v12327_v2  ;;  %v12419_v2 = vld [vmem:[#allocation5 + $0x1c44] ss:$88 sps:$4 sm:$0xff]  }
 0x1d0   :  { %7057 = vmatpush1.bf16.msra.mxu1 %v12330_v3  ;;  %6935 = vmatprep.subr.bf16.mxu0 %v12335_v4  ;;  %v12422_v3 = vld [vmem:[#allocation5 + $0x1c4c] ss:$88 sps:$4 sm:$0xff]   ;;  %v12417_v4 = vld [vmem:[#allocation5 + $0x1c40] ss:$88 sps:$4 sm:$0xff]  }
 0x1d1   :  { %7058 = vmatprep.subr.bf16.mxu1 %v12338_v6  ;;  %v12420_v6 = vld [vmem:[#allocation5 + $0x1c48] ss:$88 sps:$4 sm:$0xff]  }
 0x1d3   :  { %6936 = vmatpush1.bf16.msra.mxu0 %v12333_v7  ;;  %v12425_v7 = vld [vmem:[#allocation5 + $0x1cf4] ss:$88 sps:$4 sm:$0xff]  }
 0x1d4   :  { %7059 = vmatpush1.bf16.msra.mxu1 %v12336_v8  ;;  %6937 = vmatprep.subr.bf16.mxu0 %v12341_v9  ;;  %v12428_v8 = vld [vmem:[#allocation5 + $0x1cfc] ss:$88 sps:$4 sm:$0xff]   ;;  %v12423_v9 = vld [vmem:[#allocation5 + $0x1cf0] ss:$88 sps:$4 sm:$0xff]  }
 0x1d5   :  { %7060 = vmatprep.subr.bf16.mxu1 %v12344_v11  ;;  %v12426_v11 = vld [vmem:[#allocation5 + $0x1cf8] ss:$88 sps:$4 sm:$0xff]  }
 0x1d7   :  { %6938 = vmatpush1.bf16.msra.mxu0 %v12339_v12  ;;  %v12431_v12 = vld [vmem:[#allocation5 + $0x1da4] ss:$88 sps:$4 sm:$0xff]  }
 0x1d8   :  { %7061 = vmatpush1.bf16.msra.mxu1 %v12342_v14  ;;  %6939 = vmatprep.subr.bf16.mxu0 %v12347_v16  ;;  %v12434_v14 = vld [vmem:[#allocation5 + $0x1dac] ss:$88 sps:$4 sm:$0xff]   ;;  %v12429_v16 = vld [vmem:[#allocation5 + $0x1da0] ss:$88 sps:$4 sm:$0xff]  }
 0x1d9   :  { %7062 = vmatprep.subr.bf16.mxu1 %v12350_v17  ;;  %v12432_v17 = vld [vmem:[#allocation5 + $0x1da8] ss:$88 sps:$4 sm:$0xff]  }
 0x1db   :  { %6940 = vmatpush1.bf16.msra.mxu0 %v12345_v19  ;;  %v12437_v19 = vld [vmem:[#allocation5 + $0x1e54] ss:$88 sps:$4 sm:$0xff]  }
 0x1dc   :  { %7063 = vmatpush1.bf16.msra.mxu1 %v12348_v20  ;;  %6941 = vmatprep.subr.bf16.mxu0 %v12353_v21  ;;  %v12440_v20 = vld [vmem:[#allocation5 + $0x1e5c] ss:$88 sps:$4 sm:$0xff]   ;;  %v12435_v21 = vld [vmem:[#allocation5 + $0x1e50] ss:$88 sps:$4 sm:$0xff]  }
 0x1dd   :  { %7064 = vmatprep.subr.bf16.mxu1 %v12356_v22  ;;  %v12438_v22 = vld [vmem:[#allocation5 + $0x1e58] ss:$88 sps:$4 sm:$0xff]  }
 0x1df   :  { %6942 = vmatpush1.bf16.msra.mxu0 %v12351_v23  ;;  %v12443_v23 = vld [vmem:[#allocation5 + $0x1f04] ss:$88 sps:$4 sm:$0xff]  }
 0x1e0   :  { %7065 = vmatpush1.bf16.msra.mxu1 %v12354_v24  ;;  %6943 = vmatprep.subr.bf16.mxu0 %v12359_v25  ;;  %v12446_v24 = vld [vmem:[#allocation5 + $0x1f0c] ss:$88 sps:$4 sm:$0xff]   ;;  %v12441_v25 = vld [vmem:[#allocation5 + $0x1f00] ss:$88 sps:$4 sm:$0xff]  }
 0x1e1   :  { %7066 = vmatprep.subr.bf16.mxu1 %v12362_v13  ;;  %v12444_v13 = vld [vmem:[#allocation5 + $0x1f08] ss:$88 sps:$4 sm:$0xff]  }
 0x1e3   :  { %6944 = vmatpush1.bf16.msra.mxu0 %v12357_v26  ;;  %v12449_v26 = vld [vmem:[#allocation5 + $0x1fb4] ss:$88 sps:$4 sm:$0xff]  }
 0x1e4   :  { %7067 = vmatpush1.bf16.msra.mxu1 %v12360_v27  ;;  %6954 = vmatprep.subr.bf16.mxu0 %v12365_v28  ;;  %v12452_v27 = vld [vmem:[#allocation5 + $0x1fbc] ss:$88 sps:$4 sm:$0xff]   ;;  %v12447_v28 = vld [vmem:[#allocation5 + $0x1fb0] ss:$88 sps:$4 sm:$0xff]  }
 0x1e5   :  { %7077 = vmatprep.subr.bf16.mxu1 %v12368_v29  ;;  %v12450_v29 = vld [vmem:[#allocation5 + $0x1fb8] ss:$88 sps:$4 sm:$0xff]  }
 0x1e6   :  { %6946 = vmatmul.mubr.bf16.vlgmr.msra.gmra.mrb[4].mxu0 %v14138_v10 }
 0x1e7   :  { %7069 = vmatmul.mubr.bf16.vlgmr.msra.gmra.mrb[4].mxu1 %v14138_v10  ;;  %6955 = vmatpush1.bf16.msra.mxu0 %v12363_v31  ;;  %v12455_v31 = vld [vmem:[#allocation5 + $0x2064] ss:$88 sps:$4 sm:$0xff]  }
 0x1e8   :  { %7078 = vmatpush1.bf16.msra.mxu1 %v12366_v32  ;;  %6956 = vmatprep.subr.bf16.mxu0 %v12371_v33  ;;  %v12458_v32 = vld [vmem:[#allocation5 + $0x206c] ss:$88 sps:$4 sm:$0xff]   ;;  %v12453_v33 = vld [vmem:[#allocation5 + $0x2060] ss:$88 sps:$4 sm:$0xff]  }
 0x1e9   :  { %7079 = vmatprep.subr.bf16.mxu1 %v12374_v34  ;;  %6986 = vmatprep.mubr.bf16.mxu0 %v14144_v15  ;;  %v12456_v34 = vld [vmem:[#allocation5 + $0x2068] ss:$88 sps:$4 sm:$0xff]  }
 0x1ea   :  { %7109 = vmatprep.mubr.bf16.mxu1 %v14144_v15 }
 0x1eb   :  { %6957 = vmatpush1.bf16.msra.mxu0 %v12369_v35  ;;  %v12461_v35 = vld [vmem:[#allocation5 + $0x24] ss:$88 sps:$4 sm:$0xff]  }
 0x1ec   :  { %7080 = vmatpush1.bf16.msra.mxu1 %v12372_v36  ;;  %6958 = vmatprep.subr.bf16.mxu0 %v12377_v37  ;;  %v12464_v36 = vld [vmem:[#allocation5 + $0x2c] ss:$88 sps:$4 sm:$0xff]   ;;  %v12459_v37 = vld [vmem:[#allocation5 + $0x20] ss:$88 sps:$4 sm:$0xff]  }
 0x1ed   :  { %7081 = vmatprep.subr.bf16.mxu1 %v12380_v38  ;;  %v12462_v38 = vld [vmem:[#allocation5 + $0x28] ss:$88 sps:$4 sm:$0xff]  }
 0x1ef   :  { %6959 = vmatpush1.bf16.msra.mxu0 %v12375_v39  ;;  %v12467_v39 = vld [vmem:[#allocation5 + $0xd4] ss:$88 sps:$4 sm:$0xff]  }
 0x1f0   :  { %7082 = vmatpush1.bf16.msra.mxu1 %v12378_v40  ;;  %6960 = vmatprep.subr.bf16.mxu0 %v12383_v41  ;;  %v12470_v40 = vld [vmem:[#allocation5 + $0xdc] ss:$88 sps:$4 sm:$0xff]   ;;  %v12465_v41 = vld [vmem:[#allocation5 + $0xd0] ss:$88 sps:$4 sm:$0xff]  }
 0x1f1   :  { %7083 = vmatprep.subr.bf16.mxu1 %v12386_v42  ;;  %v12468_v42 = vld [vmem:[#allocation5 + $0xd8] ss:$88 sps:$4 sm:$0xff]  }
 0x1f3   :  { %6961 = vmatpush1.bf16.msra.mxu0 %v12381_v43  ;;  %v12473_v43 = vld [vmem:[#allocation5 + $0x184] ss:$88 sps:$4 sm:$0xff]  }
 0x1f4   :  { %7084 = vmatpush1.bf16.msra.mxu1 %v12384_v44  ;;  %6962 = vmatprep.subr.bf16.mxu0 %v12389_v45  ;;  %v12476_v44 = vld [vmem:[#allocation5 + $0x18c] ss:$88 sps:$4 sm:$0xff]   ;;  %v12471_v45 = vld [vmem:[#allocation5 + $0x180] ss:$88 sps:$4 sm:$0xff]  }
 0x1f5   :  { %7085 = vmatprep.subr.bf16.mxu1 %v12392_v46  ;;  %v12474_v46 = vld [vmem:[#allocation5 + $0x188] ss:$88 sps:$4 sm:$0xff]  }
 0x1f7   :  { %6963 = vmatpush1.bf16.msra.mxu0 %v12387_v47  ;;  %v12479_v47 = vld [vmem:[#allocation5 + $0x234] ss:$88 sps:$4 sm:$0xff]  }
 0x1f8   :  { %7086 = vmatpush1.bf16.msra.mxu1 %v12390_v49  ;;  %6964 = vmatprep.subr.bf16.mxu0 %v12395_v50  ;;  %v12482_v49 = vld [vmem:[#allocation5 + $0x23c] ss:$88 sps:$4 sm:$0xff]   ;;  %v12477_v50 = vld [vmem:[#allocation5 + $0x230] ss:$88 sps:$4 sm:$0xff]  }
 0x1f9   :  { %7087 = vmatprep.subr.bf16.mxu1 %v12398_v51  ;;  %v12480_v51 = vld [vmem:[#allocation5 + $0x238] ss:$88 sps:$4 sm:$0xff]  }
 0x1fb   :  { %6965 = vmatpush1.bf16.msra.mxu0 %v12393_v52  ;;  %v12485_v52 = vld [vmem:[#allocation5 + $0x2e4] ss:$88 sps:$4 sm:$0xff]  }
 0x1fc   :  { %7088 = vmatpush1.bf16.msra.mxu1 %v12396_v53  ;;  %6966 = vmatprep.subr.bf16.mxu0 %v12401_v54  ;;  %v12488_v53 = vld [vmem:[#allocation5 + $0x2ec] ss:$88 sps:$4 sm:$0xff]   ;;  %v12483_v54 = vld [vmem:[#allocation5 + $0x2e0] ss:$88 sps:$4 sm:$0xff]  }
 0x1fd   :  { %7089 = vmatprep.subr.bf16.mxu1 %v12404_v55  ;;  %v12486_v55 = vld [vmem:[#allocation5 + $0x2e8] ss:$88 sps:$4 sm:$0xff]  }
 0x1ff   :  { %6967 = vmatpush1.bf16.msra.mxu0 %v12399_v56  ;;  %v12491_v56 = vld [vmem:[#allocation5 + $0x394] ss:$88 sps:$4 sm:$0xff]  }
 0x200   :  { %7090 = vmatpush1.bf16.msra.mxu1 %v12402_v57  ;;  %6968 = vmatprep.subr.bf16.mxu0 %v12407_v58  ;;  %v12494_v57 = vld [vmem:[#allocation5 + $0x39c] ss:$88 sps:$4 sm:$0xff]   ;;  %v12489_v58 = vld [vmem:[#allocation5 + $0x390] ss:$88 sps:$4 sm:$0xff]  }
 0x201   :  { %7091 = vmatprep.subr.bf16.mxu1 %v12410_v59  ;;  %v12492_v59 = vld [vmem:[#allocation5 + $0x398] ss:$88 sps:$4 sm:$0xff]  }
 0x203   :  { %6969 = vmatpush1.bf16.msra.mxu0 %v12405_v60  ;;  %v12497_v60 = vld [vmem:[#allocation5 + $0x444] ss:$88 sps:$4 sm:$0xff]  }
 0x204   :  { %7092 = vmatpush1.bf16.msra.mxu1 %v12408_v61  ;;  %6970 = vmatprep.subr.bf16.mxu0 %v12413_v62  ;;  %v12500_v61 = vld [vmem:[#allocation5 + $0x44c] ss:$88 sps:$4 sm:$0xff]  }
 0x205   :  { %7093 = vmatprep.subr.bf16.mxu1 %v12416_v63 }
 0x207   :  { %6971 = vmatpush1.bf16.msra.mxu0 %v12411_v0 }
 0x208   :  { %7094 = vmatpush1.bf16.msra.mxu1 %v12414_v1  ;;  %6972 = vmatprep.subr.bf16.mxu0 %v12419_v2 }
 0x209   :  { %7095 = vmatprep.subr.bf16.mxu1 %v12422_v3  ;;  %v12495_v3 = vld [vmem:[#allocation5 + $0x440] ss:$88 sps:$4 sm:$0xff]  }
 0x20b   :  { %6973 = vmatpush1.bf16.msra.mxu0 %v12417_v4  ;;  %v12498_v4 = vld [vmem:[#allocation5 + $0x448] ss:$88 sps:$4 sm:$0xff]  }
 0x20c   :  { %7096 = vmatpush1.bf16.msra.mxu1 %v12420_v6  ;;  %6974 = vmatprep.subr.bf16.mxu0 %v12425_v7 }
 0x20d   :  { %7097 = vmatprep.subr.bf16.mxu1 %v12428_v8  ;;  %v12503_v8 = vld [vmem:[#allocation5 + $0x4f4] ss:$88 sps:$4 sm:$0xff]  }
 0x20f   :  { %6975 = vmatpush1.bf16.msra.mxu0 %v12423_v9  ;;  %v12506_v9 = vld [vmem:[#allocation5 + $0x4fc] ss:$88 sps:$4 sm:$0xff]  }
 0x210   :  { %7098 = vmatpush1.bf16.msra.mxu1 %v12426_v11  ;;  %6976 = vmatprep.subr.bf16.mxu0 %v12431_v12  ;;  %v12501_v12 = vld [vmem:[#allocation5 + $0x4f0] ss:$88 sps:$4 sm:$0xff]  }
 0x211   :  { %7099 = vmatprep.subr.bf16.mxu1 %v12434_v14  ;;  %v12504_v14 = vld [vmem:[#allocation5 + $0x4f8] ss:$88 sps:$4 sm:$0xff]  }
 0x213   :  { %6977 = vmatpush1.bf16.msra.mxu0 %v12429_v16  ;;  %v12509_v16 = vld [vmem:[#allocation5 + $0x5a4] ss:$88 sps:$4 sm:$0xff]  }
 0x214   :  { %7100 = vmatpush1.bf16.msra.mxu1 %v12432_v17  ;;  %6978 = vmatprep.subr.bf16.mxu0 %v12437_v19  ;;  %v12512_v17 = vld [vmem:[#allocation5 + $0x5ac] ss:$88 sps:$4 sm:$0xff]   ;;  %v12507_v19 = vld [vmem:[#allocation5 + $0x5a0] ss:$88 sps:$4 sm:$0xff]  }
 0x215   :  { %7101 = vmatprep.subr.bf16.mxu1 %v12440_v20  ;;  %v12510_v20 = vld [vmem:[#allocation5 + $0x5a8] ss:$88 sps:$4 sm:$0xff]  }
 0x217   :  { %6979 = vmatpush1.bf16.msra.mxu0 %v12435_v21  ;;  %v12515_v21 = vld [vmem:[#allocation5 + $0x654] ss:$88 sps:$4 sm:$0xff]  }
 0x218   :  { %7102 = vmatpush1.bf16.msra.mxu1 %v12438_v22  ;;  %6980 = vmatprep.subr.bf16.mxu0 %v12443_v23  ;;  %v12518_v22 = vld [vmem:[#allocation5 + $0x65c] ss:$88 sps:$4 sm:$0xff]   ;;  %v12513_v23 = vld [vmem:[#allocation5 + $0x650] ss:$88 sps:$4 sm:$0xff]  }
 0x219   :  { %7103 = vmatprep.subr.bf16.mxu1 %v12446_v24  ;;  %v12516_v24 = vld [vmem:[#allocation5 + $0x658] ss:$88 sps:$4 sm:$0xff]  }
 0x21b   :  { %6981 = vmatpush1.bf16.msra.mxu0 %v12441_v25  ;;  %v12521_v25 = vld [vmem:[#allocation5 + $0x704] ss:$88 sps:$4 sm:$0xff]  }
 0x21c   :  { %7104 = vmatpush1.bf16.msra.mxu1 %v12444_v13  ;;  %6982 = vmatprep.subr.bf16.mxu0 %v12449_v26  ;;  %v12524_v13 = vld [vmem:[#allocation5 + $0x70c] ss:$88 sps:$4 sm:$0xff]   ;;  %v12519_v26 = vld [vmem:[#allocation5 + $0x700] ss:$88 sps:$4 sm:$0xff]  }
 0x21d   :  { %7105 = vmatprep.subr.bf16.mxu1 %v12452_v27  ;;  %v12522_v27 = vld [vmem:[#allocation5 + $0x708] ss:$88 sps:$4 sm:$0xff]  }
 0x21f   :  { %6983 = vmatpush1.bf16.msra.mxu0 %v12447_v28  ;;  %v12527_v28 = vld [vmem:[#allocation5 + $0x7b4] ss:$88 sps:$4 sm:$0xff]  }
 0x220   :  { %7106 = vmatpush1.bf16.msra.mxu1 %v12450_v29  ;;  %6984 = vmatprep.subr.bf16.mxu0 %v12455_v31  ;;  %v12530_v29 = vld [vmem:[#allocation5 + $0x7bc] ss:$88 sps:$4 sm:$0xff]   ;;  %v12525_v31 = vld [vmem:[#allocation5 + $0x7b0] ss:$88 sps:$4 sm:$0xff]  }
 0x221   :  { %7107 = vmatprep.subr.bf16.mxu1 %v12458_v32  ;;  %v12528_v32 = vld [vmem:[#allocation5 + $0x7b8] ss:$88 sps:$4 sm:$0xff]  }
 0x223   :  { %6985 = vmatpush1.bf16.msra.mxu0 %v12453_v33  ;;  %v12533_v33 = vld [vmem:[#allocation5 + $0x864] ss:$88 sps:$4 sm:$0xff]  }
 0x224   :  { %7108 = vmatpush1.bf16.msra.mxu1 %v12456_v34  ;;  %7118 = vmatprep.subr.bf16.mxu0 %v12461_v35  ;;  %v12536_v34 = vld [vmem:[#allocation5 + $0x86c] ss:$88 sps:$4 sm:$0xff]   ;;  %v12531_v35 = vld [vmem:[#allocation5 + $0x860] ss:$88 sps:$4 sm:$0xff]  }
 0x225   :  { %7241 = vmatprep.subr.bf16.mxu1 %v12464_v36  ;;  %v12534_v36 = vld [vmem:[#allocation5 + $0x868] ss:$88 sps:$4 sm:$0xff]  }
 0x226   :  { %6987 = vmatmul.mubr.bf16.vlgmr.msra.gmra.mrb[4].mxu0 %v14152_v18 }
 0x227   :  { %7110 = vmatmul.mubr.bf16.vlgmr.msra.gmra.mrb[4].mxu1 %v14152_v18  ;;  %7119 = vmatpush1.bf16.msra.mxu0 %v12459_v37  ;;  %v12539_v37 = vld [vmem:[#allocation5 + $0x914] ss:$88 sps:$4 sm:$0xff]  }
 0x228   :  { %7242 = vmatpush1.bf16.msra.mxu1 %v12462_v38  ;;  %7120 = vmatprep.subr.bf16.mxu0 %v12467_v39  ;;  %v12542_v38 = vld [vmem:[#allocation5 + $0x91c] ss:$88 sps:$4 sm:$0xff]   ;;  %v12537_v39 = vld [vmem:[#allocation5 + $0x910] ss:$88 sps:$4 sm:$0xff]  }
 0x229   :  { %7243 = vmatprep.subr.bf16.mxu1 %v12470_v40  ;;  %7150 = vmatprep.mubr.bf16.mxu0 %v14120_v48  ;;  %v12540_v40 = vld [vmem:[#allocation5 + $0x918] ss:$88 sps:$4 sm:$0xff]  }
 0x22a   :  { %7273 = vmatprep.mubr.bf16.mxu1 %v14120_v48 }
 0x22b   :  { %7121 = vmatpush1.bf16.msra.mxu0 %v12465_v41  ;;  %v12545_v41 = vld [vmem:[#allocation5 + $0x9c4] ss:$88 sps:$4 sm:$0xff]  }
 0x22c   :  { %7244 = vmatpush1.bf16.msra.mxu1 %v12468_v42  ;;  %7122 = vmatprep.subr.bf16.mxu0 %v12473_v43  ;;  %v12548_v42 = vld [vmem:[#allocation5 + $0x9cc] ss:$88 sps:$4 sm:$0xff]   ;;  %v12543_v43 = vld [vmem:[#allocation5 + $0x9c0] ss:$88 sps:$4 sm:$0xff]  }
 0x22d   :  { %7245 = vmatprep.subr.bf16.mxu1 %v12476_v44  ;;  %v12546_v44 = vld [vmem:[#allocation5 + $0x9c8] ss:$88 sps:$4 sm:$0xff]  }
 0x22f   :  { %7123 = vmatpush1.bf16.msra.mxu0 %v12471_v45  ;;  %v12551_v45 = vld [vmem:[#allocation5 + $0xa74] ss:$88 sps:$4 sm:$0xff]  }
 0x230   :  { %7246 = vmatpush1.bf16.msra.mxu1 %v12474_v46  ;;  %7124 = vmatprep.subr.bf16.mxu0 %v12479_v47  ;;  %v12554_v46 = vld [vmem:[#allocation5 + $0xa7c] ss:$88 sps:$4 sm:$0xff]   ;;  %v12549_v47 = vld [vmem:[#allocation5 + $0xa70] ss:$88 sps:$4 sm:$0xff]  }
 0x231   :  { %7247 = vmatprep.subr.bf16.mxu1 %v12482_v49  ;;  %v12552_v49 = vld [vmem:[#allocation5 + $0xa78] ss:$88 sps:$4 sm:$0xff]  }
 0x233   :  { %7125 = vmatpush1.bf16.msra.mxu0 %v12477_v50  ;;  %v12557_v50 = vld [vmem:[#allocation5 + $0xb24] ss:$88 sps:$4 sm:$0xff]  }
 0x234   :  { %7248 = vmatpush1.bf16.msra.mxu1 %v12480_v51  ;;  %7126 = vmatprep.subr.bf16.mxu0 %v12485_v52  ;;  %v12560_v51 = vld [vmem:[#allocation5 + $0xb2c] ss:$88 sps:$4 sm:$0xff]   ;;  %v12555_v52 = vld [vmem:[#allocation5 + $0xb20] ss:$88 sps:$4 sm:$0xff]  }
 0x235   :  { %7249 = vmatprep.subr.bf16.mxu1 %v12488_v53  ;;  %v12558_v53 = vld [vmem:[#allocation5 + $0xb28] ss:$88 sps:$4 sm:$0xff]  }
 0x237   :  { %7127 = vmatpush1.bf16.msra.mxu0 %v12483_v54  ;;  %v12563_v54 = vld [vmem:[#allocation5 + $0xbd4] ss:$88 sps:$4 sm:$0xff]  }
 0x238   :  { %7250 = vmatpush1.bf16.msra.mxu1 %v12486_v55  ;;  %7128 = vmatprep.subr.bf16.mxu0 %v12491_v56  ;;  %v12566_v55 = vld [vmem:[#allocation5 + $0xbdc] ss:$88 sps:$4 sm:$0xff]   ;;  %v12561_v56 = vld [vmem:[#allocation5 + $0xbd0] ss:$88 sps:$4 sm:$0xff]  }
 0x239   :  { %7251 = vmatprep.subr.bf16.mxu1 %v12494_v57  ;;  %v14170_v62 = vpop.f32.mrb[0].mxu0  ;;  %v12564_v57 = vld [vmem:[#allocation5 + $0xbd8] ss:$88 sps:$4 sm:$0xff]  }
 0x23a   :  { %v14172_v63 = vpop.f32.mrb[0].mxu1  ;;  %v14174_v0 = vpop.f32.mrb[1].mxu0 }
 0x23b   :  { %v14176_v1 = vpop.f32.mrb[1].mxu1  ;;  %v6746_v2 = vpop.f32.mrb[2].mxu0  ;;  %7129 = vmatpush1.bf16.msra.mxu0 %v12489_v58  ;;  %v12569_v58 = vld [vmem:[#allocation5 + $0xc84] ss:$88 sps:$4 sm:$0xff]  }
 0x23c   :  { %7252 = vmatpush1.bf16.msra.mxu1 %v12492_v59  ;;  %v6869_v6 = vpop.f32.mrb[2].mxu1  ;;  %v6747_v7 = vpop.f32.mrb[3].mxu0  ;;  %7130 = vmatprep.subr.bf16.mxu0 %v12497_v60  ;;  %v12572_v59 = vld [vmem:[#allocation5 + $0xc8c] ss:$88 sps:$4 sm:$0xff]   ;;  %v12567_v60 = vld [vmem:[#allocation5 + $0xc80] ss:$88 sps:$4 sm:$0xff]  }
 0x23d   :  { %7253 = vmatprep.subr.bf16.mxu1 %v12500_v61  ;;  %v6870_v11 = vpop.f32.mrb[3].mxu1  ;;  %v12570_v61 = vld [vmem:[#allocation5 + $0xc88] ss:$88 sps:$4 sm:$0xff]   ;;  %v12575_v2 = vld [vmem:[#allocation5 + $0xd34] ss:$88 sps:$4 sm:$0xff]  }
 0x23e   :  { %v12576_v6 = vld [vmem:[#allocation5 + $0xd38] ss:$88 sps:$4 sm:$0xff]   ;;  %v12581_v7 = vld [vmem:[#allocation5 + $0xde4] ss:$88 sps:$4 sm:$0xff]   ;;  %v12582_v11 = vld [vmem:[#allocation5 + $0xde8] ss:$88 sps:$4 sm:$0xff]  }
 0x23f   :  { %7131 = vmatpush1.bf16.msra.mxu0 %v12495_v3  ;;  %v12578_v3 = vld [vmem:[#allocation5 + $0xd3c] ss:$88 sps:$4 sm:$0xff]  }
 0x240   :  { %7254 = vmatpush1.bf16.msra.mxu1 %v12498_v4  ;;  %7132 = vmatprep.subr.bf16.mxu0 %v12503_v8  ;;  %v12573_v4 = vld [vmem:[#allocation5 + $0xd30] ss:$88 sps:$4 sm:$0xff]   ;;  %v12584_v8 = vld [vmem:[#allocation5 + $0xdec] ss:$88 sps:$4 sm:$0xff]  }
 0x241   :  { %7255 = vmatprep.subr.bf16.mxu1 %v12506_v9  ;;  %v12579_v9 = vld [vmem:[#allocation5 + $0xde0] ss:$88 sps:$4 sm:$0xff]  }
 0x243   :  { %7133 = vmatpush1.bf16.msra.mxu0 %v12501_v12  ;;  %v12587_v12 = vld [vmem:[#allocation5 + $0xe94] ss:$88 sps:$4 sm:$0xff]  }
 0x244   :  { %7256 = vmatpush1.bf16.msra.mxu1 %v12504_v14  ;;  %7134 = vmatprep.subr.bf16.mxu0 %v12509_v16  ;;  %v12590_v14 = vld [vmem:[#allocation5 + $0xe9c] ss:$88 sps:$4 sm:$0xff]   ;;  %v12585_v16 = vld [vmem:[#allocation5 + $0xe90] ss:$88 sps:$4 sm:$0xff]  }
 0x245   :  { %7257 = vmatprep.subr.bf16.mxu1 %v12512_v17  ;;  %v12588_v17 = vld [vmem:[#allocation5 + $0xe98] ss:$88 sps:$4 sm:$0xff]  }
 0x247   :  { %7135 = vmatpush1.bf16.msra.mxu0 %v12507_v19  ;;  %v12593_v19 = vld [vmem:[#allocation5 + $0xf44] ss:$88 sps:$4 sm:$0xff]  }
 0x248   :  { %7258 = vmatpush1.bf16.msra.mxu1 %v12510_v20  ;;  %7136 = vmatprep.subr.bf16.mxu0 %v12515_v21  ;;  %v12596_v20 = vld [vmem:[#allocation5 + $0xf4c] ss:$88 sps:$4 sm:$0xff]   ;;  %v12591_v21 = vld [vmem:[#allocation5 + $0xf40] ss:$88 sps:$4 sm:$0xff]  }
 0x249   :  { %7259 = vmatprep.subr.bf16.mxu1 %v12518_v22  ;;  %v12594_v22 = vld [vmem:[#allocation5 + $0xf48] ss:$88 sps:$4 sm:$0xff]  }
 0x24b   :  { %7137 = vmatpush1.bf16.msra.mxu0 %v12513_v23  ;;  %v12599_v23 = vld [vmem:[#allocation5 + $0xff4] ss:$88 sps:$4 sm:$0xff]  }
 0x24c   :  { %7260 = vmatpush1.bf16.msra.mxu1 %v12516_v24  ;;  %7138 = vmatprep.subr.bf16.mxu0 %v12521_v25  ;;  %v12602_v24 = vld [vmem:[#allocation5 + $0xffc] ss:$88 sps:$4 sm:$0xff]   ;;  %v12597_v25 = vld [vmem:[#allocation5 + $0xff0] ss:$88 sps:$4 sm:$0xff]  }
 0x24d   :  { %7261 = vmatprep.subr.bf16.mxu1 %v12524_v13  ;;  %v12600_v13 = vld [vmem:[#allocation5 + $0xff8] ss:$88 sps:$4 sm:$0xff]  }
 0x24f   :  { %7139 = vmatpush1.bf16.msra.mxu0 %v12519_v26  ;;  %v12605_v26 = vld [vmem:[#allocation5 + $0x10a4] ss:$88 sps:$4 sm:$0xff]  }
 0x250   :  { %7262 = vmatpush1.bf16.msra.mxu1 %v12522_v27  ;;  %7140 = vmatprep.subr.bf16.mxu0 %v12527_v28  ;;  %v12608_v27 = vld [vmem:[#allocation5 + $0x10ac] ss:$88 sps:$4 sm:$0xff]   ;;  %v12603_v28 = vld [vmem:[#allocation5 + $0x10a0] ss:$88 sps:$4 sm:$0xff]  }
 0x251   :  { %7263 = vmatprep.subr.bf16.mxu1 %v12530_v29  ;;  %v12606_v29 = vld [vmem:[#allocation5 + $0x10a8] ss:$88 sps:$4 sm:$0xff]  }
 0x253   :  { %7141 = vmatpush1.bf16.msra.mxu0 %v12525_v31  ;;  %v12611_v31 = vld [vmem:[#allocation5 + $0x1154] ss:$88 sps:$4 sm:$0xff]  }
 0x254   :  { %7264 = vmatpush1.bf16.msra.mxu1 %v12528_v32  ;;  %7142 = vmatprep.subr.bf16.mxu0 %v12533_v33  ;;  %v12614_v32 = vld [vmem:[#allocation5 + $0x115c] ss:$88 sps:$4 sm:$0xff]   ;;  %v12609_v33 = vld [vmem:[#allocation5 + $0x1150] ss:$88 sps:$4 sm:$0xff]  }
 0x255   :  { %7265 = vmatprep.subr.bf16.mxu1 %v12536_v34  ;;  %v12612_v34 = vld [vmem:[#allocation5 + $0x1158] ss:$88 sps:$4 sm:$0xff]  }
 0x257   :  { %7143 = vmatpush1.bf16.msra.mxu0 %v12531_v35  ;;  %v12617_v35 = vld [vmem:[#allocation5 + $0x1204] ss:$88 sps:$4 sm:$0xff]  }
 0x258   :  { %7266 = vmatpush1.bf16.msra.mxu1 %v12534_v36  ;;  %7144 = vmatprep.subr.bf16.mxu0 %v12539_v37  ;;  %v12620_v36 = vld [vmem:[#allocation5 + $0x120c] ss:$88 sps:$4 sm:$0xff]   ;;  %v12615_v37 = vld [vmem:[#allocation5 + $0x1200] ss:$88 sps:$4 sm:$0xff]  }
 0x259   :  { %7267 = vmatprep.subr.bf16.mxu1 %v12542_v38  ;;  %v12618_v38 = vld [vmem:[#allocation5 + $0x1208] ss:$88 sps:$4 sm:$0xff]  }
 0x25b   :  { %7145 = vmatpush1.bf16.msra.mxu0 %v12537_v39  ;;  %v12623_v39 = vld [vmem:[#allocation5 + $0x12b4] ss:$88 sps:$4 sm:$0xff]  }
 0x25c   :  { %7268 = vmatpush1.bf16.msra.mxu1 %v12540_v40  ;;  %7146 = vmatprep.subr.bf16.mxu0 %v12545_v41  ;;  %v12626_v40 = vld [vmem:[#allocation5 + $0x12bc] ss:$88 sps:$4 sm:$0xff]   ;;  %v12621_v41 = vld [vmem:[#allocation5 + $0x12b0] ss:$88 sps:$4 sm:$0xff]  }
 0x25d   :  { %7269 = vmatprep.subr.bf16.mxu1 %v12548_v42  ;;  %v12624_v42 = vld [vmem:[#allocation5 + $0x12b8] ss:$88 sps:$4 sm:$0xff]  }
 0x25f   :  { %7147 = vmatpush1.bf16.msra.mxu0 %v12543_v43  ;;  %v12629_v43 = vld [vmem:[#allocation5 + $0x1364] ss:$88 sps:$4 sm:$0xff]  }
 0x260   :  { %7270 = vmatpush1.bf16.msra.mxu1 %v12546_v44  ;;  %7148 = vmatprep.subr.bf16.mxu0 %v12551_v45  ;;  %v12632_v44 = vld [vmem:[#allocation5 + $0x136c] ss:$88 sps:$4 sm:$0xff]   ;;  %v12627_v45 = vld [vmem:[#allocation5 + $0x1360] ss:$88 sps:$4 sm:$0xff]  }
 0x261   :  { %7271 = vmatprep.subr.bf16.mxu1 %v12554_v46  ;;  %v12630_v46 = vld [vmem:[#allocation5 + $0x1368] ss:$88 sps:$4 sm:$0xff]  }
 0x263   :  { %7149 = vmatpush1.bf16.msra.mxu0 %v12549_v47  ;;  %v12635_v47 = vld [vmem:[#allocation5 + $0x1414] ss:$88 sps:$4 sm:$0xff]  }
 0x264   :  { %7272 = vmatpush1.bf16.msra.mxu1 %v12552_v49  ;;  %7159 = vmatprep.subr.bf16.mxu0 %v12557_v50  ;;  %v12638_v49 = vld [vmem:[#allocation5 + $0x141c] ss:$88 sps:$4 sm:$0xff]   ;;  %v12633_v50 = vld [vmem:[#allocation5 + $0x1410] ss:$88 sps:$4 sm:$0xff]  }
 0x265   :  { %7282 = vmatprep.subr.bf16.mxu1 %v12560_v51  ;;  %v12636_v51 = vld [vmem:[#allocation5 + $0x1418] ss:$88 sps:$4 sm:$0xff]  }
 0x266   :  { %7151 = vmatmul.mubr.bf16.vlgmr.msra.gmra.mrb[8].mxu0 %v14124_v5 }
 0x267   :  { %7274 = vmatmul.mubr.bf16.vlgmr.msra.gmra.mrb[8].mxu1 %v14124_v5  ;;  %7160 = vmatpush1.bf16.msra.mxu0 %v12555_v52  ;;  %v12641_v52 = vld [vmem:[#allocation5 + $0x14c4] ss:$88 sps:$4 sm:$0xff]  }
 0x268   :  { %7283 = vmatpush1.bf16.msra.mxu1 %v12558_v53  ;;  %7161 = vmatprep.subr.bf16.mxu0 %v12563_v54  ;;  %v12644_v53 = vld [vmem:[#allocation5 + $0x14cc] ss:$88 sps:$4 sm:$0xff]   ;;  %v12639_v54 = vld [vmem:[#allocation5 + $0x14c0] ss:$88 sps:$4 sm:$0xff]  }
 0x269   :  { %7284 = vmatprep.subr.bf16.mxu1 %v12566_v55  ;;  %7191 = vmatprep.mubr.bf16.mxu0 %v14132_v30  ;;  %v12642_v55 = vld [vmem:[#allocation5 + $0x14c8] ss:$88 sps:$4 sm:$0xff]  }
 0x26a   :  { %7314 = vmatprep.mubr.bf16.mxu1 %v14132_v30 }
 0x26b   :  { %7162 = vmatpush1.bf16.msra.mxu0 %v12561_v56  ;;  %v12647_v56 = vld [vmem:[#allocation5 + $0x1574] ss:$88 sps:$4 sm:$0xff]  }
 0x26c   :  { %7285 = vmatpush1.bf16.msra.mxu1 %v12564_v57  ;;  %7163 = vmatprep.subr.bf16.mxu0 %v12569_v58  ;;  %v12650_v57 = vld [vmem:[#allocation5 + $0x157c] ss:$88 sps:$4 sm:$0xff]   ;;  %v12645_v58 = vld [vmem:[#allocation5 + $0x1570] ss:$88 sps:$4 sm:$0xff]  }
 0x26d   :  { %7286 = vmatprep.subr.bf16.mxu1 %v12572_v59  ;;  %v12648_v59 = vld [vmem:[#allocation5 + $0x1578] ss:$88 sps:$4 sm:$0xff]  }
 0x26f   :  { %7164 = vmatpush1.bf16.msra.mxu0 %v12567_v60  ;;  %v12653_v60 = vld [vmem:[#allocation5 + $0x1624] ss:$88 sps:$4 sm:$0xff]  }
 0x270   :  { %7287 = vmatpush1.bf16.msra.mxu1 %v12570_v61  ;;  %7165 = vmatprep.subr.bf16.mxu0 %v12575_v2  ;;  %v12656_v61 = vld [vmem:[#allocation5 + $0x162c] ss:$88 sps:$4 sm:$0xff]   ;;  %v12651_v2 = vld [vmem:[#allocation5 + $0x1620] ss:$88 sps:$4 sm:$0xff]  }
 0x271   :  { %7288 = vmatprep.subr.bf16.mxu1 %v12578_v3  ;;  %v12654_v3 = vld [vmem:[#allocation5 + $0x1628] ss:$88 sps:$4 sm:$0xff]  }
 0x273   :  { %7166 = vmatpush1.bf16.msra.mxu0 %v12573_v4  ;;  %v12659_v4 = vld [vmem:[#allocation5 + $0x16d4] ss:$88 sps:$4 sm:$0xff]  }
 0x274   :  { %7289 = vmatpush1.bf16.msra.mxu1 %v12576_v6  ;;  %7167 = vmatprep.subr.bf16.mxu0 %v12581_v7  ;;  %v12662_v6 = vld [vmem:[#allocation5 + $0x16dc] ss:$88 sps:$4 sm:$0xff]   ;;  %v12657_v7 = vld [vmem:[#allocation5 + $0x16d0] ss:$88 sps:$4 sm:$0xff]  }
 0x275   :  { %7290 = vmatprep.subr.bf16.mxu1 %v12584_v8  ;;  %v12660_v8 = vld [vmem:[#allocation5 + $0x16d8] ss:$88 sps:$4 sm:$0xff]  }
 0x277   :  { %7168 = vmatpush1.bf16.msra.mxu0 %v12579_v9  ;;  %v12665_v9 = vld [vmem:[#allocation5 + $0x1784] ss:$88 sps:$4 sm:$0xff]  }
 0x278   :  { %7291 = vmatpush1.bf16.msra.mxu1 %v12582_v11  ;;  %7169 = vmatprep.subr.bf16.mxu0 %v12587_v12  ;;  %v12668_v11 = vld [vmem:[#allocation5 + $0x178c] ss:$88 sps:$4 sm:$0xff]   ;;  %v12663_v12 = vld [vmem:[#allocation5 + $0x1780] ss:$88 sps:$4 sm:$0xff]  }
 0x279   :  { %7292 = vmatprep.subr.bf16.mxu1 %v12590_v14  ;;  %v12666_v14 = vld [vmem:[#allocation5 + $0x1788] ss:$88 sps:$4 sm:$0xff]  }
 0x27b   :  { %7170 = vmatpush1.bf16.msra.mxu0 %v12585_v16  ;;  %v12671_v16 = vld [vmem:[#allocation5 + $0x1834] ss:$88 sps:$4 sm:$0xff]  }
 0x27c   :  { %7293 = vmatpush1.bf16.msra.mxu1 %v12588_v17  ;;  %7171 = vmatprep.subr.bf16.mxu0 %v12593_v19  ;;  %v12674_v17 = vld [vmem:[#allocation5 + $0x183c] ss:$88 sps:$4 sm:$0xff]   ;;  %v12669_v19 = vld [vmem:[#allocation5 + $0x1830] ss:$88 sps:$4 sm:$0xff]  }
 0x27d   :  { %7294 = vmatprep.subr.bf16.mxu1 %v12596_v20  ;;  %v12672_v20 = vld [vmem:[#allocation5 + $0x1838] ss:$88 sps:$4 sm:$0xff]  }
 0x27f   :  { %7172 = vmatpush1.bf16.msra.mxu0 %v12591_v21  ;;  %v12677_v21 = vld [vmem:[#allocation5 + $0x18e4] ss:$88 sps:$4 sm:$0xff]  }
 0x280   :  { %7295 = vmatpush1.bf16.msra.mxu1 %v12594_v22  ;;  %7173 = vmatprep.subr.bf16.mxu0 %v12599_v23  ;;  %v12680_v22 = vld [vmem:[#allocation5 + $0x18ec] ss:$88 sps:$4 sm:$0xff]   ;;  %v12675_v23 = vld [vmem:[#allocation5 + $0x18e0] ss:$88 sps:$4 sm:$0xff]  }
 0x281   :  { %7296 = vmatprep.subr.bf16.mxu1 %v12602_v24  ;;  %v12678_v24 = vld [vmem:[#allocation5 + $0x18e8] ss:$88 sps:$4 sm:$0xff]  }
 0x283   :  { %7174 = vmatpush1.bf16.msra.mxu0 %v12597_v25  ;;  %v12683_v25 = vld [vmem:[#allocation5 + $0x1994] ss:$88 sps:$4 sm:$0xff]  }
 0x284   :  { %7297 = vmatpush1.bf16.msra.mxu1 %v12600_v13  ;;  %7175 = vmatprep.subr.bf16.mxu0 %v12605_v26  ;;  %v12686_v13 = vld [vmem:[#allocation5 + $0x199c] ss:$88 sps:$4 sm:$0xff]   ;;  %v12681_v26 = vld [vmem:[#allocation5 + $0x1990] ss:$88 sps:$4 sm:$0xff]  }
 0x285   :  { %7298 = vmatprep.subr.bf16.mxu1 %v12608_v27  ;;  %v12684_v27 = vld [vmem:[#allocation5 + $0x1998] ss:$88 sps:$4 sm:$0xff]  }
 0x287   :  { %7176 = vmatpush1.bf16.msra.mxu0 %v12603_v28  ;;  %v12689_v28 = vld [vmem:[#allocation5 + $0x1a44] ss:$88 sps:$4 sm:$0xff]  }
 0x288   :  { %7299 = vmatpush1.bf16.msra.mxu1 %v12606_v29  ;;  %7177 = vmatprep.subr.bf16.mxu0 %v12611_v31  ;;  %v12692_v29 = vld [vmem:[#allocation5 + $0x1a4c] ss:$88 sps:$4 sm:$0xff]   ;;  %v12687_v31 = vld [vmem:[#allocation5 + $0x1a40] ss:$88 sps:$4 sm:$0xff]  }
 0x289   :  { %7300 = vmatprep.subr.bf16.mxu1 %v12614_v32  ;;  %v12690_v32 = vld [vmem:[#allocation5 + $0x1a48] ss:$88 sps:$4 sm:$0xff]  }
 0x28b   :  { %7178 = vmatpush1.bf16.msra.mxu0 %v12609_v33  ;;  %v12695_v33 = vld [vmem:[#allocation5 + $0x1af4] ss:$88 sps:$4 sm:$0xff]  }
 0x28c   :  { %7301 = vmatpush1.bf16.msra.mxu1 %v12612_v34  ;;  %7179 = vmatprep.subr.bf16.mxu0 %v12617_v35  ;;  %v12698_v34 = vld [vmem:[#allocation5 + $0x1afc] ss:$88 sps:$4 sm:$0xff]   ;;  %v12693_v35 = vld [vmem:[#allocation5 + $0x1af0] ss:$88 sps:$4 sm:$0xff]  }
 0x28d   :  { %7302 = vmatprep.subr.bf16.mxu1 %v12620_v36  ;;  %v12696_v36 = vld [vmem:[#allocation5 + $0x1af8] ss:$88 sps:$4 sm:$0xff]  }
 0x28f   :  { %7180 = vmatpush1.bf16.msra.mxu0 %v12615_v37  ;;  %v12701_v37 = vld [vmem:[#allocation5 + $0x1ba4] ss:$88 sps:$4 sm:$0xff]  }
 0x290   :  { %7303 = vmatpush1.bf16.msra.mxu1 %v12618_v38  ;;  %7181 = vmatprep.subr.bf16.mxu0 %v12623_v39  ;;  %v12704_v38 = vld [vmem:[#allocation5 + $0x1bac] ss:$88 sps:$4 sm:$0xff]   ;;  %v12699_v39 = vld [vmem:[#allocation5 + $0x1ba0] ss:$88 sps:$4 sm:$0xff]  }
 0x291   :  { %7304 = vmatprep.subr.bf16.mxu1 %v12626_v40  ;;  %v12702_v40 = vld [vmem:[#allocation5 + $0x1ba8] ss:$88 sps:$4 sm:$0xff]  }
 0x293   :  { %7182 = vmatpush1.bf16.msra.mxu0 %v12621_v41  ;;  %v12707_v41 = vld [vmem:[#allocation5 + $0x1c54] ss:$88 sps:$4 sm:$0xff]  }
 0x294   :  { %7305 = vmatpush1.bf16.msra.mxu1 %v12624_v42  ;;  %7183 = vmatprep.subr.bf16.mxu0 %v12629_v43  ;;  %v12710_v42 = vld [vmem:[#allocation5 + $0x1c5c] ss:$88 sps:$4 sm:$0xff]   ;;  %v12705_v43 = vld [vmem:[#allocation5 + $0x1c50] ss:$88 sps:$4 sm:$0xff]  }
 0x295   :  { %7306 = vmatprep.subr.bf16.mxu1 %v12632_v44  ;;  %v12708_v44 = vld [vmem:[#allocation5 + $0x1c58] ss:$88 sps:$4 sm:$0xff]  }
 0x297   :  { %7184 = vmatpush1.bf16.msra.mxu0 %v12627_v45  ;;  %v12713_v45 = vld [vmem:[#allocation5 + $0x1d04] ss:$88 sps:$4 sm:$0xff]  }
 0x298   :  { %7307 = vmatpush1.bf16.msra.mxu1 %v12630_v46  ;;  %7185 = vmatprep.subr.bf16.mxu0 %v12635_v47  ;;  %v12716_v46 = vld [vmem:[#allocation5 + $0x1d0c] ss:$88 sps:$4 sm:$0xff]   ;;  %v12711_v47 = vld [vmem:[#allocation5 + $0x1d00] ss:$88 sps:$4 sm:$0xff]  }
 0x299   :  { %7308 = vmatprep.subr.bf16.mxu1 %v12638_v49  ;;  %v12714_v49 = vld [vmem:[#allocation5 + $0x1d08] ss:$88 sps:$4 sm:$0xff]  }
 0x29b   :  { %7186 = vmatpush1.bf16.msra.mxu0 %v12633_v50  ;;  %v12719_v50 = vld [vmem:[#allocation5 + $0x1db4] ss:$88 sps:$4 sm:$0xff]  }
 0x29c   :  { %7309 = vmatpush1.bf16.msra.mxu1 %v12636_v51  ;;  %7187 = vmatprep.subr.bf16.mxu0 %v12641_v52  ;;  %v12722_v51 = vld [vmem:[#allocation5 + $0x1dbc] ss:$88 sps:$4 sm:$0xff]   ;;  %v12717_v52 = vld [vmem:[#allocation5 + $0x1db0] ss:$88 sps:$4 sm:$0xff]  }
 0x29d   :  { %7310 = vmatprep.subr.bf16.mxu1 %v12644_v53  ;;  %v12720_v53 = vld [vmem:[#allocation5 + $0x1db8] ss:$88 sps:$4 sm:$0xff]  }
 0x29f   :  { %7188 = vmatpush1.bf16.msra.mxu0 %v12639_v54  ;;  %v12725_v54 = vld [vmem:[#allocation5 + $0x1e64] ss:$88 sps:$4 sm:$0xff]  }
 0x2a0   :  { %7311 = vmatpush1.bf16.msra.mxu1 %v12642_v55  ;;  %7189 = vmatprep.subr.bf16.mxu0 %v12647_v56  ;;  %v12728_v55 = vld [vmem:[#allocation5 + $0x1e6c] ss:$88 sps:$4 sm:$0xff]   ;;  %v12723_v56 = vld [vmem:[#allocation5 + $0x1e60] ss:$88 sps:$4 sm:$0xff]  }
 0x2a1   :  { %7312 = vmatprep.subr.bf16.mxu1 %v12650_v57  ;;  %v12726_v57 = vld [vmem:[#allocation5 + $0x1e68] ss:$88 sps:$4 sm:$0xff]  }
 0x2a3   :  { %7190 = vmatpush1.bf16.msra.mxu0 %v12645_v58  ;;  %v12731_v58 = vld [vmem:[#allocation5 + $0x1f14] ss:$88 sps:$4 sm:$0xff]  }
 0x2a4   :  { %7313 = vmatpush1.bf16.msra.mxu1 %v12648_v59  ;;  %7200 = vmatprep.subr.bf16.mxu0 %v12653_v60  ;;  %v12734_v59 = vld [vmem:[#allocation5 + $0x1f1c] ss:$88 sps:$4 sm:$0xff]   ;;  %v12729_v60 = vld [vmem:[#allocation5 + $0x1f10] ss:$88 sps:$4 sm:$0xff]  }
 0x2a5   :  { %7323 = vmatprep.subr.bf16.mxu1 %v12656_v61  ;;  %v12732_v61 = vld [vmem:[#allocation5 + $0x1f18] ss:$88 sps:$4 sm:$0xff]  }
 0x2a6   :  { %7192 = vmatmul.mubr.bf16.vlgmr.msra.gmra.mrb[8].mxu0 %v14138_v10 }
 0x2a7   :  { %7315 = vmatmul.mubr.bf16.vlgmr.msra.gmra.mrb[8].mxu1 %v14138_v10  ;;  %7201 = vmatpush1.bf16.msra.mxu0 %v12651_v2  ;;  %v12737_v2 = vld [vmem:[#allocation5 + $0x1fc4] ss:$88 sps:$4 sm:$0xff]  }
 0x2a8   :  { %7324 = vmatpush1.bf16.msra.mxu1 %v12654_v3  ;;  %7202 = vmatprep.subr.bf16.mxu0 %v12659_v4  ;;  %v12740_v3 = vld [vmem:[#allocation5 + $0x1fcc] ss:$88 sps:$4 sm:$0xff]   ;;  %v12735_v4 = vld [vmem:[#allocation5 + $0x1fc0] ss:$88 sps:$4 sm:$0xff]  }
 0x2a9   :  { %7325 = vmatprep.subr.bf16.mxu1 %v12662_v6  ;;  %7232 = vmatprep.mubr.bf16.mxu0 %v14144_v15  ;;  %v12738_v6 = vld [vmem:[#allocation5 + $0x1fc8] ss:$88 sps:$4 sm:$0xff]  }
 0x2aa   :  { %7355 = vmatprep.mubr.bf16.mxu1 %v14144_v15 }
 0x2ab   :  { %7203 = vmatpush1.bf16.msra.mxu0 %v12657_v7  ;;  %v12743_v7 = vld [vmem:[#allocation5 + $0x2074] ss:$88 sps:$4 sm:$0xff]  }
 0x2ac   :  { %7326 = vmatpush1.bf16.msra.mxu1 %v12660_v8  ;;  %7204 = vmatprep.subr.bf16.mxu0 %v12665_v9  ;;  %v12746_v8 = vld [vmem:[#allocation5 + $0x207c] ss:$88 sps:$4 sm:$0xff]   ;;  %v12741_v9 = vld [vmem:[#allocation5 + $0x2070] ss:$88 sps:$4 sm:$0xff]  }
 0x2ad   :  { %7327 = vmatprep.subr.bf16.mxu1 %v12668_v11  ;;  %v12744_v11 = vld [vmem:[#allocation5 + $0x2078] ss:$88 sps:$4 sm:$0xff]  }
 0x2af   :  { %7205 = vmatpush1.bf16.msra.mxu0 %v12663_v12  ;;  %v12749_v12 = vld [vmem:[#allocation5 + $0x34] ss:$88 sps:$4 sm:$0xff]  }
 0x2b0   :  { %7328 = vmatpush1.bf16.msra.mxu1 %v12666_v14  ;;  %7206 = vmatprep.subr.bf16.mxu0 %v12671_v16  ;;  %v12752_v14 = vld [vmem:[#allocation5 + $0x3c] ss:$88 sps:$4 sm:$0xff]   ;;  %v12747_v16 = vld [vmem:[#allocation5 + $0x30] ss:$88 sps:$4 sm:$0xff]  }
 0x2b1   :  { %7329 = vmatprep.subr.bf16.mxu1 %v12674_v17  ;;  %v12750_v17 = vld [vmem:[#allocation5 + $0x38] ss:$88 sps:$4 sm:$0xff]  }
 0x2b3   :  { %7207 = vmatpush1.bf16.msra.mxu0 %v12669_v19  ;;  %v12755_v19 = vld [vmem:[#allocation5 + $0xe4] ss:$88 sps:$4 sm:$0xff]  }
 0x2b4   :  { %7330 = vmatpush1.bf16.msra.mxu1 %v12672_v20  ;;  %7208 = vmatprep.subr.bf16.mxu0 %v12677_v21  ;;  %v12758_v20 = vld [vmem:[#allocation5 + $0xec] ss:$88 sps:$4 sm:$0xff]   ;;  %v12753_v21 = vld [vmem:[#allocation5 + $0xe0] ss:$88 sps:$4 sm:$0xff]  }
 0x2b5   :  { %7331 = vmatprep.subr.bf16.mxu1 %v12680_v22  ;;  %v12756_v22 = vld [vmem:[#allocation5 + $0xe8] ss:$88 sps:$4 sm:$0xff]  }
 0x2b7   :  { %7209 = vmatpush1.bf16.msra.mxu0 %v12675_v23  ;;  %v12761_v23 = vld [vmem:[#allocation5 + $0x194] ss:$88 sps:$4 sm:$0xff]  }
 0x2b8   :  { %7332 = vmatpush1.bf16.msra.mxu1 %v12678_v24  ;;  %7210 = vmatprep.subr.bf16.mxu0 %v12683_v25  ;;  %v12764_v24 = vld [vmem:[#allocation5 + $0x19c] ss:$88 sps:$4 sm:$0xff]   ;;  %v12759_v25 = vld [vmem:[#allocation5 + $0x190] ss:$88 sps:$4 sm:$0xff]  }
 0x2b9   :  { %7333 = vmatprep.subr.bf16.mxu1 %v12686_v13  ;;  %v12762_v13 = vld [vmem:[#allocation5 + $0x198] ss:$88 sps:$4 sm:$0xff]  }
 0x2bb   :  { %7211 = vmatpush1.bf16.msra.mxu0 %v12681_v26  ;;  %v12767_v26 = vld [vmem:[#allocation5 + $0x244] ss:$88 sps:$4 sm:$0xff]  }
 0x2bc   :  { %7334 = vmatpush1.bf16.msra.mxu1 %v12684_v27  ;;  %7212 = vmatprep.subr.bf16.mxu0 %v12689_v28  ;;  %v12770_v27 = vld [vmem:[#allocation5 + $0x24c] ss:$88 sps:$4 sm:$0xff]   ;;  %v12765_v28 = vld [vmem:[#allocation5 + $0x240] ss:$88 sps:$4 sm:$0xff]  }
 0x2bd   :  { %7335 = vmatprep.subr.bf16.mxu1 %v12692_v29  ;;  %v12768_v29 = vld [vmem:[#allocation5 + $0x248] ss:$88 sps:$4 sm:$0xff]  }
 0x2bf   :  { %7213 = vmatpush1.bf16.msra.mxu0 %v12687_v31  ;;  %v12773_v31 = vld [vmem:[#allocation5 + $0x2f4] ss:$88 sps:$4 sm:$0xff]  }
 0x2c0   :  { %7336 = vmatpush1.bf16.msra.mxu1 %v12690_v32  ;;  %7214 = vmatprep.subr.bf16.mxu0 %v12695_v33  ;;  %v12776_v32 = vld [vmem:[#allocation5 + $0x2fc] ss:$88 sps:$4 sm:$0xff]   ;;  %v12771_v33 = vld [vmem:[#allocation5 + $0x2f0] ss:$88 sps:$4 sm:$0xff]  }
 0x2c1   :  { %7337 = vmatprep.subr.bf16.mxu1 %v12698_v34  ;;  %v12774_v34 = vld [vmem:[#allocation5 + $0x2f8] ss:$88 sps:$4 sm:$0xff]  }
 0x2c3   :  { %7215 = vmatpush1.bf16.msra.mxu0 %v12693_v35  ;;  %v12779_v35 = vld [vmem:[#allocation5 + $0x3a4] ss:$88 sps:$4 sm:$0xff]  }
 0x2c4   :  { %7338 = vmatpush1.bf16.msra.mxu1 %v12696_v36  ;;  %7216 = vmatprep.subr.bf16.mxu0 %v12701_v37  ;;  %v12782_v36 = vld [vmem:[#allocation5 + $0x3ac] ss:$88 sps:$4 sm:$0xff]   ;;  %v12777_v37 = vld [vmem:[#allocation5 + $0x3a0] ss:$88 sps:$4 sm:$0xff]  }
 0x2c5   :  { %7339 = vmatprep.subr.bf16.mxu1 %v12704_v38  ;;  %v12780_v38 = vld [vmem:[#allocation5 + $0x3a8] ss:$88 sps:$4 sm:$0xff]  }
 0x2c7   :  { %7217 = vmatpush1.bf16.msra.mxu0 %v12699_v39  ;;  %v12785_v39 = vld [vmem:[#allocation5 + $0x454] ss:$88 sps:$4 sm:$0xff]  }
 0x2c8   :  { %7340 = vmatpush1.bf16.msra.mxu1 %v12702_v40  ;;  %7218 = vmatprep.subr.bf16.mxu0 %v12707_v41  ;;  %v12788_v40 = vld [vmem:[#allocation5 + $0x45c] ss:$88 sps:$4 sm:$0xff]  }
 0x2c9   :  { %7341 = vmatprep.subr.bf16.mxu1 %v12710_v42 }
 0x2cb   :  { %7219 = vmatpush1.bf16.msra.mxu0 %v12705_v43 }
 0x2cc   :  { %7342 = vmatpush1.bf16.msra.mxu1 %v12708_v44  ;;  %7220 = vmatprep.subr.bf16.mxu0 %v12713_v45 }
 0x2cd   :  { %7343 = vmatprep.subr.bf16.mxu1 %v12716_v46  ;;  %v12783_v46 = vld [vmem:[#allocation5 + $0x450] ss:$88 sps:$4 sm:$0xff]  }
 0x2cf   :  { %7221 = vmatpush1.bf16.msra.mxu0 %v12711_v47  ;;  %v12786_v47 = vld [vmem:[#allocation5 + $0x458] ss:$88 sps:$4 sm:$0xff]  }
 0x2d0   :  { %7344 = vmatpush1.bf16.msra.mxu1 %v12714_v49  ;;  %7222 = vmatprep.subr.bf16.mxu0 %v12719_v50 }
 0x2d1   :  { %7345 = vmatprep.subr.bf16.mxu1 %v12722_v51  ;;  %v12791_v51 = vld [vmem:[#allocation5 + $0x504] ss:$88 sps:$4 sm:$0xff]  }
 0x2d3   :  { %7223 = vmatpush1.bf16.msra.mxu0 %v12717_v52  ;;  %v12794_v52 = vld [vmem:[#allocation5 + $0x50c] ss:$88 sps:$4 sm:$0xff]  }
 0x2d4   :  { %7346 = vmatpush1.bf16.msra.mxu1 %v12720_v53  ;;  %7224 = vmatprep.subr.bf16.mxu0 %v12725_v54  ;;  %v12789_v54 = vld [vmem:[#allocation5 + $0x500] ss:$88 sps:$4 sm:$0xff]  }
 0x2d5   :  { %7347 = vmatprep.subr.bf16.mxu1 %v12728_v55  ;;  %v12792_v55 = vld [vmem:[#allocation5 + $0x508] ss:$88 sps:$4 sm:$0xff]  }
 0x2d7   :  { %7225 = vmatpush1.bf16.msra.mxu0 %v12723_v56  ;;  %v12797_v56 = vld [vmem:[#allocation5 + $0x5b4] ss:$88 sps:$4 sm:$0xff]  }
 0x2d8   :  { %7348 = vmatpush1.bf16.msra.mxu1 %v12726_v57  ;;  %7226 = vmatprep.subr.bf16.mxu0 %v12731_v58  ;;  %v12800_v57 = vld [vmem:[#allocation5 + $0x5bc] ss:$88 sps:$4 sm:$0xff]   ;;  %v12795_v58 = vld [vmem:[#allocation5 + $0x5b0] ss:$88 sps:$4 sm:$0xff]  }
 0x2d9   :  { %7349 = vmatprep.subr.bf16.mxu1 %v12734_v59  ;;  %v12798_v59 = vld [vmem:[#allocation5 + $0x5b8] ss:$88 sps:$4 sm:$0xff]  }
 0x2db   :  { %7227 = vmatpush1.bf16.msra.mxu0 %v12729_v60  ;;  %v12803_v60 = vld [vmem:[#allocation5 + $0x664] ss:$88 sps:$4 sm:$0xff]  }
 0x2dc   :  { %7350 = vmatpush1.bf16.msra.mxu1 %v12732_v61  ;;  %7228 = vmatprep.subr.bf16.mxu0 %v12737_v2  ;;  %v12806_v61 = vld [vmem:[#allocation5 + $0x66c] ss:$88 sps:$4 sm:$0xff]   ;;  %v12801_v2 = vld [vmem:[#allocation5 + $0x660] ss:$88 sps:$4 sm:$0xff]  }
 0x2dd   :  { %7351 = vmatprep.subr.bf16.mxu1 %v12740_v3  ;;  %v12804_v3 = vld [vmem:[#allocation5 + $0x668] ss:$88 sps:$4 sm:$0xff]  }
 0x2df   :  { %7229 = vmatpush1.bf16.msra.mxu0 %v12735_v4  ;;  %v12809_v4 = vld [vmem:[#allocation5 + $0x714] ss:$88 sps:$4 sm:$0xff]  }
 0x2e0   :  { %7352 = vmatpush1.bf16.msra.mxu1 %v12738_v6  ;;  %7230 = vmatprep.subr.bf16.mxu0 %v12743_v7  ;;  %v12812_v6 = vld [vmem:[#allocation5 + $0x71c] ss:$88 sps:$4 sm:$0xff]   ;;  %v12807_v7 = vld [vmem:[#allocation5 + $0x710] ss:$88 sps:$4 sm:$0xff]  }
 0x2e1   :  { %7353 = vmatprep.subr.bf16.mxu1 %v12746_v8  ;;  %v12810_v8 = vld [vmem:[#allocation5 + $0x718] ss:$88 sps:$4 sm:$0xff]  }
 0x2e3   :  { %7231 = vmatpush1.bf16.msra.mxu0 %v12741_v9  ;;  %v12815_v9 = vld [vmem:[#allocation5 + $0x7c4] ss:$88 sps:$4 sm:$0xff]  }
 0x2e4   :  { %7354 = vmatpush1.bf16.msra.mxu1 %v12744_v11  ;;  %7364 = vmatprep.subr.bf16.mxu0 %v12749_v12  ;;  %v12818_v11 = vld [vmem:[#allocation5 + $0x7cc] ss:$88 sps:$4 sm:$0xff]   ;;  %v12813_v12 = vld [vmem:[#allocation5 + $0x7c0] ss:$88 sps:$4 sm:$0xff]  }
 0x2e5   :  { %7487 = vmatprep.subr.bf16.mxu1 %v12752_v14  ;;  %v12816_v14 = vld [vmem:[#allocation5 + $0x7c8] ss:$88 sps:$4 sm:$0xff]  }
 0x2e6   :  { %7233 = vmatmul.mubr.bf16.vlgmr.msra.gmra.mrb[8].mxu0 %v14152_v18 }
 0x2e7   :  { %7356 = vmatmul.mubr.bf16.vlgmr.msra.gmra.mrb[8].mxu1 %v14152_v18  ;;  %7365 = vmatpush1.bf16.msra.mxu0 %v12747_v16  ;;  %v12821_v16 = vld [vmem:[#allocation5 + $0x874] ss:$88 sps:$4 sm:$0xff]  }
 0x2e8   :  { %7488 = vmatpush1.bf16.msra.mxu1 %v12750_v17  ;;  %7366 = vmatprep.subr.bf16.mxu0 %v12755_v19  ;;  %v12824_v17 = vld [vmem:[#allocation5 + $0x87c] ss:$88 sps:$4 sm:$0xff]   ;;  %v12819_v19 = vld [vmem:[#allocation5 + $0x870] ss:$88 sps:$4 sm:$0xff]  }
 0x2e9   :  { %7489 = vmatprep.subr.bf16.mxu1 %v12758_v20  ;;  %7396 = vmatprep.mubr.bf16.mxu0 %v14120_v48  ;;  %v12822_v20 = vld [vmem:[#allocation5 + $0x878] ss:$88 sps:$4 sm:$0xff]  }
 0x2ea   :  { %7519 = vmatprep.mubr.bf16.mxu1 %v14120_v48 }
 0x2eb   :  { %7367 = vmatpush1.bf16.msra.mxu0 %v12753_v21  ;;  %v12827_v21 = vld [vmem:[#allocation5 + $0x924] ss:$88 sps:$4 sm:$0xff]  }
 0x2ec   :  { %7490 = vmatpush1.bf16.msra.mxu1 %v12756_v22  ;;  %7368 = vmatprep.subr.bf16.mxu0 %v12761_v23  ;;  %v12830_v22 = vld [vmem:[#allocation5 + $0x92c] ss:$88 sps:$4 sm:$0xff]   ;;  %v12825_v23 = vld [vmem:[#allocation5 + $0x920] ss:$88 sps:$4 sm:$0xff]  }
 0x2ed   :  { %7491 = vmatprep.subr.bf16.mxu1 %v12764_v24  ;;  %v12828_v24 = vld [vmem:[#allocation5 + $0x928] ss:$88 sps:$4 sm:$0xff]  }
 0x2ef   :  { %7369 = vmatpush1.bf16.msra.mxu0 %v12759_v25  ;;  %v12833_v25 = vld [vmem:[#allocation5 + $0x9d4] ss:$88 sps:$4 sm:$0xff]  }
 0x2f0   :  { %7492 = vmatpush1.bf16.msra.mxu1 %v12762_v13  ;;  %7370 = vmatprep.subr.bf16.mxu0 %v12767_v26  ;;  %v12836_v13 = vld [vmem:[#allocation5 + $0x9dc] ss:$88 sps:$4 sm:$0xff]   ;;  %v12831_v26 = vld [vmem:[#allocation5 + $0x9d0] ss:$88 sps:$4 sm:$0xff]  }
 0x2f1   :  { %7493 = vmatprep.subr.bf16.mxu1 %v12770_v27  ;;  %v12834_v27 = vld [vmem:[#allocation5 + $0x9d8] ss:$88 sps:$4 sm:$0xff]  }
 0x2f3   :  { %7371 = vmatpush1.bf16.msra.mxu0 %v12765_v28  ;;  %v12839_v28 = vld [vmem:[#allocation5 + $0xa84] ss:$88 sps:$4 sm:$0xff]  }
 0x2f4   :  { %7494 = vmatpush1.bf16.msra.mxu1 %v12768_v29  ;;  %7372 = vmatprep.subr.bf16.mxu0 %v12773_v31  ;;  %v12842_v29 = vld [vmem:[#allocation5 + $0xa8c] ss:$88 sps:$4 sm:$0xff]   ;;  %v12837_v31 = vld [vmem:[#allocation5 + $0xa80] ss:$88 sps:$4 sm:$0xff]  }
 0x2f5   :  { %7495 = vmatprep.subr.bf16.mxu1 %v12776_v32  ;;  %v12840_v32 = vld [vmem:[#allocation5 + $0xa88] ss:$88 sps:$4 sm:$0xff]  }
 0x2f7   :  { %7373 = vmatpush1.bf16.msra.mxu0 %v12771_v33  ;;  %v12845_v33 = vld [vmem:[#allocation5 + $0xb34] ss:$88 sps:$4 sm:$0xff]  }
 0x2f8   :  { %7496 = vmatpush1.bf16.msra.mxu1 %v12774_v34  ;;  %7374 = vmatprep.subr.bf16.mxu0 %v12779_v35  ;;  %v12848_v34 = vld [vmem:[#allocation5 + $0xb3c] ss:$88 sps:$4 sm:$0xff]   ;;  %v12843_v35 = vld [vmem:[#allocation5 + $0xb30] ss:$88 sps:$4 sm:$0xff]  }
 0x2f9   :  { %7497 = vmatprep.subr.bf16.mxu1 %v12782_v36  ;;  %v14190_v41 = vpop.f32.mrb[4].mxu0  ;;  %v12846_v36 = vld [vmem:[#allocation5 + $0xb38] ss:$88 sps:$4 sm:$0xff]  }
 0x2fa   :  { %v14192_v42 = vpop.f32.mrb[4].mxu1  ;;  %v14194_v43 = vpop.f32.mrb[5].mxu0 }
 0x2fb   :  { %v14196_v44 = vpop.f32.mrb[5].mxu1  ;;  %v6992_v45 = vpop.f32.mrb[6].mxu0  ;;  %7375 = vmatpush1.bf16.msra.mxu0 %v12777_v37  ;;  %v12851_v37 = vld [vmem:[#allocation5 + $0xbe4] ss:$88 sps:$4 sm:$0xff]  }
 0x2fc   :  { %7498 = vmatpush1.bf16.msra.mxu1 %v12780_v38  ;;  %v7115_v49 = vpop.f32.mrb[6].mxu1  ;;  %v6993_v50 = vpop.f32.mrb[7].mxu0  ;;  %7376 = vmatprep.subr.bf16.mxu0 %v12785_v39  ;;  %v12854_v38 = vld [vmem:[#allocation5 + $0xbec] ss:$88 sps:$4 sm:$0xff]   ;;  %v12849_v39 = vld [vmem:[#allocation5 + $0xbe0] ss:$88 sps:$4 sm:$0xff]  }
 0x2fd   :  { %7499 = vmatprep.subr.bf16.mxu1 %v12788_v40  ;;  %v7116_v53 = vpop.f32.mrb[7].mxu1  ;;  %v12852_v40 = vld [vmem:[#allocation5 + $0xbe8] ss:$88 sps:$4 sm:$0xff]   ;;  %v12857_v45 = vld [vmem:[#allocation5 + $0xc94] ss:$88 sps:$4 sm:$0xff]  }
 0x2fe   :  { %v12858_v49 = vld [vmem:[#allocation5 + $0xc98] ss:$88 sps:$4 sm:$0xff]   ;;  %v12863_v50 = vld [vmem:[#allocation5 + $0xd44] ss:$88 sps:$4 sm:$0xff]   ;;  %v12864_v53 = vld [vmem:[#allocation5 + $0xd48] ss:$88 sps:$4 sm:$0xff]  }
 0x2ff   :  { %7377 = vmatpush1.bf16.msra.mxu0 %v12783_v46  ;;  %v12860_v46 = vld [vmem:[#allocation5 + $0xc9c] ss:$88 sps:$4 sm:$0xff]  }
 0x300   :  { %7500 = vmatpush1.bf16.msra.mxu1 %v12786_v47  ;;  %7378 = vmatprep.subr.bf16.mxu0 %v12791_v51  ;;  %v12855_v47 = vld [vmem:[#allocation5 + $0xc90] ss:$88 sps:$4 sm:$0xff]   ;;  %v12866_v51 = vld [vmem:[#allocation5 + $0xd4c] ss:$88 sps:$4 sm:$0xff]  }
 0x301   :  { %7501 = vmatprep.subr.bf16.mxu1 %v12794_v52  ;;  %v12861_v52 = vld [vmem:[#allocation5 + $0xd40] ss:$88 sps:$4 sm:$0xff]  }
 0x303   :  { %7379 = vmatpush1.bf16.msra.mxu0 %v12789_v54  ;;  %v12869_v54 = vld [vmem:[#allocation5 + $0xdf4] ss:$88 sps:$4 sm:$0xff]  }
 0x304   :  { %7502 = vmatpush1.bf16.msra.mxu1 %v12792_v55  ;;  %7380 = vmatprep.subr.bf16.mxu0 %v12797_v56  ;;  %v12872_v55 = vld [vmem:[#allocation5 + $0xdfc] ss:$88 sps:$4 sm:$0xff]   ;;  %v12867_v56 = vld [vmem:[#allocation5 + $0xdf0] ss:$88 sps:$4 sm:$0xff]  }
 0x305   :  { %7503 = vmatprep.subr.bf16.mxu1 %v12800_v57  ;;  %v12870_v57 = vld [vmem:[#allocation5 + $0xdf8] ss:$88 sps:$4 sm:$0xff]  }
 0x307   :  { %7381 = vmatpush1.bf16.msra.mxu0 %v12795_v58  ;;  %v12875_v58 = vld [vmem:[#allocation5 + $0xea4] ss:$88 sps:$4 sm:$0xff]  }
 0x308   :  { %7504 = vmatpush1.bf16.msra.mxu1 %v12798_v59  ;;  %7382 = vmatprep.subr.bf16.mxu0 %v12803_v60  ;;  %v12878_v59 = vld [vmem:[#allocation5 + $0xeac] ss:$88 sps:$4 sm:$0xff]   ;;  %v12873_v60 = vld [vmem:[#allocation5 + $0xea0] ss:$88 sps:$4 sm:$0xff]  }
 0x309   :  { %7505 = vmatprep.subr.bf16.mxu1 %v12806_v61  ;;  %v12876_v61 = vld [vmem:[#allocation5 + $0xea8] ss:$88 sps:$4 sm:$0xff]  }
 0x30b   :  { %7383 = vmatpush1.bf16.msra.mxu0 %v12801_v2  ;;  %v12881_v2 = vld [vmem:[#allocation5 + $0xf54] ss:$88 sps:$4 sm:$0xff]  }
 0x30c   :  { %7506 = vmatpush1.bf16.msra.mxu1 %v12804_v3  ;;  %7384 = vmatprep.subr.bf16.mxu0 %v12809_v4  ;;  %v12884_v3 = vld [vmem:[#allocation5 + $0xf5c] ss:$88 sps:$4 sm:$0xff]   ;;  %v12879_v4 = vld [vmem:[#allocation5 + $0xf50] ss:$88 sps:$4 sm:$0xff]  }
 0x30d   :  { %7507 = vmatprep.subr.bf16.mxu1 %v12812_v6  ;;  %v12882_v6 = vld [vmem:[#allocation5 + $0xf58] ss:$88 sps:$4 sm:$0xff]  }
 0x30f   :  { %7385 = vmatpush1.bf16.msra.mxu0 %v12807_v7  ;;  %v12887_v7 = vld [vmem:[#allocation5 + $0x1004] ss:$88 sps:$4 sm:$0xff]  }
 0x310   :  { %7508 = vmatpush1.bf16.msra.mxu1 %v12810_v8  ;;  %7386 = vmatprep.subr.bf16.mxu0 %v12815_v9  ;;  %v12890_v8 = vld [vmem:[#allocation5 + $0x100c] ss:$88 sps:$4 sm:$0xff]   ;;  %v12885_v9 = vld [vmem:[#allocation5 + $0x1000] ss:$88 sps:$4 sm:$0xff]  }
 0x311   :  { %7509 = vmatprep.subr.bf16.mxu1 %v12818_v11  ;;  %v12888_v11 = vld [vmem:[#allocation5 + $0x1008] ss:$88 sps:$4 sm:$0xff]  }
 0x313   :  { %7387 = vmatpush1.bf16.msra.mxu0 %v12813_v12  ;;  %v12893_v12 = vld [vmem:[#allocation5 + $0x10b4] ss:$88 sps:$4 sm:$0xff]  }
 0x314   :  { %7510 = vmatpush1.bf16.msra.mxu1 %v12816_v14  ;;  %7388 = vmatprep.subr.bf16.mxu0 %v12821_v16  ;;  %v12896_v14 = vld [vmem:[#allocation5 + $0x10bc] ss:$88 sps:$4 sm:$0xff]   ;;  %v12891_v16 = vld [vmem:[#allocation5 + $0x10b0] ss:$88 sps:$4 sm:$0xff]  }
 0x315   :  { %7511 = vmatprep.subr.bf16.mxu1 %v12824_v17  ;;  %v12894_v17 = vld [vmem:[#allocation5 + $0x10b8] ss:$88 sps:$4 sm:$0xff]  }
 0x317   :  { %7389 = vmatpush1.bf16.msra.mxu0 %v12819_v19  ;;  %v12899_v19 = vld [vmem:[#allocation5 + $0x1164] ss:$88 sps:$4 sm:$0xff]  }
 0x318   :  { %7512 = vmatpush1.bf16.msra.mxu1 %v12822_v20  ;;  %7390 = vmatprep.subr.bf16.mxu0 %v12827_v21  ;;  %v12902_v20 = vld [vmem:[#allocation5 + $0x116c] ss:$88 sps:$4 sm:$0xff]   ;;  %v12897_v21 = vld [vmem:[#allocation5 + $0x1160] ss:$88 sps:$4 sm:$0xff]  }
 0x319   :  { %7513 = vmatprep.subr.bf16.mxu1 %v12830_v22  ;;  %v12900_v22 = vld [vmem:[#allocation5 + $0x1168] ss:$88 sps:$4 sm:$0xff]  }
 0x31b   :  { %7391 = vmatpush1.bf16.msra.mxu0 %v12825_v23  ;;  %v12905_v23 = vld [vmem:[#allocation5 + $0x1214] ss:$88 sps:$4 sm:$0xff]  }
 0x31c   :  { %7514 = vmatpush1.bf16.msra.mxu1 %v12828_v24  ;;  %7392 = vmatprep.subr.bf16.mxu0 %v12833_v25  ;;  %v12908_v24 = vld [vmem:[#allocation5 + $0x121c] ss:$88 sps:$4 sm:$0xff]   ;;  %v12903_v25 = vld [vmem:[#allocation5 + $0x1210] ss:$88 sps:$4 sm:$0xff]  }
 0x31d   :  { %7515 = vmatprep.subr.bf16.mxu1 %v12836_v13  ;;  %v12906_v13 = vld [vmem:[#allocation5 + $0x1218] ss:$88 sps:$4 sm:$0xff]  }
 0x31f   :  { %7393 = vmatpush1.bf16.msra.mxu0 %v12831_v26  ;;  %v12911_v26 = vld [vmem:[#allocation5 + $0x12c4] ss:$88 sps:$4 sm:$0xff]  }
 0x320   :  { %7516 = vmatpush1.bf16.msra.mxu1 %v12834_v27  ;;  %7394 = vmatprep.subr.bf16.mxu0 %v12839_v28  ;;  %v12914_v27 = vld [vmem:[#allocation5 + $0x12cc] ss:$88 sps:$4 sm:$0xff]   ;;  %v12909_v28 = vld [vmem:[#allocation5 + $0x12c0] ss:$88 sps:$4 sm:$0xff]  }
 0x321   :  { %7517 = vmatprep.subr.bf16.mxu1 %v12842_v29  ;;  %v12912_v29 = vld [vmem:[#allocation5 + $0x12c8] ss:$88 sps:$4 sm:$0xff]  }
 0x323   :  { %7395 = vmatpush1.bf16.msra.mxu0 %v12837_v31  ;;  %v12917_v31 = vld [vmem:[#allocation5 + $0x1374] ss:$88 sps:$4 sm:$0xff]  }
 0x324   :  { %7518 = vmatpush1.bf16.msra.mxu1 %v12840_v32  ;;  %7405 = vmatprep.subr.bf16.mxu0 %v12845_v33  ;;  %v12920_v32 = vld [vmem:[#allocation5 + $0x137c] ss:$88 sps:$4 sm:$0xff]   ;;  %v12915_v33 = vld [vmem:[#allocation5 + $0x1370] ss:$88 sps:$4 sm:$0xff]  }
 0x325   :  { %7528 = vmatprep.subr.bf16.mxu1 %v12848_v34  ;;  %v12918_v34 = vld [vmem:[#allocation5 + $0x1378] ss:$88 sps:$4 sm:$0xff]  }
 0x326   :  { %7397 = vmatmul.mubr.bf16.vlgmr.msra.gmra.mrb[12].mxu0 %v14124_v5 }
 0x327   :  { %7520 = vmatmul.mubr.bf16.vlgmr.msra.gmra.mrb[12].mxu1 %v14124_v5  ;;  %7406 = vmatpush1.bf16.msra.mxu0 %v12843_v35  ;;  %v12923_v35 = vld [vmem:[#allocation5 + $0x1424] ss:$88 sps:$4 sm:$0xff]  }
 0x328   :  { %7529 = vmatpush1.bf16.msra.mxu1 %v12846_v36  ;;  %7407 = vmatprep.subr.bf16.mxu0 %v12851_v37  ;;  %v12926_v36 = vld [vmem:[#allocation5 + $0x142c] ss:$88 sps:$4 sm:$0xff]   ;;  %v12921_v37 = vld [vmem:[#allocation5 + $0x1420] ss:$88 sps:$4 sm:$0xff]  }
 0x329   :  { %7530 = vmatprep.subr.bf16.mxu1 %v12854_v38  ;;  %7437 = vmatprep.mubr.bf16.mxu0 %v14132_v30  ;;  %v12924_v38 = vld [vmem:[#allocation5 + $0x1428] ss:$88 sps:$4 sm:$0xff]  }
 0x32a   :  { %7560 = vmatprep.mubr.bf16.mxu1 %v14132_v30 }
 0x32b   :  { %7408 = vmatpush1.bf16.msra.mxu0 %v12849_v39  ;;  %v12929_v39 = vld [vmem:[#allocation5 + $0x14d4] ss:$88 sps:$4 sm:$0xff]  }
 0x32c   :  { %7531 = vmatpush1.bf16.msra.mxu1 %v12852_v40  ;;  %7409 = vmatprep.subr.bf16.mxu0 %v12857_v45  ;;  %v12932_v40 = vld [vmem:[#allocation5 + $0x14dc] ss:$88 sps:$4 sm:$0xff]   ;;  %v12927_v45 = vld [vmem:[#allocation5 + $0x14d0] ss:$88 sps:$4 sm:$0xff]  }
 0x32d   :  { %7532 = vmatprep.subr.bf16.mxu1 %v12860_v46  ;;  %v12930_v46 = vld [vmem:[#allocation5 + $0x14d8] ss:$88 sps:$4 sm:$0xff]  }
 0x32f   :  { %7410 = vmatpush1.bf16.msra.mxu0 %v12855_v47  ;;  %v12935_v47 = vld [vmem:[#allocation5 + $0x1584] ss:$88 sps:$4 sm:$0xff]  }
 0x330   :  { %7533 = vmatpush1.bf16.msra.mxu1 %v12858_v49  ;;  %7411 = vmatprep.subr.bf16.mxu0 %v12863_v50  ;;  %v12938_v49 = vld [vmem:[#allocation5 + $0x158c] ss:$88 sps:$4 sm:$0xff]   ;;  %v12933_v50 = vld [vmem:[#allocation5 + $0x1580] ss:$88 sps:$4 sm:$0xff]  }
 0x331   :  { %7534 = vmatprep.subr.bf16.mxu1 %v12866_v51  ;;  %v12936_v51 = vld [vmem:[#allocation5 + $0x1588] ss:$88 sps:$4 sm:$0xff]  }
 0x333   :  { %7412 = vmatpush1.bf16.msra.mxu0 %v12861_v52  ;;  %v12941_v52 = vld [vmem:[#allocation5 + $0x1634] ss:$88 sps:$4 sm:$0xff]  }
 0x334   :  { %7535 = vmatpush1.bf16.msra.mxu1 %v12864_v53  ;;  %7413 = vmatprep.subr.bf16.mxu0 %v12869_v54  ;;  %v12944_v53 = vld [vmem:[#allocation5 + $0x163c] ss:$88 sps:$4 sm:$0xff]   ;;  %v12939_v54 = vld [vmem:[#allocation5 + $0x1630] ss:$88 sps:$4 sm:$0xff]  }
 0x335   :  { %7536 = vmatprep.subr.bf16.mxu1 %v12872_v55  ;;  %v12942_v55 = vld [vmem:[#allocation5 + $0x1638] ss:$88 sps:$4 sm:$0xff]  }
 0x337   :  { %7414 = vmatpush1.bf16.msra.mxu0 %v12867_v56  ;;  %v12947_v56 = vld [vmem:[#allocation5 + $0x16e4] ss:$88 sps:$4 sm:$0xff]  }
 0x338   :  { %7537 = vmatpush1.bf16.msra.mxu1 %v12870_v57  ;;  %7415 = vmatprep.subr.bf16.mxu0 %v12875_v58  ;;  %v12950_v57 = vld [vmem:[#allocation5 + $0x16ec] ss:$88 sps:$4 sm:$0xff]   ;;  %v12945_v58 = vld [vmem:[#allocation5 + $0x16e0] ss:$88 sps:$4 sm:$0xff]  }
 0x339   :  { %7538 = vmatprep.subr.bf16.mxu1 %v12878_v59  ;;  %v12948_v59 = vld [vmem:[#allocation5 + $0x16e8] ss:$88 sps:$4 sm:$0xff]  }
 0x33b   :  { %7416 = vmatpush1.bf16.msra.mxu0 %v12873_v60  ;;  %v12953_v60 = vld [vmem:[#allocation5 + $0x1794] ss:$88 sps:$4 sm:$0xff]  }
 0x33c   :  { %7539 = vmatpush1.bf16.msra.mxu1 %v12876_v61  ;;  %7417 = vmatprep.subr.bf16.mxu0 %v12881_v2  ;;  %v12956_v61 = vld [vmem:[#allocation5 + $0x179c] ss:$88 sps:$4 sm:$0xff]   ;;  %v12951_v2 = vld [vmem:[#allocation5 + $0x1790] ss:$88 sps:$4 sm:$0xff]  }
 0x33d   :  { %7540 = vmatprep.subr.bf16.mxu1 %v12884_v3  ;;  %v12954_v3 = vld [vmem:[#allocation5 + $0x1798] ss:$88 sps:$4 sm:$0xff]  }
 0x33f   :  { %7418 = vmatpush1.bf16.msra.mxu0 %v12879_v4  ;;  %v12959_v4 = vld [vmem:[#allocation5 + $0x1844] ss:$88 sps:$4 sm:$0xff]  }
 0x340   :  { %7541 = vmatpush1.bf16.msra.mxu1 %v12882_v6  ;;  %7419 = vmatprep.subr.bf16.mxu0 %v12887_v7  ;;  %v12962_v6 = vld [vmem:[#allocation5 + $0x184c] ss:$88 sps:$4 sm:$0xff]   ;;  %v12957_v7 = vld [vmem:[#allocation5 + $0x1840] ss:$88 sps:$4 sm:$0xff]  }
 0x341   :  { %7542 = vmatprep.subr.bf16.mxu1 %v12890_v8  ;;  %v12960_v8 = vld [vmem:[#allocation5 + $0x1848] ss:$88 sps:$4 sm:$0xff]  }
 0x343   :  { %7420 = vmatpush1.bf16.msra.mxu0 %v12885_v9  ;;  %v12965_v9 = vld [vmem:[#allocation5 + $0x18f4] ss:$88 sps:$4 sm:$0xff]  }
 0x344   :  { %7543 = vmatpush1.bf16.msra.mxu1 %v12888_v11  ;;  %7421 = vmatprep.subr.bf16.mxu0 %v12893_v12  ;;  %v12968_v11 = vld [vmem:[#allocation5 + $0x18fc] ss:$88 sps:$4 sm:$0xff]   ;;  %v12963_v12 = vld [vmem:[#allocation5 + $0x18f0] ss:$88 sps:$4 sm:$0xff]  }
 0x345   :  { %7544 = vmatprep.subr.bf16.mxu1 %v12896_v14  ;;  %v12966_v14 = vld [vmem:[#allocation5 + $0x18f8] ss:$88 sps:$4 sm:$0xff]  }
 0x347   :  { %7422 = vmatpush1.bf16.msra.mxu0 %v12891_v16  ;;  %v12971_v16 = vld [vmem:[#allocation5 + $0x19a4] ss:$88 sps:$4 sm:$0xff]  }
 0x348   :  { %7545 = vmatpush1.bf16.msra.mxu1 %v12894_v17  ;;  %7423 = vmatprep.subr.bf16.mxu0 %v12899_v19  ;;  %v12974_v17 = vld [vmem:[#allocation5 + $0x19ac] ss:$88 sps:$4 sm:$0xff]   ;;  %v12969_v19 = vld [vmem:[#allocation5 + $0x19a0] ss:$88 sps:$4 sm:$0xff]  }
 0x349   :  { %7546 = vmatprep.subr.bf16.mxu1 %v12902_v20  ;;  %v12972_v20 = vld [vmem:[#allocation5 + $0x19a8] ss:$88 sps:$4 sm:$0xff]  }
 0x34b   :  { %7424 = vmatpush1.bf16.msra.mxu0 %v12897_v21  ;;  %v12977_v21 = vld [vmem:[#allocation5 + $0x1a54] ss:$88 sps:$4 sm:$0xff]  }
 0x34c   :  { %7547 = vmatpush1.bf16.msra.mxu1 %v12900_v22  ;;  %7425 = vmatprep.subr.bf16.mxu0 %v12905_v23  ;;  %v12980_v22 = vld [vmem:[#allocation5 + $0x1a5c] ss:$88 sps:$4 sm:$0xff]   ;;  %v12975_v23 = vld [vmem:[#allocation5 + $0x1a50] ss:$88 sps:$4 sm:$0xff]  }
 0x34d   :  { %7548 = vmatprep.subr.bf16.mxu1 %v12908_v24  ;;  %v12978_v24 = vld [vmem:[#allocation5 + $0x1a58] ss:$88 sps:$4 sm:$0xff]  }
 0x34f   :  { %7426 = vmatpush1.bf16.msra.mxu0 %v12903_v25  ;;  %v12983_v25 = vld [vmem:[#allocation5 + $0x1b04] ss:$88 sps:$4 sm:$0xff]  }
 0x350   :  { %7549 = vmatpush1.bf16.msra.mxu1 %v12906_v13  ;;  %7427 = vmatprep.subr.bf16.mxu0 %v12911_v26  ;;  %v12986_v13 = vld [vmem:[#allocation5 + $0x1b0c] ss:$88 sps:$4 sm:$0xff]   ;;  %v12981_v26 = vld [vmem:[#allocation5 + $0x1b00] ss:$88 sps:$4 sm:$0xff]  }
 0x351   :  { %7550 = vmatprep.subr.bf16.mxu1 %v12914_v27  ;;  %v12984_v27 = vld [vmem:[#allocation5 + $0x1b08] ss:$88 sps:$4 sm:$0xff]  }
 0x353   :  { %7428 = vmatpush1.bf16.msra.mxu0 %v12909_v28  ;;  %v12989_v28 = vld [vmem:[#allocation5 + $0x1bb4] ss:$88 sps:$4 sm:$0xff]  }
 0x354   :  { %7551 = vmatpush1.bf16.msra.mxu1 %v12912_v29  ;;  %7429 = vmatprep.subr.bf16.mxu0 %v12917_v31  ;;  %v12992_v29 = vld [vmem:[#allocation5 + $0x1bbc] ss:$88 sps:$4 sm:$0xff]   ;;  %v12987_v31 = vld [vmem:[#allocation5 + $0x1bb0] ss:$88 sps:$4 sm:$0xff]  }
 0x355   :  { %7552 = vmatprep.subr.bf16.mxu1 %v12920_v32  ;;  %v12990_v32 = vld [vmem:[#allocation5 + $0x1bb8] ss:$88 sps:$4 sm:$0xff]  }
 0x357   :  { %7430 = vmatpush1.bf16.msra.mxu0 %v12915_v33  ;;  %v12995_v33 = vld [vmem:[#allocation5 + $0x1c64] ss:$88 sps:$4 sm:$0xff]  }
 0x358   :  { %7553 = vmatpush1.bf16.msra.mxu1 %v12918_v34  ;;  %7431 = vmatprep.subr.bf16.mxu0 %v12923_v35  ;;  %v12998_v34 = vld [vmem:[#allocation5 + $0x1c6c] ss:$88 sps:$4 sm:$0xff]   ;;  %v12993_v35 = vld [vmem:[#allocation5 + $0x1c60] ss:$88 sps:$4 sm:$0xff]  }
 0x359   :  { %7554 = vmatprep.subr.bf16.mxu1 %v12926_v36  ;;  %v12996_v36 = vld [vmem:[#allocation5 + $0x1c68] ss:$88 sps:$4 sm:$0xff]  }
 0x35b   :  { %7432 = vmatpush1.bf16.msra.mxu0 %v12921_v37  ;;  %v13001_v37 = vld [vmem:[#allocation5 + $0x1d14] ss:$88 sps:$4 sm:$0xff]  }
 0x35c   :  { %7555 = vmatpush1.bf16.msra.mxu1 %v12924_v38  ;;  %7433 = vmatprep.subr.bf16.mxu0 %v12929_v39  ;;  %v13004_v38 = vld [vmem:[#allocation5 + $0x1d1c] ss:$88 sps:$4 sm:$0xff]   ;;  %v12999_v39 = vld [vmem:[#allocation5 + $0x1d10] ss:$88 sps:$4 sm:$0xff]  }
 0x35d   :  { %7556 = vmatprep.subr.bf16.mxu1 %v12932_v40  ;;  %v13002_v40 = vld [vmem:[#allocation5 + $0x1d18] ss:$88 sps:$4 sm:$0xff]  }
 0x35f   :  { %7434 = vmatpush1.bf16.msra.mxu0 %v12927_v45  ;;  %v13007_v45 = vld [vmem:[#allocation5 + $0x1dc4] ss:$88 sps:$4 sm:$0xff]  }
 0x360   :  { %7557 = vmatpush1.bf16.msra.mxu1 %v12930_v46  ;;  %7435 = vmatprep.subr.bf16.mxu0 %v12935_v47  ;;  %v13010_v46 = vld [vmem:[#allocation5 + $0x1dcc] ss:$88 sps:$4 sm:$0xff]   ;;  %v13005_v47 = vld [vmem:[#allocation5 + $0x1dc0] ss:$88 sps:$4 sm:$0xff]  }
 0x361   :  { %7558 = vmatprep.subr.bf16.mxu1 %v12938_v49  ;;  %v13008_v49 = vld [vmem:[#allocation5 + $0x1dc8] ss:$88 sps:$4 sm:$0xff]  }
 0x363   :  { %7436 = vmatpush1.bf16.msra.mxu0 %v12933_v50  ;;  %v13013_v50 = vld [vmem:[#allocation5 + $0x1e74] ss:$88 sps:$4 sm:$0xff]  }
 0x364   :  { %7559 = vmatpush1.bf16.msra.mxu1 %v12936_v51  ;;  %7446 = vmatprep.subr.bf16.mxu0 %v12941_v52  ;;  %v13016_v51 = vld [vmem:[#allocation5 + $0x1e7c] ss:$88 sps:$4 sm:$0xff]   ;;  %v13011_v52 = vld [vmem:[#allocation5 + $0x1e70] ss:$88 sps:$4 sm:$0xff]  }
 0x365   :  { %7569 = vmatprep.subr.bf16.mxu1 %v12944_v53  ;;  %v13014_v53 = vld [vmem:[#allocation5 + $0x1e78] ss:$88 sps:$4 sm:$0xff]  }
 0x366   :  { %7438 = vmatmul.mubr.bf16.vlgmr.msra.gmra.mrb[12].mxu0 %v14138_v10 }
 0x367   :  { %7561 = vmatmul.mubr.bf16.vlgmr.msra.gmra.mrb[12].mxu1 %v14138_v10  ;;  %7447 = vmatpush1.bf16.msra.mxu0 %v12939_v54  ;;  %v13019_v54 = vld [vmem:[#allocation5 + $0x1f24] ss:$88 sps:$4 sm:$0xff]  }
 0x368   :  { %7570 = vmatpush1.bf16.msra.mxu1 %v12942_v55  ;;  %7448 = vmatprep.subr.bf16.mxu0 %v12947_v56  ;;  %v13022_v55 = vld [vmem:[#allocation5 + $0x1f2c] ss:$88 sps:$4 sm:$0xff]   ;;  %v13017_v56 = vld [vmem:[#allocation5 + $0x1f20] ss:$88 sps:$4 sm:$0xff]  }
 0x369   :  { %7571 = vmatprep.subr.bf16.mxu1 %v12950_v57  ;;  %7478 = vmatprep.mubr.bf16.mxu0 %v14144_v15  ;;  %v13020_v57 = vld [vmem:[#allocation5 + $0x1f28] ss:$88 sps:$4 sm:$0xff]  }
 0x36a   :  { %7601 = vmatprep.mubr.bf16.mxu1 %v14144_v15 }
 0x36b   :  { %7449 = vmatpush1.bf16.msra.mxu0 %v12945_v58  ;;  %v13025_v58 = vld [vmem:[#allocation5 + $0x1fd4] ss:$88 sps:$4 sm:$0xff]  }
 0x36c   :  { %7572 = vmatpush1.bf16.msra.mxu1 %v12948_v59  ;;  %7450 = vmatprep.subr.bf16.mxu0 %v12953_v60  ;;  %v13028_v59 = vld [vmem:[#allocation5 + $0x1fdc] ss:$88 sps:$4 sm:$0xff]   ;;  %v13023_v60 = vld [vmem:[#allocation5 + $0x1fd0] ss:$88 sps:$4 sm:$0xff]  }
 0x36d   :  { %7573 = vmatprep.subr.bf16.mxu1 %v12956_v61  ;;  %v13026_v61 = vld [vmem:[#allocation5 + $0x1fd8] ss:$88 sps:$4 sm:$0xff]  }
 0x36f   :  { %7451 = vmatpush1.bf16.msra.mxu0 %v12951_v2  ;;  %v13031_v2 = vld [vmem:[#allocation5 + $0x2084] ss:$88 sps:$4 sm:$0xff]  }
 0x370   :  { %7574 = vmatpush1.bf16.msra.mxu1 %v12954_v3  ;;  %7452 = vmatprep.subr.bf16.mxu0 %v12959_v4  ;;  %v13034_v3 = vld [vmem:[#allocation5 + $0x208c] ss:$88 sps:$4 sm:$0xff]   ;;  %v13029_v4 = vld [vmem:[#allocation5 + $0x2080] ss:$88 sps:$4 sm:$0xff]  }
 0x371   :  { %7575 = vmatprep.subr.bf16.mxu1 %v12962_v6  ;;  %v13032_v6 = vld [vmem:[#allocation5 + $0x2088] ss:$88 sps:$4 sm:$0xff]  }
 0x373   :  { %7453 = vmatpush1.bf16.msra.mxu0 %v12957_v7  ;;  %v13037_v7 = vld [vmem:[#allocation5 + $0x44] ss:$88 sps:$4 sm:$0xff]  }
 0x374   :  { %7576 = vmatpush1.bf16.msra.mxu1 %v12960_v8  ;;  %7454 = vmatprep.subr.bf16.mxu0 %v12965_v9  ;;  %v13040_v8 = vld [vmem:[#allocation5 + $0x4c] ss:$88 sps:$4 sm:$0xff]   ;;  %v13035_v9 = vld [vmem:[#allocation5 + $0x40] ss:$88 sps:$4 sm:$0xff]  }
 0x375   :  { %7577 = vmatprep.subr.bf16.mxu1 %v12968_v11  ;;  %v13038_v11 = vld [vmem:[#allocation5 + $0x48] ss:$88 sps:$4 sm:$0xff]  }
 0x377   :  { %7455 = vmatpush1.bf16.msra.mxu0 %v12963_v12  ;;  %v13043_v12 = vld [vmem:[#allocation5 + $0xf4] ss:$88 sps:$4 sm:$0xff]  }
 0x378   :  { %7578 = vmatpush1.bf16.msra.mxu1 %v12966_v14  ;;  %7456 = vmatprep.subr.bf16.mxu0 %v12971_v16  ;;  %v13046_v14 = vld [vmem:[#allocation5 + $0xfc] ss:$88 sps:$4 sm:$0xff]   ;;  %v13041_v16 = vld [vmem:[#allocation5 + $0xf0] ss:$88 sps:$4 sm:$0xff]  }
 0x379   :  { %7579 = vmatprep.subr.bf16.mxu1 %v12974_v17  ;;  %v13044_v17 = vld [vmem:[#allocation5 + $0xf8] ss:$88 sps:$4 sm:$0xff]  }
 0x37b   :  { %7457 = vmatpush1.bf16.msra.mxu0 %v12969_v19  ;;  %v13049_v19 = vld [vmem:[#allocation5 + $0x1a4] ss:$88 sps:$4 sm:$0xff]  }
 0x37c   :  { %7580 = vmatpush1.bf16.msra.mxu1 %v12972_v20  ;;  %7458 = vmatprep.subr.bf16.mxu0 %v12977_v21  ;;  %v13052_v20 = vld [vmem:[#allocation5 + $0x1ac] ss:$88 sps:$4 sm:$0xff]   ;;  %v13047_v21 = vld [vmem:[#allocation5 + $0x1a0] ss:$88 sps:$4 sm:$0xff]  }
 0x37d   :  { %7581 = vmatprep.subr.bf16.mxu1 %v12980_v22  ;;  %v13050_v22 = vld [vmem:[#allocation5 + $0x1a8] ss:$88 sps:$4 sm:$0xff]  }
 0x37f   :  { %7459 = vmatpush1.bf16.msra.mxu0 %v12975_v23  ;;  %v13055_v23 = vld [vmem:[#allocation5 + $0x254] ss:$88 sps:$4 sm:$0xff]  }
 0x380   :  { %7582 = vmatpush1.bf16.msra.mxu1 %v12978_v24  ;;  %7460 = vmatprep.subr.bf16.mxu0 %v12983_v25  ;;  %v13058_v24 = vld [vmem:[#allocation5 + $0x25c] ss:$88 sps:$4 sm:$0xff]   ;;  %v13053_v25 = vld [vmem:[#allocation5 + $0x250] ss:$88 sps:$4 sm:$0xff]  }
 0x381   :  { %7583 = vmatprep.subr.bf16.mxu1 %v12986_v13  ;;  %v13056_v13 = vld [vmem:[#allocation5 + $0x258] ss:$88 sps:$4 sm:$0xff]  }
 0x383   :  { %7461 = vmatpush1.bf16.msra.mxu0 %v12981_v26  ;;  %v13061_v26 = vld [vmem:[#allocation5 + $0x304] ss:$88 sps:$4 sm:$0xff]  }
 0x384   :  { %7584 = vmatpush1.bf16.msra.mxu1 %v12984_v27  ;;  %7462 = vmatprep.subr.bf16.mxu0 %v12989_v28  ;;  %v13064_v27 = vld [vmem:[#allocation5 + $0x30c] ss:$88 sps:$4 sm:$0xff]   ;;  %v13059_v28 = vld [vmem:[#allocation5 + $0x300] ss:$88 sps:$4 sm:$0xff]  }
 0x385   :  { %7585 = vmatprep.subr.bf16.mxu1 %v12992_v29  ;;  %v13062_v29 = vld [vmem:[#allocation5 + $0x308] ss:$88 sps:$4 sm:$0xff]  }
 0x387   :  { %7463 = vmatpush1.bf16.msra.mxu0 %v12987_v31  ;;  %v13067_v31 = vld [vmem:[#allocation5 + $0x3b4] ss:$88 sps:$4 sm:$0xff]  }
 0x388   :  { %7586 = vmatpush1.bf16.msra.mxu1 %v12990_v32  ;;  %7464 = vmatprep.subr.bf16.mxu0 %v12995_v33  ;;  %v13070_v32 = vld [vmem:[#allocation5 + $0x3bc] ss:$88 sps:$4 sm:$0xff]   ;;  %v13065_v33 = vld [vmem:[#allocation5 + $0x3b0] ss:$88 sps:$4 sm:$0xff]  }
 0x389   :  { %7587 = vmatprep.subr.bf16.mxu1 %v12998_v34  ;;  %v13068_v34 = vld [vmem:[#allocation5 + $0x3b8] ss:$88 sps:$4 sm:$0xff]  }
 0x38b   :  { %7465 = vmatpush1.bf16.msra.mxu0 %v12993_v35  ;;  %v13073_v35 = vld [vmem:[#allocation5 + $0x464] ss:$88 sps:$4 sm:$0xff]  }
 0x38c   :  { %7588 = vmatpush1.bf16.msra.mxu1 %v12996_v36  ;;  %7466 = vmatprep.subr.bf16.mxu0 %v13001_v37  ;;  %v13076_v36 = vld [vmem:[#allocation5 + $0x46c] ss:$88 sps:$4 sm:$0xff]  }
 0x38d   :  { %7589 = vmatprep.subr.bf16.mxu1 %v13004_v38 }
 0x38f   :  { %7467 = vmatpush1.bf16.msra.mxu0 %v12999_v39 }
 0x390   :  { %7590 = vmatpush1.bf16.msra.mxu1 %v13002_v40  ;;  %7468 = vmatprep.subr.bf16.mxu0 %v13007_v45 }
 0x391   :  { %7591 = vmatprep.subr.bf16.mxu1 %v13010_v46  ;;  %v13071_v46 = vld [vmem:[#allocation5 + $0x460] ss:$88 sps:$4 sm:$0xff]  }
 0x393   :  { %7469 = vmatpush1.bf16.msra.mxu0 %v13005_v47  ;;  %v13074_v47 = vld [vmem:[#allocation5 + $0x468] ss:$88 sps:$4 sm:$0xff]  }
 0x394   :  { %7592 = vmatpush1.bf16.msra.mxu1 %v13008_v49  ;;  %7470 = vmatprep.subr.bf16.mxu0 %v13013_v50 }
 0x395   :  { %7593 = vmatprep.subr.bf16.mxu1 %v13016_v51  ;;  %v13079_v51 = vld [vmem:[#allocation5 + $0x514] ss:$88 sps:$4 sm:$0xff]  }
 0x397   :  { %7471 = vmatpush1.bf16.msra.mxu0 %v13011_v52  ;;  %v13082_v52 = vld [vmem:[#allocation5 + $0x51c] ss:$88 sps:$4 sm:$0xff]  }
 0x398   :  { %7594 = vmatpush1.bf16.msra.mxu1 %v13014_v53  ;;  %7472 = vmatprep.subr.bf16.mxu0 %v13019_v54  ;;  %v13077_v54 = vld [vmem:[#allocation5 + $0x510] ss:$88 sps:$4 sm:$0xff]  }
 0x399   :  { %7595 = vmatprep.subr.bf16.mxu1 %v13022_v55  ;;  %v13080_v55 = vld [vmem:[#allocation5 + $0x518] ss:$88 sps:$4 sm:$0xff]  }
 0x39b   :  { %7473 = vmatpush1.bf16.msra.mxu0 %v13017_v56  ;;  %v13085_v56 = vld [vmem:[#allocation5 + $0x5c4] ss:$88 sps:$4 sm:$0xff]  }
 0x39c   :  { %7596 = vmatpush1.bf16.msra.mxu1 %v13020_v57  ;;  %7474 = vmatprep.subr.bf16.mxu0 %v13025_v58  ;;  %v13088_v57 = vld [vmem:[#allocation5 + $0x5cc] ss:$88 sps:$4 sm:$0xff]   ;;  %v13083_v58 = vld [vmem:[#allocation5 + $0x5c0] ss:$88 sps:$4 sm:$0xff]  }
 0x39d   :  { %7597 = vmatprep.subr.bf16.mxu1 %v13028_v59  ;;  %v13086_v59 = vld [vmem:[#allocation5 + $0x5c8] ss:$88 sps:$4 sm:$0xff]  }
 0x39f   :  { %7475 = vmatpush1.bf16.msra.mxu0 %v13023_v60  ;;  %v13091_v60 = vld [vmem:[#allocation5 + $0x674] ss:$88 sps:$4 sm:$0xff]  }
 0x3a0   :  { %7598 = vmatpush1.bf16.msra.mxu1 %v13026_v61  ;;  %7476 = vmatprep.subr.bf16.mxu0 %v13031_v2  ;;  %v13094_v61 = vld [vmem:[#allocation5 + $0x67c] ss:$88 sps:$4 sm:$0xff]   ;;  %v13089_v2 = vld [vmem:[#allocation5 + $0x670] ss:$88 sps:$4 sm:$0xff]  }
 0x3a1   :  { %7599 = vmatprep.subr.bf16.mxu1 %v13034_v3  ;;  %v13092_v3 = vld [vmem:[#allocation5 + $0x678] ss:$88 sps:$4 sm:$0xff]  }
 0x3a3   :  { %7477 = vmatpush1.bf16.msra.mxu0 %v13029_v4  ;;  %v13097_v4 = vld [vmem:[#allocation5 + $0x724] ss:$88 sps:$4 sm:$0xff]  }
 0x3a4   :  { %7600 = vmatpush1.bf16.msra.mxu1 %v13032_v6  ;;  %7610 = vmatprep.subr.bf16.mxu0 %v13037_v7  ;;  %v13100_v6 = vld [vmem:[#allocation5 + $0x72c] ss:$88 sps:$4 sm:$0xff]   ;;  %v13095_v7 = vld [vmem:[#allocation5 + $0x720] ss:$88 sps:$4 sm:$0xff]  }
 0x3a5   :  { %7733 = vmatprep.subr.bf16.mxu1 %v13040_v8  ;;  %v13098_v8 = vld [vmem:[#allocation5 + $0x728] ss:$88 sps:$4 sm:$0xff]  }
 0x3a6   :  { %7479 = vmatmul.mubr.bf16.vlgmr.msra.gmra.mrb[12].mxu0 %v14152_v18 }
 0x3a7   :  { %7602 = vmatmul.mubr.bf16.vlgmr.msra.gmra.mrb[12].mxu1 %v14152_v18  ;;  %7611 = vmatpush1.bf16.msra.mxu0 %v13035_v9  ;;  %v13103_v9 = vld [vmem:[#allocation5 + $0x7d4] ss:$88 sps:$4 sm:$0xff]  }
 0x3a8   :  { %7734 = vmatpush1.bf16.msra.mxu1 %v13038_v11  ;;  %7612 = vmatprep.subr.bf16.mxu0 %v13043_v12  ;;  %v13106_v11 = vld [vmem:[#allocation5 + $0x7dc] ss:$88 sps:$4 sm:$0xff]   ;;  %v13101_v12 = vld [vmem:[#allocation5 + $0x7d0] ss:$88 sps:$4 sm:$0xff]  }
 0x3a9   :  { %7735 = vmatprep.subr.bf16.mxu1 %v13046_v14  ;;  %7642 = vmatprep.mubr.bf16.mxu0 %v14120_v48  ;;  %v13104_v14 = vld [vmem:[#allocation5 + $0x7d8] ss:$88 sps:$4 sm:$0xff]  }
 0x3aa   :  { %7765 = vmatprep.mubr.bf16.mxu1 %v14120_v48 }
 0x3ab   :  { %7613 = vmatpush1.bf16.msra.mxu0 %v13041_v16  ;;  %v13109_v16 = vld [vmem:[#allocation5 + $0x884] ss:$88 sps:$4 sm:$0xff]  }
 0x3ac   :  { %7736 = vmatpush1.bf16.msra.mxu1 %v13044_v17  ;;  %7614 = vmatprep.subr.bf16.mxu0 %v13049_v19  ;;  %v13112_v17 = vld [vmem:[#allocation5 + $0x88c] ss:$88 sps:$4 sm:$0xff]   ;;  %v13107_v19 = vld [vmem:[#allocation5 + $0x880] ss:$88 sps:$4 sm:$0xff]  }
 0x3ad   :  { %7737 = vmatprep.subr.bf16.mxu1 %v13052_v20  ;;  %v13110_v20 = vld [vmem:[#allocation5 + $0x888] ss:$88 sps:$4 sm:$0xff]  }
 0x3af   :  { %7615 = vmatpush1.bf16.msra.mxu0 %v13047_v21  ;;  %v13115_v21 = vld [vmem:[#allocation5 + $0x934] ss:$88 sps:$4 sm:$0xff]  }
 0x3b0   :  { %7738 = vmatpush1.bf16.msra.mxu1 %v13050_v22  ;;  %7616 = vmatprep.subr.bf16.mxu0 %v13055_v23  ;;  %v13118_v22 = vld [vmem:[#allocation5 + $0x93c] ss:$88 sps:$4 sm:$0xff]   ;;  %v13113_v23 = vld [vmem:[#allocation5 + $0x930] ss:$88 sps:$4 sm:$0xff]  }
 0x3b1   :  { %7739 = vmatprep.subr.bf16.mxu1 %v13058_v24  ;;  %v13116_v24 = vld [vmem:[#allocation5 + $0x938] ss:$88 sps:$4 sm:$0xff]  }
 0x3b3   :  { %7617 = vmatpush1.bf16.msra.mxu0 %v13053_v25  ;;  %v13121_v25 = vld [vmem:[#allocation5 + $0x9e4] ss:$88 sps:$4 sm:$0xff]  }
 0x3b4   :  { %7740 = vmatpush1.bf16.msra.mxu1 %v13056_v13  ;;  %7618 = vmatprep.subr.bf16.mxu0 %v13061_v26  ;;  %v13124_v13 = vld [vmem:[#allocation5 + $0x9ec] ss:$88 sps:$4 sm:$0xff]   ;;  %v13119_v26 = vld [vmem:[#allocation5 + $0x9e0] ss:$88 sps:$4 sm:$0xff]  }
 0x3b5   :  { %7741 = vmatprep.subr.bf16.mxu1 %v13064_v27  ;;  %v13122_v27 = vld [vmem:[#allocation5 + $0x9e8] ss:$88 sps:$4 sm:$0xff]  }
 0x3b7   :  { %7619 = vmatpush1.bf16.msra.mxu0 %v13059_v28  ;;  %v13127_v28 = vld [vmem:[#allocation5 + $0xa94] ss:$88 sps:$4 sm:$0xff]  }
 0x3b8   :  { %7742 = vmatpush1.bf16.msra.mxu1 %v13062_v29  ;;  %7620 = vmatprep.subr.bf16.mxu0 %v13067_v31  ;;  %v13130_v29 = vld [vmem:[#allocation5 + $0xa9c] ss:$88 sps:$4 sm:$0xff]   ;;  %v13125_v31 = vld [vmem:[#allocation5 + $0xa90] ss:$88 sps:$4 sm:$0xff]  }
 0x3b9   :  { %7743 = vmatprep.subr.bf16.mxu1 %v13070_v32  ;;  %v14210_v37 = vpop.f32.mrb[8].mxu0  ;;  %v13128_v32 = vld [vmem:[#allocation5 + $0xa98] ss:$88 sps:$4 sm:$0xff]  }
 0x3ba   :  { %v14212_v38 = vpop.f32.mrb[8].mxu1  ;;  %v14214_v39 = vpop.f32.mrb[9].mxu0 }
 0x3bb   :  { %v14216_v40 = vpop.f32.mrb[9].mxu1  ;;  %v7238_v45 = vpop.f32.mrb[10].mxu0  ;;  %7621 = vmatpush1.bf16.msra.mxu0 %v13065_v33  ;;  %v13133_v33 = vld [vmem:[#allocation5 + $0xb44] ss:$88 sps:$4 sm:$0xff]  }
 0x3bc   :  { %7744 = vmatpush1.bf16.msra.mxu1 %v13068_v34  ;;  %v7361_v49 = vpop.f32.mrb[10].mxu1  ;;  %v7239_v50 = vpop.f32.mrb[11].mxu0  ;;  %7622 = vmatprep.subr.bf16.mxu0 %v13073_v35  ;;  %v13136_v34 = vld [vmem:[#allocation5 + $0xb4c] ss:$88 sps:$4 sm:$0xff]   ;;  %v13131_v35 = vld [vmem:[#allocation5 + $0xb40] ss:$88 sps:$4 sm:$0xff]  }
 0x3bd   :  { %7745 = vmatprep.subr.bf16.mxu1 %v13076_v36  ;;  %v7362_v53 = vpop.f32.mrb[11].mxu1  ;;  %v13134_v36 = vld [vmem:[#allocation5 + $0xb48] ss:$88 sps:$4 sm:$0xff]   ;;  %v13139_v45 = vld [vmem:[#allocation5 + $0xbf4] ss:$88 sps:$4 sm:$0xff]  }
 0x3be   :  { %v13140_v49 = vld [vmem:[#allocation5 + $0xbf8] ss:$88 sps:$4 sm:$0xff]   ;;  %v13145_v50 = vld [vmem:[#allocation5 + $0xca4] ss:$88 sps:$4 sm:$0xff]   ;;  %v13146_v53 = vld [vmem:[#allocation5 + $0xca8] ss:$88 sps:$4 sm:$0xff]  }
 0x3bf   :  { %7623 = vmatpush1.bf16.msra.mxu0 %v13071_v46  ;;  %v13142_v46 = vld [vmem:[#allocation5 + $0xbfc] ss:$88 sps:$4 sm:$0xff]  }
 0x3c0   :  { %7746 = vmatpush1.bf16.msra.mxu1 %v13074_v47  ;;  %7624 = vmatprep.subr.bf16.mxu0 %v13079_v51  ;;  %v13137_v47 = vld [vmem:[#allocation5 + $0xbf0] ss:$88 sps:$4 sm:$0xff]   ;;  %v13148_v51 = vld [vmem:[#allocation5 + $0xcac] ss:$88 sps:$4 sm:$0xff]  }
 0x3c1   :  { %7747 = vmatprep.subr.bf16.mxu1 %v13082_v52  ;;  %v13143_v52 = vld [vmem:[#allocation5 + $0xca0] ss:$88 sps:$4 sm:$0xff]  }
 0x3c3   :  { %7625 = vmatpush1.bf16.msra.mxu0 %v13077_v54  ;;  %v13151_v54 = vld [vmem:[#allocation5 + $0xd54] ss:$88 sps:$4 sm:$0xff]  }
 0x3c4   :  { %7748 = vmatpush1.bf16.msra.mxu1 %v13080_v55  ;;  %7626 = vmatprep.subr.bf16.mxu0 %v13085_v56  ;;  %v13154_v55 = vld [vmem:[#allocation5 + $0xd5c] ss:$88 sps:$4 sm:$0xff]   ;;  %v13149_v56 = vld [vmem:[#allocation5 + $0xd50] ss:$88 sps:$4 sm:$0xff]  }
 0x3c5   :  { %7749 = vmatprep.subr.bf16.mxu1 %v13088_v57  ;;  %v13152_v57 = vld [vmem:[#allocation5 + $0xd58] ss:$88 sps:$4 sm:$0xff]  }
 0x3c7   :  { %7627 = vmatpush1.bf16.msra.mxu0 %v13083_v58  ;;  %v13157_v58 = vld [vmem:[#allocation5 + $0xe04] ss:$88 sps:$4 sm:$0xff]  }
 0x3c8   :  { %7750 = vmatpush1.bf16.msra.mxu1 %v13086_v59  ;;  %7628 = vmatprep.subr.bf16.mxu0 %v13091_v60  ;;  %v13160_v59 = vld [vmem:[#allocation5 + $0xe0c] ss:$88 sps:$4 sm:$0xff]   ;;  %v13155_v60 = vld [vmem:[#allocation5 + $0xe00] ss:$88 sps:$4 sm:$0xff]  }
 0x3c9   :  { %7751 = vmatprep.subr.bf16.mxu1 %v13094_v61  ;;  %v13158_v61 = vld [vmem:[#allocation5 + $0xe08] ss:$88 sps:$4 sm:$0xff]  }
 0x3cb   :  { %7629 = vmatpush1.bf16.msra.mxu0 %v13089_v2  ;;  %v13163_v2 = vld [vmem:[#allocation5 + $0xeb4] ss:$88 sps:$4 sm:$0xff]  }
 0x3cc   :  { %7752 = vmatpush1.bf16.msra.mxu1 %v13092_v3  ;;  %7630 = vmatprep.subr.bf16.mxu0 %v13097_v4  ;;  %v13166_v3 = vld [vmem:[#allocation5 + $0xebc] ss:$88 sps:$4 sm:$0xff]   ;;  %v13161_v4 = vld [vmem:[#allocation5 + $0xeb0] ss:$88 sps:$4 sm:$0xff]  }
 0x3cd   :  { %7753 = vmatprep.subr.bf16.mxu1 %v13100_v6  ;;  %v13164_v6 = vld [vmem:[#allocation5 + $0xeb8] ss:$88 sps:$4 sm:$0xff]  }
 0x3cf   :  { %7631 = vmatpush1.bf16.msra.mxu0 %v13095_v7  ;;  %v13169_v7 = vld [vmem:[#allocation5 + $0xf64] ss:$88 sps:$4 sm:$0xff]  }
 0x3d0   :  { %7754 = vmatpush1.bf16.msra.mxu1 %v13098_v8  ;;  %7632 = vmatprep.subr.bf16.mxu0 %v13103_v9  ;;  %v13172_v8 = vld [vmem:[#allocation5 + $0xf6c] ss:$88 sps:$4 sm:$0xff]   ;;  %v13167_v9 = vld [vmem:[#allocation5 + $0xf60] ss:$88 sps:$4 sm:$0xff]  }
 0x3d1   :  { %7755 = vmatprep.subr.bf16.mxu1 %v13106_v11  ;;  %v13170_v11 = vld [vmem:[#allocation5 + $0xf68] ss:$88 sps:$4 sm:$0xff]  }
 0x3d3   :  { %7633 = vmatpush1.bf16.msra.mxu0 %v13101_v12  ;;  %v13175_v12 = vld [vmem:[#allocation5 + $0x1014] ss:$88 sps:$4 sm:$0xff]  }
 0x3d4   :  { %7756 = vmatpush1.bf16.msra.mxu1 %v13104_v14  ;;  %7634 = vmatprep.subr.bf16.mxu0 %v13109_v16  ;;  %v13178_v14 = vld [vmem:[#allocation5 + $0x101c] ss:$88 sps:$4 sm:$0xff]   ;;  %v13173_v16 = vld [vmem:[#allocation5 + $0x1010] ss:$88 sps:$4 sm:$0xff]  }
 0x3d5   :  { %7757 = vmatprep.subr.bf16.mxu1 %v13112_v17  ;;  %v13176_v17 = vld [vmem:[#allocation5 + $0x1018] ss:$88 sps:$4 sm:$0xff]  }
 0x3d7   :  { %7635 = vmatpush1.bf16.msra.mxu0 %v13107_v19  ;;  %v13181_v19 = vld [vmem:[#allocation5 + $0x10c4] ss:$88 sps:$4 sm:$0xff]  }
 0x3d8   :  { %7758 = vmatpush1.bf16.msra.mxu1 %v13110_v20  ;;  %7636 = vmatprep.subr.bf16.mxu0 %v13115_v21  ;;  %v13184_v20 = vld [vmem:[#allocation5 + $0x10cc] ss:$88 sps:$4 sm:$0xff]   ;;  %v13179_v21 = vld [vmem:[#allocation5 + $0x10c0] ss:$88 sps:$4 sm:$0xff]  }
 0x3d9   :  { %7759 = vmatprep.subr.bf16.mxu1 %v13118_v22  ;;  %v13182_v22 = vld [vmem:[#allocation5 + $0x10c8] ss:$88 sps:$4 sm:$0xff]  }
 0x3db   :  { %7637 = vmatpush1.bf16.msra.mxu0 %v13113_v23  ;;  %v13187_v23 = vld [vmem:[#allocation5 + $0x1174] ss:$88 sps:$4 sm:$0xff]  }
 0x3dc   :  { %7760 = vmatpush1.bf16.msra.mxu1 %v13116_v24  ;;  %7638 = vmatprep.subr.bf16.mxu0 %v13121_v25  ;;  %v13190_v24 = vld [vmem:[#allocation5 + $0x117c] ss:$88 sps:$4 sm:$0xff]   ;;  %v13185_v25 = vld [vmem:[#allocation5 + $0x1170] ss:$88 sps:$4 sm:$0xff]  }
 0x3dd   :  { %7761 = vmatprep.subr.bf16.mxu1 %v13124_v13  ;;  %v13188_v13 = vld [vmem:[#allocation5 + $0x1178] ss:$88 sps:$4 sm:$0xff]  }
 0x3df   :  { %7639 = vmatpush1.bf16.msra.mxu0 %v13119_v26  ;;  %v13193_v26 = vld [vmem:[#allocation5 + $0x1224] ss:$88 sps:$4 sm:$0xff]  }
 0x3e0   :  { %7762 = vmatpush1.bf16.msra.mxu1 %v13122_v27  ;;  %7640 = vmatprep.subr.bf16.mxu0 %v13127_v28  ;;  %v13196_v27 = vld [vmem:[#allocation5 + $0x122c] ss:$88 sps:$4 sm:$0xff]   ;;  %v13191_v28 = vld [vmem:[#allocation5 + $0x1220] ss:$88 sps:$4 sm:$0xff]  }
 0x3e1   :  { %7763 = vmatprep.subr.bf16.mxu1 %v13130_v29  ;;  %v13194_v29 = vld [vmem:[#allocation5 + $0x1228] ss:$88 sps:$4 sm:$0xff]  }
 0x3e3   :  { %7641 = vmatpush1.bf16.msra.mxu0 %v13125_v31  ;;  %v13199_v31 = vld [vmem:[#allocation5 + $0x12d4] ss:$88 sps:$4 sm:$0xff]  }
 0x3e4   :  { %7764 = vmatpush1.bf16.msra.mxu1 %v13128_v32  ;;  %7651 = vmatprep.subr.bf16.mxu0 %v13133_v33  ;;  %v13202_v32 = vld [vmem:[#allocation5 + $0x12dc] ss:$88 sps:$4 sm:$0xff]   ;;  %v13197_v33 = vld [vmem:[#allocation5 + $0x12d0] ss:$88 sps:$4 sm:$0xff]  }
 0x3e5   :  { %7774 = vmatprep.subr.bf16.mxu1 %v13136_v34  ;;  %v13200_v34 = vld [vmem:[#allocation5 + $0x12d8] ss:$88 sps:$4 sm:$0xff]  }
 0x3e6   :  { %7643 = vmatmul.mubr.bf16.vlgmr.msra.gmra.mrb[16].mxu0 %v14124_v5 }
 0x3e7   :  { %7766 = vmatmul.mubr.bf16.vlgmr.msra.gmra.mrb[16].mxu1 %v14124_v5  ;;  %7652 = vmatpush1.bf16.msra.mxu0 %v13131_v35  ;;  %v13205_v35 = vld [vmem:[#allocation5 + $0x1384] ss:$88 sps:$4 sm:$0xff]  }
 0x3e8   :  { %7775 = vmatpush1.bf16.msra.mxu1 %v13134_v36  ;;  %7653 = vmatprep.subr.bf16.mxu0 %v13139_v45  ;;  %v13208_v36 = vld [vmem:[#allocation5 + $0x138c] ss:$88 sps:$4 sm:$0xff]   ;;  %v13203_v45 = vld [vmem:[#allocation5 + $0x1380] ss:$88 sps:$4 sm:$0xff]  }
 0x3e9   :  { %7776 = vmatprep.subr.bf16.mxu1 %v13142_v46  ;;  %7683 = vmatprep.mubr.bf16.mxu0 %v14132_v30  ;;  %v13206_v46 = vld [vmem:[#allocation5 + $0x1388] ss:$88 sps:$4 sm:$0xff]  }
 0x3ea   :  { %7806 = vmatprep.mubr.bf16.mxu1 %v14132_v30 }
 0x3eb   :  { %7654 = vmatpush1.bf16.msra.mxu0 %v13137_v47  ;;  %v13211_v47 = vld [vmem:[#allocation5 + $0x1434] ss:$88 sps:$4 sm:$0xff]  }
 0x3ec   :  { %7777 = vmatpush1.bf16.msra.mxu1 %v13140_v49  ;;  %7655 = vmatprep.subr.bf16.mxu0 %v13145_v50  ;;  %v13214_v49 = vld [vmem:[#allocation5 + $0x143c] ss:$88 sps:$4 sm:$0xff]   ;;  %v13209_v50 = vld [vmem:[#allocation5 + $0x1430] ss:$88 sps:$4 sm:$0xff]  }
 0x3ed   :  { %7778 = vmatprep.subr.bf16.mxu1 %v13148_v51  ;;  %v13212_v51 = vld [vmem:[#allocation5 + $0x1438] ss:$88 sps:$4 sm:$0xff]  }
 0x3ef   :  { %7656 = vmatpush1.bf16.msra.mxu0 %v13143_v52  ;;  %v13217_v52 = vld [vmem:[#allocation5 + $0x14e4] ss:$88 sps:$4 sm:$0xff]  }
 0x3f0   :  { %7779 = vmatpush1.bf16.msra.mxu1 %v13146_v53  ;;  %7657 = vmatprep.subr.bf16.mxu0 %v13151_v54  ;;  %v13220_v53 = vld [vmem:[#allocation5 + $0x14ec] ss:$88 sps:$4 sm:$0xff]   ;;  %v13215_v54 = vld [vmem:[#allocation5 + $0x14e0] ss:$88 sps:$4 sm:$0xff]  }
 0x3f1   :  { %7780 = vmatprep.subr.bf16.mxu1 %v13154_v55  ;;  %v13218_v55 = vld [vmem:[#allocation5 + $0x14e8] ss:$88 sps:$4 sm:$0xff]  }
 0x3f3   :  { %7658 = vmatpush1.bf16.msra.mxu0 %v13149_v56  ;;  %v13223_v56 = vld [vmem:[#allocation5 + $0x1594] ss:$88 sps:$4 sm:$0xff]  }
 0x3f4   :  { %7781 = vmatpush1.bf16.msra.mxu1 %v13152_v57  ;;  %7659 = vmatprep.subr.bf16.mxu0 %v13157_v58  ;;  %v13226_v57 = vld [vmem:[#allocation5 + $0x159c] ss:$88 sps:$4 sm:$0xff]   ;;  %v13221_v58 = vld [vmem:[#allocation5 + $0x1590] ss:$88 sps:$4 sm:$0xff]  }
 0x3f5   :  { %7782 = vmatprep.subr.bf16.mxu1 %v13160_v59  ;;  %v13224_v59 = vld [vmem:[#allocation5 + $0x1598] ss:$88 sps:$4 sm:$0xff]  }
 0x3f7   :  { %7660 = vmatpush1.bf16.msra.mxu0 %v13155_v60  ;;  %v13229_v60 = vld [vmem:[#allocation5 + $0x1644] ss:$88 sps:$4 sm:$0xff]  }
 0x3f8   :  { %7783 = vmatpush1.bf16.msra.mxu1 %v13158_v61  ;;  %7661 = vmatprep.subr.bf16.mxu0 %v13163_v2  ;;  %v13232_v61 = vld [vmem:[#allocation5 + $0x164c] ss:$88 sps:$4 sm:$0xff]   ;;  %v13227_v2 = vld [vmem:[#allocation5 + $0x1640] ss:$88 sps:$4 sm:$0xff]  }
 0x3f9   :  { %7784 = vmatprep.subr.bf16.mxu1 %v13166_v3  ;;  %v13230_v3 = vld [vmem:[#allocation5 + $0x1648] ss:$88 sps:$4 sm:$0xff]  }
 0x3fb   :  { %7662 = vmatpush1.bf16.msra.mxu0 %v13161_v4  ;;  %v13235_v4 = vld [vmem:[#allocation5 + $0x16f4] ss:$88 sps:$4 sm:$0xff]  }
 0x3fc   :  { %7785 = vmatpush1.bf16.msra.mxu1 %v13164_v6  ;;  %7663 = vmatprep.subr.bf16.mxu0 %v13169_v7  ;;  %v13238_v6 = vld [vmem:[#allocation5 + $0x16fc] ss:$88 sps:$4 sm:$0xff]   ;;  %v13233_v7 = vld [vmem:[#allocation5 + $0x16f0] ss:$88 sps:$4 sm:$0xff]  }
 0x3fd   :  { %7786 = vmatprep.subr.bf16.mxu1 %v13172_v8  ;;  %v13236_v8 = vld [vmem:[#allocation5 + $0x16f8] ss:$88 sps:$4 sm:$0xff]  }
 0x3ff   :  { %7664 = vmatpush1.bf16.msra.mxu0 %v13167_v9  ;;  %v13241_v9 = vld [vmem:[#allocation5 + $0x17a4] ss:$88 sps:$4 sm:$0xff]  }
 0x400   :  { %7787 = vmatpush1.bf16.msra.mxu1 %v13170_v11  ;;  %7665 = vmatprep.subr.bf16.mxu0 %v13175_v12  ;;  %v13244_v11 = vld [vmem:[#allocation5 + $0x17ac] ss:$88 sps:$4 sm:$0xff]   ;;  %v13239_v12 = vld [vmem:[#allocation5 + $0x17a0] ss:$88 sps:$4 sm:$0xff]  }
 0x401   :  { %7788 = vmatprep.subr.bf16.mxu1 %v13178_v14  ;;  %v13242_v14 = vld [vmem:[#allocation5 + $0x17a8] ss:$88 sps:$4 sm:$0xff]  }
 0x403   :  { %7666 = vmatpush1.bf16.msra.mxu0 %v13173_v16  ;;  %v13247_v16 = vld [vmem:[#allocation5 + $0x1854] ss:$88 sps:$4 sm:$0xff]  }
 0x404   :  { %7789 = vmatpush1.bf16.msra.mxu1 %v13176_v17  ;;  %7667 = vmatprep.subr.bf16.mxu0 %v13181_v19  ;;  %v13250_v17 = vld [vmem:[#allocation5 + $0x185c] ss:$88 sps:$4 sm:$0xff]   ;;  %v13245_v19 = vld [vmem:[#allocation5 + $0x1850] ss:$88 sps:$4 sm:$0xff]  }
 0x405   :  { %7790 = vmatprep.subr.bf16.mxu1 %v13184_v20  ;;  %v13248_v20 = vld [vmem:[#allocation5 + $0x1858] ss:$88 sps:$4 sm:$0xff]  }
 0x407   :  { %7668 = vmatpush1.bf16.msra.mxu0 %v13179_v21  ;;  %v13253_v21 = vld [vmem:[#allocation5 + $0x1904] ss:$88 sps:$4 sm:$0xff]  }
 0x408   :  { %7791 = vmatpush1.bf16.msra.mxu1 %v13182_v22  ;;  %7669 = vmatprep.subr.bf16.mxu0 %v13187_v23  ;;  %v13256_v22 = vld [vmem:[#allocation5 + $0x190c] ss:$88 sps:$4 sm:$0xff]   ;;  %v13251_v23 = vld [vmem:[#allocation5 + $0x1900] ss:$88 sps:$4 sm:$0xff]  }
 0x409   :  { %7792 = vmatprep.subr.bf16.mxu1 %v13190_v24  ;;  %v13254_v24 = vld [vmem:[#allocation5 + $0x1908] ss:$88 sps:$4 sm:$0xff]  }
 0x40b   :  { %7670 = vmatpush1.bf16.msra.mxu0 %v13185_v25  ;;  %v13259_v25 = vld [vmem:[#allocation5 + $0x19b4] ss:$88 sps:$4 sm:$0xff]  }
 0x40c   :  { %7793 = vmatpush1.bf16.msra.mxu1 %v13188_v13  ;;  %7671 = vmatprep.subr.bf16.mxu0 %v13193_v26  ;;  %v13262_v13 = vld [vmem:[#allocation5 + $0x19bc] ss:$88 sps:$4 sm:$0xff]   ;;  %v13257_v26 = vld [vmem:[#allocation5 + $0x19b0] ss:$88 sps:$4 sm:$0xff]  }
 0x40d   :  { %7794 = vmatprep.subr.bf16.mxu1 %v13196_v27  ;;  %v13260_v27 = vld [vmem:[#allocation5 + $0x19b8] ss:$88 sps:$4 sm:$0xff]  }
 0x40f   :  { %7672 = vmatpush1.bf16.msra.mxu0 %v13191_v28  ;;  %v13265_v28 = vld [vmem:[#allocation5 + $0x1a64] ss:$88 sps:$4 sm:$0xff]  }
 0x410   :  { %7795 = vmatpush1.bf16.msra.mxu1 %v13194_v29  ;;  %7673 = vmatprep.subr.bf16.mxu0 %v13199_v31  ;;  %v13268_v29 = vld [vmem:[#allocation5 + $0x1a6c] ss:$88 sps:$4 sm:$0xff]   ;;  %v13263_v31 = vld [vmem:[#allocation5 + $0x1a60] ss:$88 sps:$4 sm:$0xff]  }
 0x411   :  { %7796 = vmatprep.subr.bf16.mxu1 %v13202_v32  ;;  %v13266_v32 = vld [vmem:[#allocation5 + $0x1a68] ss:$88 sps:$4 sm:$0xff]  }
 0x413   :  { %7674 = vmatpush1.bf16.msra.mxu0 %v13197_v33  ;;  %v13271_v33 = vld [vmem:[#allocation5 + $0x1b14] ss:$88 sps:$4 sm:$0xff]  }
 0x414   :  { %7797 = vmatpush1.bf16.msra.mxu1 %v13200_v34  ;;  %7675 = vmatprep.subr.bf16.mxu0 %v13205_v35  ;;  %v13274_v34 = vld [vmem:[#allocation5 + $0x1b1c] ss:$88 sps:$4 sm:$0xff]   ;;  %v13269_v35 = vld [vmem:[#allocation5 + $0x1b10] ss:$88 sps:$4 sm:$0xff]  }
 0x415   :  { %7798 = vmatprep.subr.bf16.mxu1 %v13208_v36  ;;  %v13272_v36 = vld [vmem:[#allocation5 + $0x1b18] ss:$88 sps:$4 sm:$0xff]  }
 0x417   :  { %7676 = vmatpush1.bf16.msra.mxu0 %v13203_v45  ;;  %v13277_v45 = vld [vmem:[#allocation5 + $0x1bc4] ss:$88 sps:$4 sm:$0xff]  }
 0x418   :  { %7799 = vmatpush1.bf16.msra.mxu1 %v13206_v46  ;;  %7677 = vmatprep.subr.bf16.mxu0 %v13211_v47  ;;  %v13280_v46 = vld [vmem:[#allocation5 + $0x1bcc] ss:$88 sps:$4 sm:$0xff]   ;;  %v13275_v47 = vld [vmem:[#allocation5 + $0x1bc0] ss:$88 sps:$4 sm:$0xff]  }
 0x419   :  { %7800 = vmatprep.subr.bf16.mxu1 %v13214_v49  ;;  %v13278_v49 = vld [vmem:[#allocation5 + $0x1bc8] ss:$88 sps:$4 sm:$0xff]  }
 0x41b   :  { %7678 = vmatpush1.bf16.msra.mxu0 %v13209_v50  ;;  %v13283_v50 = vld [vmem:[#allocation5 + $0x1c74] ss:$88 sps:$4 sm:$0xff]  }
 0x41c   :  { %7801 = vmatpush1.bf16.msra.mxu1 %v13212_v51  ;;  %7679 = vmatprep.subr.bf16.mxu0 %v13217_v52  ;;  %v13286_v51 = vld [vmem:[#allocation5 + $0x1c7c] ss:$88 sps:$4 sm:$0xff]   ;;  %v13281_v52 = vld [vmem:[#allocation5 + $0x1c70] ss:$88 sps:$4 sm:$0xff]  }
 0x41d   :  { %7802 = vmatprep.subr.bf16.mxu1 %v13220_v53  ;;  %v13284_v53 = vld [vmem:[#allocation5 + $0x1c78] ss:$88 sps:$4 sm:$0xff]  }
 0x41f   :  { %7680 = vmatpush1.bf16.msra.mxu0 %v13215_v54  ;;  %v13289_v54 = vld [vmem:[#allocation5 + $0x1d24] ss:$88 sps:$4 sm:$0xff]  }
 0x420   :  { %7803 = vmatpush1.bf16.msra.mxu1 %v13218_v55  ;;  %7681 = vmatprep.subr.bf16.mxu0 %v13223_v56  ;;  %v13292_v55 = vld [vmem:[#allocation5 + $0x1d2c] ss:$88 sps:$4 sm:$0xff]   ;;  %v13287_v56 = vld [vmem:[#allocation5 + $0x1d20] ss:$88 sps:$4 sm:$0xff]  }
 0x421   :  { %7804 = vmatprep.subr.bf16.mxu1 %v13226_v57  ;;  %v13290_v57 = vld [vmem:[#allocation5 + $0x1d28] ss:$88 sps:$4 sm:$0xff]  }
 0x423   :  { %7682 = vmatpush1.bf16.msra.mxu0 %v13221_v58  ;;  %v13295_v58 = vld [vmem:[#allocation5 + $0x1dd4] ss:$88 sps:$4 sm:$0xff]  }
 0x424   :  { %7805 = vmatpush1.bf16.msra.mxu1 %v13224_v59  ;;  %7692 = vmatprep.subr.bf16.mxu0 %v13229_v60  ;;  %v13298_v59 = vld [vmem:[#allocation5 + $0x1ddc] ss:$88 sps:$4 sm:$0xff]   ;;  %v1215_v60 = vlaneseq }
 0x425   :  { %7815 = vmatprep.subr.bf16.mxu1 %v13232_v61  ;;  %v13293_v61 = vld [vmem:[#allocation5 + $0x1dd0] ss:$88 sps:$4 sm:$0xff]  }
 0x426   :  { %7684 = vmatmul.mubr.bf16.vlgmr.msra.gmra.mrb[16].mxu0 %v14138_v10 }
 0x427   :  { %7807 = vmatmul.mubr.bf16.vlgmr.msra.gmra.mrb[16].mxu1 %v14138_v10  ;;  %7693 = vmatpush1.bf16.msra.mxu0 %v13227_v2  ;;  %v13296_v2 = vld [vmem:[#allocation5 + $0x1dd8] ss:$88 sps:$4 sm:$0xff]  }
 0x428   :  { %7816 = vmatpush1.bf16.msra.mxu1 %v13230_v3  ;;  %7694 = vmatprep.subr.bf16.mxu0 %v13235_v4  ;;  %v13301_v3 = vld [vmem:[#allocation5 + $0x1e84] ss:$88 sps:$4 sm:$0xff]  }
 0x429   :  { %7817 = vmatprep.subr.bf16.mxu1 %v13238_v6  ;;  %7724 = vmatprep.mubr.bf16.mxu0 %v14144_v15  ;;  %v13304_v4 = vld [vmem:[#allocation5 + $0x1e8c] ss:$88 sps:$4 sm:$0xff]   ;;  %v14226_v6 = vshrl.u32 %v1215_v60, 7 }
 0x42a   :  { %7847 = vmatprep.mubr.bf16.mxu1 %v14144_v15  ;;  %v13351_v60 = vld [vmem:[#allocation8 + $0x68] sm:$0xff]  }
 0x42b   :  { %7695 = vmatpush1.bf16.msra.mxu0 %v13233_v7  ;;  %v13299_v7 = vld [vmem:[#allocation5 + $0x1e80] ss:$88 sps:$4 sm:$0xff]  }
 0x42c   :  { %7818 = vmatpush1.bf16.msra.mxu1 %v13236_v8  ;;  %7696 = vmatprep.subr.bf16.mxu0 %v13241_v9  ;;  %v13302_v8 = vld [vmem:[#allocation5 + $0x1e88] ss:$88 sps:$4 sm:$0xff]   ;;  %v13307_v9 = vld [vmem:[#allocation5 + $0x1f34] ss:$88 sps:$4 sm:$0xff]  }
 0x42d   :  { %7819 = vmatprep.subr.bf16.mxu1 %v13244_v11  ;;  %v13310_v11 = vld [vmem:[#allocation5 + $0x1f3c] ss:$88 sps:$4 sm:$0xff]  }
 0x42f   :  { %7697 = vmatpush1.bf16.msra.mxu0 %v13239_v12  ;;  %v14229_v12 = vsub.s32 1, %v14226_v6 }
 0x430   :  { %7820 = vmatpush1.bf16.msra.mxu1 %v13242_v14  ;;  %7698 = vmatprep.subr.bf16.mxu0 %v13247_v16  ;;  %v14231_v14 = vld [vmem:[#allocation7] sm:$0xff]  ;;  %v13305_v16 = vld [vmem:[#allocation5 + $0x1f30] ss:$88 sps:$4 sm:$0xff]  }
 0x431   :  { %7821 = vmatprep.subr.bf16.mxu1 %v13250_v17  ;;  %v13308_v17 = vld [vmem:[#allocation5 + $0x1f38] ss:$88 sps:$4 sm:$0xff]  }
 0x433   :  { %7699 = vmatpush1.bf16.msra.mxu0 %v13245_v19  ;;  %v13313_v19 = vld [vmem:[#allocation5 + $0x1fe4] ss:$88 sps:$4 sm:$0xff]  }
 0x434   :  { %7822 = vmatpush1.bf16.msra.mxu1 %v13248_v20  ;;  %7700 = vmatprep.subr.bf16.mxu0 %v13253_v21  ;;  %v13316_v20 = vld [vmem:[#allocation5 + $0x1fec] ss:$88 sps:$4 sm:$0xff]   ;;  %v1222_v21 = vrot.slane %v14231_v14, %v14229_v12 }
 0x435   :  { %7823 = vmatprep.subr.bf16.mxu1 %v13256_v22  ;;  %v13311_v22 = vld [vmem:[#allocation5 + $0x1fe0] ss:$88 sps:$4 sm:$0xff]  }
 0x437   :  { %7701 = vmatpush1.bf16.msra.mxu0 %v13251_v23  ;;  %v13314_v23 = vld [vmem:[#allocation5 + $0x1fe8] ss:$88 sps:$4 sm:$0xff]  }
 0x438   :  { %7824 = vmatpush1.bf16.msra.mxu1 %v13254_v24  ;;  %7702 = vmatprep.subr.bf16.mxu0 %v13259_v25  ;;  %v13319_v24 = vld [vmem:[#allocation5 + $0x2094] ss:$88 sps:$4 sm:$0xff]  }
 0x439   :  { %7825 = vmatprep.subr.bf16.mxu1 %v13262_v13  ;;  %v13322_v25 = vld [vmem:[#allocation5 + $0x209c] ss:$88 sps:$4 sm:$0xff]   ;;  %v11745_v13 = vadd.f32 %v14174_v0, %v1222_v21  ;;  %v13328_v0 = vld [vmem:[#allocation5 + $0x100] ss:$88 sps:$4 sm:$0xff]   ;;  %v13353_v21 = vld [vmem:[#allocation5 + $0x470] ss:$88 sps:$4 sm:$0xff]  }
 0x43b   :  { %7703 = vmatpush1.bf16.msra.mxu0 %v13257_v26  ;;  %v13317_v26 = vld [vmem:[#allocation5 + $0x2090] ss:$88 sps:$4 sm:$0xff]  }
 0x43c   :  { %7826 = vmatpush1.bf16.msra.mxu1 %v13260_v27  ;;  %7704 = vmatprep.subr.bf16.mxu0 %v13265_v28  ;;  %v13320_v27 = vld [vmem:[#allocation5 + $0x2098] ss:$88 sps:$4 sm:$0xff]   ;;  %v13325_v28 = vld [vmem:[#allocation5 + $0x54] ss:$88 sps:$4 sm:$0xff]  }
 0x43d   :  { %7827 = vmatprep.subr.bf16.mxu1 %v13268_v29  ;;  %v13326_v29 = vld [vmem:[#allocation8 + $0x40] sm:$0xff]  }
 0x43f   :  { %7705 = vmatpush1.bf16.msra.mxu0 %v13263_v31  ;;  %v7980_v31 = vmax.f32 %v11745_v13, 0.0  ;;  %v13360_v13 = vld [vmem:[#allocation5 + $0x524] ss:$88 sps:$4 sm:$0xff]  }
 0x440   :  { %7828 = vmatpush1.bf16.msra.mxu1 %v13266_v32  ;;  %7706 = vmatprep.subr.bf16.mxu0 %v13271_v33  ;;  %v13323_v32 = vld [vmem:[#allocation5 + $0x50] ss:$88 sps:$4 sm:$0xff]   ;;  %v13327_v33 = vld [vmem:[#allocation8] sm:$0xff]  }
 0x441   :  { %7829 = vmatprep.subr.bf16.mxu1 %v13274_v34  ;;  %v13330_v34 = vld [vmem:[#allocation5 + $0x104] ss:$88 sps:$4 sm:$0xff]  }
 0x443   :  { %7707 = vmatpush1.bf16.msra.mxu0 %v13269_v35  ;;  %v13331_v35 = vld [vmem:[#allocation8 + $0x48] sm:$0xff]  }
 0x444   :  { %7830 = vmatpush1.bf16.msra.mxu1 %v13272_v36  ;;  %7708 = vmatprep.subr.bf16.mxu0 %v13277_v45  ;;  %v8002_v36 = vpack.c.bf16 %v7980_v31, %v7980_v31  ;;  %v13332_v45 = vld [vmem:[#allocation8 + $0x8] sm:$0xff]   ;;  %v13362_v31 = vld [vmem:[#allocation8 + $0x38] sm:$0xff]  }
 0x445   :  { %7831 = vmatprep.subr.bf16.mxu1 %v13280_v46  ;;  %v13335_v46 = vld [vmem:[#allocation5 + $0x1b4] ss:$88 sps:$4 sm:$0xff]  }
 0x447   :  { %7709 = vmatpush1.bf16.msra.mxu0 %v13275_v47  ;;  %v13336_v47 = vld [vmem:[#allocation8 + $0x50] sm:$0xff]  }
 0x448   :  { %7832 = vmatpush1.bf16.msra.mxu1 %v13278_v49  ;;  %7710 = vmatprep.subr.bf16.mxu0 %v13283_v50  ;;  %v13333_v49 = vld [vmem:[#allocation5 + $0x1b0] ss:$88 sps:$4 sm:$0xff]  }
 0x449   :  { %7833 = vmatprep.subr.bf16.mxu1 %v13286_v51  ;;  %v13337_v50 = vld [vmem:[#allocation8 + $0x10] sm:$0xff]  }
 0x44a   :  { %v13340_v51 = vld [vmem:[#allocation5 + $0x264] ss:$88 sps:$4 sm:$0xff]  }
 0x44b   :  { %7711 = vmatpush1.bf16.msra.mxu0 %v13281_v52  ;;  %v13341_v52 = vld [vmem:[#allocation8 + $0x58] sm:$0xff]  }
 0x44c   :  { %7834 = vmatpush1.bf16.msra.mxu1 %v13284_v53  ;;  %7712 = vmatprep.subr.bf16.mxu0 %v13289_v54  ;;  %v13338_v53 = vld [vmem:[#allocation5 + $0x260] ss:$88 sps:$4 sm:$0xff]   ;;  %v13342_v54 = vld [vmem:[#allocation8 + $0x18] sm:$0xff]  }
 0x44d   :  { %7835 = vmatprep.subr.bf16.mxu1 %v13292_v55  ;;  %v13345_v55 = vld [vmem:[#allocation5 + $0x314] ss:$88 sps:$4 sm:$0xff]  }
 0x44f   :  { %7713 = vmatpush1.bf16.msra.mxu0 %v13287_v56  ;;  %v13346_v56 = vld [vmem:[#allocation8 + $0x60] sm:$0xff]  }
 0x450   :  { %7836 = vmatpush1.bf16.msra.mxu1 %v13290_v57  ;;  %7714 = vmatprep.subr.bf16.mxu0 %v13295_v58  ;;  %v13343_v57 = vld [vmem:[#allocation5 + $0x310] ss:$88 sps:$4 sm:$0xff]   ;;  %v14240_v58 = vsub.s32 0, %v14226_v6 }
 0x451   :  { %7837 = vmatprep.subr.bf16.mxu1 %v13298_v59  ;;  %v13350_v59 = vld [vmem:[#allocation5 + $0x3c4] ss:$88 sps:$4 sm:$0xff]  }
 0x453   :  { %7715 = vmatpush1.bf16.msra.mxu0 %v13293_v61  ;;  %v14243_v61 = vsub.s32 3, %v14226_v6 }
 0x454   :  { %7838 = vmatpush1.bf16.msra.mxu1 %v13296_v2  ;;  %7716 = vmatprep.subr.bf16.mxu0 %v13301_v3  ;;  %v13348_v2 = vld [vmem:[#allocation5 + $0x3c0] ss:$88 sps:$4 sm:$0xff]  }
 0x455   :  { %7839 = vmatprep.subr.bf16.mxu1 %v13304_v4  ;;  %v13352_v3 = vld [vmem:[#allocation8 + $0x28] sm:$0xff]   ;;  %v1218_v4 = vrot.slane %v14231_v14, %v14240_v58 }
 0x457   :  { %7717 = vmatpush1.bf16.msra.mxu0 %v13299_v7  ;;  %v13355_v7 = vld [vmem:[#allocation5 + $0x474] ss:$88 sps:$4 sm:$0xff]  }
 0x458   :  { %7840 = vmatpush1.bf16.msra.mxu1 %v13302_v8  ;;  %7718 = vmatprep.subr.bf16.mxu0 %v13307_v9  ;;  %v13356_v8 = vld [vmem:[#allocation8 + $0x70] sm:$0xff]  }
 0x459   :  { %7841 = vmatprep.subr.bf16.mxu1 %v13310_v11 }
 0x45b   :  { %7719 = vmatpush1.bf16.msra.mxu0 %v13305_v16  ;;  %v1230_v16 = vrot.slane %v14231_v14, %v14243_v61 }
 0x45c   :  { %7842 = vmatpush1.bf16.msra.mxu1 %v13308_v17  ;;  %7720 = vmatprep.subr.bf16.mxu0 %v13313_v19 }
 0x45d   :  { %7843 = vmatprep.subr.bf16.mxu1 %v13316_v20 }
 0x45f   :  { %7721 = vmatpush1.bf16.msra.mxu0 %v13311_v22  ;;  %v13357_v22 = vld [vmem:[#allocation8 + $0x30] sm:$0xff]  }
 0x460   :  { %7844 = vmatpush1.bf16.msra.mxu1 %v13314_v23  ;;  %7722 = vmatprep.subr.bf16.mxu0 %v13319_v24  ;;  %v11744_v24 = vadd.f32 %v14170_v62, %v1218_v4  ;;  %v13363_v62 = vld [vmem:[#allocation5 + $0x5d0] ss:$88 sps:$4 sm:$0xff]   ;;  %v13390_v4 = vld [vmem:[#allocation5 + $0x944] ss:$88 sps:$4 sm:$0xff]  }
 0x461   :  { %7845 = vmatprep.subr.bf16.mxu1 %v13322_v25 }
 0x463   :  { %7723 = vmatpush1.bf16.msra.mxu0 %v13317_v26  ;;  %v13361_v26 = vld [vmem:[#allocation8 + $0x78] sm:$0xff]  }
 0x464   :  { %7846 = vmatpush1.bf16.msra.mxu1 %v13320_v27  ;;  %7856 = vmatprep.subr.bf16.mxu0 %v13325_v28  ;;  %v11747_v28 = vadd.f32 %v14176_v1, %v1230_v16  ;;  %v13388_v16 = vld [vmem:[#allocation5 + $0x940] ss:$88 sps:$4 sm:$0xff]  }
 0x465   :  { %11394 = vmatprep.subr.bf16.mxu1 %v13326_v29  ;;  %v13358_v29 = vld [vmem:[#allocation5 + $0x520] ss:$88 sps:$4 sm:$0xff]  }
 0x466   :  { %7725 = vmatmul.mubr.bf16.vlgmr.msra.gmra.mrb[16].mxu0 %v14152_v18 }
 0x467   :  { %7848 = vmatmul.mubr.bf16.vlgmr.msra.gmra.mrb[16].mxu1 %v14152_v18  ;;  %7857 = vmatpush1.bf16.msra.mxu0 %v13323_v32  ;;  %v7979_v32 = vmax.f32 %v11744_v24, 0.0 }
 0x468   :  { %11395 = vmatpush3.bf16.msra.mxu1 %v13327_v33  ;;  %9470 = vmatprep.mubr.bf16.mxu1 %v8002_v36  ;;  %v13365_v33 = vld [vmem:[#allocation5 + $0x5d4] ss:$88 sps:$4 sm:$0xff]  }
 0x469   :  { %7858 = vmatprep.subr.bf16.mxu0 %v13330_v34  ;;  %11396 = vmatprep.subr.bf16.mxu1 %v13331_v35  ;;  %v13366_v34 = vld [vmem:[#allocation8 + $0xc0] sm:$0xff]   ;;  %v7982_v35 = vmax.f32 %v11747_v28, 0.0  ;;  %v13401_v28 = vld [vmem:[#allocation8 + $0xf8] sm:$0xff]  }
 0x46a   :  { %7888 = vmatprep.mubr.bf16.mxu0 %v14120_v48  ;;  %v13347_v48 = vld [vmem:[#allocation8 + $0x20] sm:$0xff]  }
 0x46b   :  { %7859 = vmatpush1.bf16.msra.mxu0 %v13328_v0  ;;  %v13367_v36 = vld [vmem:[#allocation8 + $0x80] sm:$0xff]   ;;  %v8001_v0 = vpack.c.bf16 %v7979_v32, %v7979_v32  ;;  %v8004_v1 = vpack.c.bf16 %v7982_v35, %v7982_v35  ;;  %v13402_v32 = vld [vmem:[#allocation8 + $0xb8] sm:$0xff]  }
 0x46c   :  { %11397 = vmatpush3.bf16.msra.mxu1 %v13332_v45  ;;  %7860 = vmatprep.subr.bf16.mxu0 %v13335_v46  ;;  %v13370_v45 = vld [vmem:[#allocation5 + $0x684] ss:$88 sps:$4 sm:$0xff]  }
 0x46d   :  { %11398 = vmatprep.subr.bf16.mxu1 %v13336_v47  ;;  %v13371_v46 = vld [vmem:[#allocation8 + $0xc8] sm:$0xff]   ;;  %v13406_v35 = vld [vmem:[#allocation8 + $0x140] sm:$0xff]  }
 0x46e   :  { %v13368_v47 = vld [vmem:[#allocation5 + $0x680] ss:$88 sps:$4 sm:$0xff]  }
 0x46f   :  { %7861 = vmatpush1.bf16.msra.mxu0 %v13333_v49  ;;  %v13372_v49 = vld [vmem:[#allocation8 + $0x88] sm:$0xff]  }
 0x470   :  { %11399 = vmatpush3.bf16.msra.mxu1 %v13337_v50  ;;  %7862 = vmatprep.subr.bf16.mxu0 %v13340_v51  ;;  %v13375_v50 = vld [vmem:[#allocation5 + $0x734] ss:$88 sps:$4 sm:$0xff]  }
 0x471   :  { %11400 = vmatprep.subr.bf16.mxu1 %v13341_v52  ;;  %v13376_v51 = vld [vmem:[#allocation8 + $0xd0] sm:$0xff]  }
 0x472   :  { %v13373_v52 = vld [vmem:[#allocation5 + $0x730] ss:$88 sps:$4 sm:$0xff]  }
 0x473   :  { %7863 = vmatpush1.bf16.msra.mxu0 %v13338_v53  ;;  %v13377_v53 = vld [vmem:[#allocation8 + $0x90] sm:$0xff]  }
 0x474   :  { %11401 = vmatpush3.bf16.msra.mxu1 %v13342_v54  ;;  %7864 = vmatprep.subr.bf16.mxu0 %v13345_v55  ;;  %v13380_v54 = vld [vmem:[#allocation5 + $0x7e4] ss:$88 sps:$4 sm:$0xff]   ;;  %v13381_v55 = vld [vmem:[#allocation8 + $0xd8] sm:$0xff]  }
 0x475   :  { %11402 = vmatprep.subr.bf16.mxu1 %v13346_v56  ;;  %v13378_v56 = vld [vmem:[#allocation5 + $0x7e0] ss:$88 sps:$4 sm:$0xff]  }
 0x477   :  { %7865 = vmatpush1.bf16.msra.mxu0 %v13343_v57  ;;  %v13382_v57 = vld [vmem:[#allocation8 + $0x98] sm:$0xff]  }
 0x478   :  { %11403 = vmatpush3.bf16.msra.mxu1 %v13347_v48  ;;  %7866 = vmatprep.subr.bf16.mxu0 %v13350_v59  ;;  %v13385_v48 = vld [vmem:[#allocation5 + $0x894] ss:$88 sps:$4 sm:$0xff]  }
 0x479   :  { %11404 = vmatprep.subr.bf16.mxu1 %v13351_v60  ;;  %v14247_v9 = vpop.f32.mrb[12].mxu0  ;;  %v13386_v59 = vld [vmem:[#allocation8 + $0xe0] sm:$0xff]   ;;  %v13383_v60 = vld [vmem:[#allocation5 + $0x890] ss:$88 sps:$4 sm:$0xff]  }
 0x47a   :  { %v14249_v11 = vpop.f32.mrb[12].mxu1  ;;  %v14253_v17 = vpop.f32.mrb[13].mxu0 }
 0x47b   :  { %v14255_v19 = vpop.f32.mrb[13].mxu1  ;;  %v7484_v20 = vpop.f32.mrb[14].mxu0  ;;  %7867 = vmatpush1.bf16.msra.mxu0 %v13348_v2  ;;  %v13387_v2 = vld [vmem:[#allocation8 + $0xa0] sm:$0xff]  }
 0x47c   :  { %11405 = vmatpush3.bf16.msra.mxu1 %v13352_v3  ;;  %v7607_v23 = vpop.f32.mrb[14].mxu1  ;;  %v7485_v25 = vpop.f32.mrb[15].mxu0  ;;  %7868 = vmatprep.subr.bf16.mxu0 %v13355_v7  ;;  %v14260_v3 = vsub.s32 2, %v14226_v6  ;;  %v13391_v7 = vld [vmem:[#allocation8 + $0xe8] sm:$0xff]  }
 0x47d   :  { %11406 = vmatprep.subr.bf16.mxu1 %v13356_v8  ;;  %v7608_v27 = vpop.f32.mrb[15].mxu1  ;;  %v14263_v8 = vsub.s32 5, %v14226_v6  ;;  %v13392_v20 = vld [vmem:[#allocation8 + $0xa8] sm:$0xff]   ;;  %v13396_v23 = vld [vmem:[#allocation8 + $0xf0] sm:$0xff]  }
 0x47e   :  { %v13393_v25 = vld [vmem:[#allocation5 + $0x9f0] ss:$88 sps:$4 sm:$0xff]   ;;  %v13400_v27 = vld [vmem:[#allocation5 + $0xaa4] ss:$88 sps:$4 sm:$0xff]  }
 0x47f   :  { %7869 = vmatpush1.bf16.msra.mxu0 %v13353_v21  ;;  %v1226_v21 = vrot.slane %v14231_v14, %v14260_v3  ;;  %v1238_v24 = vrot.slane %v14231_v14, %v14263_v8 }
 0x480   :  { %11407 = vmatpush3.bf16.msra.mxu1 %v13357_v22  ;;  %7870 = vmatprep.subr.bf16.mxu0 %v13360_v13  ;;  %v13395_v22 = vld [vmem:[#allocation5 + $0x9f4] ss:$88 sps:$4 sm:$0xff]  }
 0x481   :  { %11408 = vmatprep.subr.bf16.mxu1 %v13361_v26  ;;  %v13397_v13 = vld [vmem:[#allocation8 + $0xb0] sm:$0xff]   ;;  %v11746_v26 = vadd.f32 %v14172_v63, %v1226_v21  ;;  %v13407_v63 = vld [vmem:[#allocation8 + $0x100] sm:$0xff]  }
 0x482   :  { %v13435_v21 = vld [vmem:[#allocation5 + $0xf74] ss:$88 sps:$4 sm:$0xff]  }
 0x483   :  { %7871 = vmatpush1.bf16.msra.mxu0 %v13358_v29  ;;  %v11749_v29 = vadd.f32 %v14194_v43, %v1238_v24  ;;  %v13433_v24 = vld [vmem:[#allocation5 + $0xf70] ss:$88 sps:$4 sm:$0xff]  }
 0x484   :  { %11409 = vmatpush3.bf16.msra.mxu1 %v13362_v31  ;;  %7872 = vmatprep.subr.bf16.mxu0 %v13365_v33  ;;  %v13398_v31 = vld [vmem:[#allocation5 + $0xaa0] ss:$88 sps:$4 sm:$0xff]   ;;  %v7981_v33 = vmax.f32 %v11746_v26, 0.0  ;;  %v13440_v26 = vld [vmem:[#allocation5 + $0x1024] ss:$88 sps:$4 sm:$0xff]  }
 0x485   :  { %11416 = vmatprep.subr.bf16.mxu1 %v13366_v34  ;;  %v13405_v34 = vld [vmem:[#allocation5 + $0xb54] ss:$88 sps:$4 sm:$0xff]  }
 0x487   :  { %9471 = vmatmul.mubr.bf16.vlgmr.msra.gmra.mrb[20].mxu1 %v8001_v0  ;;  %7873 = vmatpush1.bf16.msra.mxu0 %v13363_v62  ;;  %v7984_v62 = vmax.f32 %v11749_v29, 0.0  ;;  %v8003_v0 = vpack.c.bf16 %v7981_v33, %v7981_v33  ;;  %v13438_v29 = vld [vmem:[#allocation5 + $0x1020] ss:$88 sps:$4 sm:$0xff]   ;;  %v13445_v33 = vld [vmem:[#allocation5 + $0x10d4] ss:$88 sps:$4 sm:$0xff]  }
 0x488   :  { %11417 = vmatpush3.bf16.msra.mxu1 %v13367_v36  ;;  %9510 = vmatprep.mubr.bf16.mxu1 %v8004_v1  ;;  %v13403_v36 = vld [vmem:[#allocation5 + $0xb50] ss:$88 sps:$4 sm:$0xff]   ;;  %v13408_v1 = vld [vmem:[#allocation5 + $0xc00] ss:$88 sps:$4 sm:$0xff]  }
 0x489   :  { %7874 = vmatprep.subr.bf16.mxu0 %v13370_v45  ;;  %11418 = vmatprep.subr.bf16.mxu1 %v13371_v46  ;;  %v13410_v45 = vld [vmem:[#allocation5 + $0xc04] ss:$88 sps:$4 sm:$0xff]   ;;  %v8006_v43 = vpack.c.bf16 %v7984_v62, %v7984_v62  ;;  %v13443_v62 = vld [vmem:[#allocation5 + $0x10d0] ss:$88 sps:$4 sm:$0xff]  }
 0x48a   :  { %v13411_v46 = vld [vmem:[#allocation8 + $0x148] sm:$0xff]  }
 0x48b   :  { %7875 = vmatpush1.bf16.msra.mxu0 %v13368_v47  ;;  %v13412_v47 = vld [vmem:[#allocation8 + $0x108] sm:$0xff]  }
 0x48c   :  { %11419 = vmatpush3.bf16.msra.mxu1 %v13372_v49  ;;  %7876 = vmatprep.subr.bf16.mxu0 %v13375_v50  ;;  %v13415_v49 = vld [vmem:[#allocation5 + $0xcb4] ss:$88 sps:$4 sm:$0xff]  }
 0x48d   :  { %11420 = vmatprep.subr.bf16.mxu1 %v13376_v51  ;;  %v13416_v50 = vld [vmem:[#allocation8 + $0x150] sm:$0xff]  }
 0x48e   :  { %v13413_v51 = vld [vmem:[#allocation5 + $0xcb0] ss:$88 sps:$4 sm:$0xff]  }
 0x48f   :  { %7877 = vmatpush1.bf16.msra.mxu0 %v13373_v52  ;;  %v13417_v52 = vld [vmem:[#allocation8 + $0x110] sm:$0xff]  }
 0x490   :  { %11421 = vmatpush3.bf16.msra.mxu1 %v13377_v53  ;;  %7878 = vmatprep.subr.bf16.mxu0 %v13380_v54  ;;  %v13420_v53 = vld [vmem:[#allocation5 + $0xd64] ss:$88 sps:$4 sm:$0xff]   ;;  %v13421_v54 = vld [vmem:[#allocation8 + $0x158] sm:$0xff]  }
 0x491   :  { %11422 = vmatprep.subr.bf16.mxu1 %v13381_v55  ;;  %v13422_v55 = vld [vmem:[#allocation8 + $0x118] sm:$0xff]  }
 0x493   :  { %7879 = vmatpush1.bf16.msra.mxu0 %v13378_v56  ;;  %v13425_v56 = vld [vmem:[#allocation5 + $0xe14] ss:$88 sps:$4 sm:$0xff]  }
 0x494   :  { %11423 = vmatpush3.bf16.msra.mxu1 %v13382_v57  ;;  %7880 = vmatprep.subr.bf16.mxu0 %v13385_v48  ;;  %v13426_v57 = vld [vmem:[#allocation8 + $0x160] sm:$0xff]   ;;  %v13423_v48 = vld [vmem:[#allocation5 + $0xe10] ss:$88 sps:$4 sm:$0xff]  }
 0x495   :  { %11424 = vmatprep.subr.bf16.mxu1 %v13386_v59  ;;  %v14274_v59 = vsub.s32 4, %v14226_v6 }
 0x497   :  { %7881 = vmatpush1.bf16.msra.mxu0 %v13383_v60  ;;  %v13430_v60 = vld [vmem:[#allocation5 + $0xec4] ss:$88 sps:$4 sm:$0xff]  }
 0x498   :  { %11425 = vmatpush3.bf16.msra.mxu1 %v13387_v2  ;;  %7882 = vmatprep.subr.bf16.mxu0 %v13390_v4  ;;  %v13431_v2 = vld [vmem:[#allocation8 + $0x168] sm:$0xff]   ;;  %v1245_v4 = vsub.s32 7, %v14226_v6 }
 0x499   :  { %11426 = vmatprep.subr.bf16.mxu1 %v13391_v7  ;;  %v13428_v7 = vld [vmem:[#allocation5 + $0xec0] ss:$88 sps:$4 sm:$0xff]  }
 0x49b   :  { %7883 = vmatpush1.bf16.msra.mxu0 %v13388_v16  ;;  %v13432_v16 = vld [vmem:[#allocation8 + $0x128] sm:$0xff]  }
 0x49c   :  { %11427 = vmatpush3.bf16.msra.mxu1 %v13392_v20  ;;  %7884 = vmatprep.subr.bf16.mxu0 %v13395_v22  ;;  %v1234_v20 = vrot.slane %v14231_v14, %v14274_v59  ;;  %v13436_v22 = vld [vmem:[#allocation8 + $0x170] sm:$0xff]  }
 0x49d   :  { %11428 = vmatprep.subr.bf16.mxu1 %v13396_v23  ;;  %v1246_v23 = vrot.slane %v14231_v14, %v1245_v4 }
 0x49f   :  { %7885 = vmatpush1.bf16.msra.mxu0 %v13393_v25  ;;  %v13437_v25 = vld [vmem:[#allocation8 + $0x130] sm:$0xff]  }
 0x4a0   :  { %11429 = vmatpush3.bf16.msra.mxu1 %v13397_v13  ;;  %7886 = vmatprep.subr.bf16.mxu0 %v13400_v27  ;;  %v11748_v13 = vadd.f32 %v14190_v41, %v1234_v20  ;;  %v13441_v27 = vld [vmem:[#allocation8 + $0x178] sm:$0xff]   ;;  %v13447_v41 = vld [vmem:[#allocation8 + $0x180] sm:$0xff]  }
 0x4a1   :  { %11430 = vmatprep.subr.bf16.mxu1 %v13401_v28  ;;  %v11751_v28 = vadd.f32 %v14196_v44, %v1246_v23  ;;  %v13475_v20 = vld [vmem:[#allocation5 + $0x14f4] ss:$88 sps:$4 sm:$0xff]   ;;  %v13473_v23 = vld [vmem:[#allocation5 + $0x14f0] ss:$88 sps:$4 sm:$0xff]  }
 0x4a3   :  { %7887 = vmatpush1.bf16.msra.mxu0 %v13398_v31  ;;  %v13442_v31 = vld [vmem:[#allocation8 + $0x138] sm:$0xff]  }
 0x4a4   :  { %11431 = vmatpush3.bf16.msra.mxu1 %v13402_v32  ;;  %7897 = vmatprep.subr.bf16.mxu0 %v13405_v34  ;;  %v7983_v32 = vmax.f32 %v11748_v13, 0.0  ;;  %v13446_v34 = vld [vmem:[#allocation8 + $0x1c0] sm:$0xff]  }
 0x4a5   :  { %11438 = vmatprep.subr.bf16.mxu1 %v13406_v35  ;;  %v7986_v35 = vmax.f32 %v11751_v28, 0.0  ;;  %v13480_v13 = vld [vmem:[#allocation5 + $0x15a4] ss:$88 sps:$4 sm:$0xff]   ;;  %v13482_v28 = vld [vmem:[#allocation8 + $0x1b8] sm:$0xff]  }
 0x4a6   :  { %7889 = vmatmul.mubr.bf16.vlgmr.msra.gmra.mrb[20].mxu0 %v14124_v5  ;;  %v13418_v5 = vld [vmem:[#allocation5 + $0xd60] ss:$88 sps:$4 sm:$0xff]  }
 0x4a7   :  { %9511 = vmatmul.mubr.bf16.vlgmr.msra.gmra.mrb[24].mxu1 %v8003_v0  ;;  %7898 = vmatpush1.bf16.msra.mxu0 %v13403_v36  ;;  %v8005_v36 = vpack.c.bf16 %v7983_v32, %v7983_v32  ;;  %v13451_v0 = vld [vmem:[#allocation8 + $0x1c8] sm:$0xff]   ;;  %v8008_v44 = vpack.c.bf16 %v7986_v35, %v7986_v35  ;;  %v13486_v32 = vld [vmem:[#allocation8 + $0x240] sm:$0xff]  }
 0x4a8   :  { %11439 = vmatpush3.bf16.msra.mxu1 %v13407_v63  ;;  %9550 = vmatprep.mubr.bf16.mxu1 %v8006_v43  ;;  %v13450_v63 = vld [vmem:[#allocation5 + $0x1184] ss:$88 sps:$4 sm:$0xff]   ;;  %v13455_v43 = vld [vmem:[#allocation5 + $0x1234] ss:$88 sps:$4 sm:$0xff]  }
 0x4a9   :  { %7899 = vmatprep.subr.bf16.mxu0 %v13410_v45  ;;  %11440 = vmatprep.subr.bf16.mxu1 %v13411_v46  ;;  %v13448_v45 = vld [vmem:[#allocation5 + $0x1180] ss:$88 sps:$4 sm:$0xff]  }
 0x4aa   :  { %7929 = vmatprep.mubr.bf16.mxu0 %v14132_v30  ;;  %v13427_v30 = vld [vmem:[#allocation8 + $0x120] sm:$0xff]   ;;  %v13452_v46 = vld [vmem:[#allocation8 + $0x188] sm:$0xff]  }
 0x4ab   :  { %7900 = vmatpush1.bf16.msra.mxu0 %v13408_v1  ;;  %v13456_v1 = vld [vmem:[#allocation8 + $0x1d0] sm:$0xff]  }
 0x4ac   :  { %11441 = vmatpush3.bf16.msra.mxu1 %v13412_v47  ;;  %7901 = vmatprep.subr.bf16.mxu0 %v13415_v49  ;;  %v13453_v47 = vld [vmem:[#allocation5 + $0x1230] ss:$88 sps:$4 sm:$0xff]  }
 0x4ad   :  { %11442 = vmatprep.subr.bf16.mxu1 %v13416_v50  ;;  %v13457_v49 = vld [vmem:[#allocation8 + $0x190] sm:$0xff]  }
 0x4ae   :  { %v13460_v50 = vld [vmem:[#allocation5 + $0x12e4] ss:$88 sps:$4 sm:$0xff]  }
 0x4af   :  { %7902 = vmatpush1.bf16.msra.mxu0 %v13413_v51  ;;  %v13461_v51 = vld [vmem:[#allocation8 + $0x1d8] sm:$0xff]  }
 0x4b0   :  { %11443 = vmatpush3.bf16.msra.mxu1 %v13417_v52  ;;  %7903 = vmatprep.subr.bf16.mxu0 %v13420_v53  ;;  %v13458_v52 = vld [vmem:[#allocation5 + $0x12e0] ss:$88 sps:$4 sm:$0xff]   ;;  %v13462_v53 = vld [vmem:[#allocation8 + $0x198] sm:$0xff]  }
 0x4b1   :  { %11444 = vmatprep.subr.bf16.mxu1 %v13421_v54  ;;  %v13465_v54 = vld [vmem:[#allocation5 + $0x1394] ss:$88 sps:$4 sm:$0xff]  }
 0x4b3   :  { %7904 = vmatpush1.bf16.msra.mxu0 %v13418_v5  ;;  %v13466_v5 = vld [vmem:[#allocation8 + $0x1e0] sm:$0xff]  }
 0x4b4   :  { %11445 = vmatpush3.bf16.msra.mxu1 %v13422_v55  ;;  %7905 = vmatprep.subr.bf16.mxu0 %v13425_v56  ;;  %v13463_v55 = vld [vmem:[#allocation5 + $0x1390] ss:$88 sps:$4 sm:$0xff]   ;;  %v13467_v56 = vld [vmem:[#allocation8 + $0x1a0] sm:$0xff]  }
 0x4b5   :  { %11446 = vmatprep.subr.bf16.mxu1 %v13426_v57  ;;  %v1241_v57 = vsub.s32 6, %v14226_v6 }
 0x4b7   :  { %7906 = vmatpush1.bf16.msra.mxu0 %v13423_v48  ;;  %v13470_v48 = vld [vmem:[#allocation5 + $0x1444] ss:$88 sps:$4 sm:$0xff]  }
 0x4b8   :  { %11447 = vmatpush3.bf16.msra.mxu1 %v13427_v30  ;;  %7907 = vmatprep.subr.bf16.mxu0 %v13430_v60  ;;  %v13471_v30 = vld [vmem:[#allocation8 + $0x1e8] sm:$0xff]   ;;  %v14285_v60 = vld [vmem:[#allocation7 + $0x8] sm:$0xff] }
 0x4b9   :  { %11448 = vmatprep.subr.bf16.mxu1 %v13431_v2  ;;  %v13468_v2 = vld [vmem:[#allocation5 + $0x1440] ss:$88 sps:$4 sm:$0xff]  }
 0x4bb   :  { %7908 = vmatpush1.bf16.msra.mxu0 %v13428_v7  ;;  %v13472_v7 = vld [vmem:[#allocation8 + $0x1a8] sm:$0xff]  }
 0x4bc   :  { %11449 = vmatpush3.bf16.msra.mxu1 %v13432_v16  ;;  %7909 = vmatprep.subr.bf16.mxu0 %v13435_v21  ;;  %v1242_v16 = vrot.slane %v14231_v14, %v1241_v57  ;;  %v13476_v21 = vld [vmem:[#allocation8 + $0x1f0] sm:$0xff]   ;;  %v13478_v14 = vld [vmem:[#allocation5 + $0x15a0] ss:$88 sps:$4 sm:$0xff]  }
 0x4bd   :  { %11450 = vmatprep.subr.bf16.mxu1 %v13436_v22  ;;  %v1254_v22 = vrot.slane %v14285_v60, %v14229_v12 }
 0x4bf   :  { %7910 = vmatpush1.bf16.msra.mxu0 %v13433_v24  ;;  %v13477_v24 = vld [vmem:[#allocation8 + $0x1b0] sm:$0xff]  }
 0x4c0   :  { %11451 = vmatpush3.bf16.msra.mxu1 %v13437_v25  ;;  %7911 = vmatprep.subr.bf16.mxu0 %v13440_v26  ;;  %v11750_v25 = vadd.f32 %v14192_v42, %v1242_v16  ;;  %v13481_v26 = vld [vmem:[#allocation8 + $0x1f8] sm:$0xff]   ;;  %v13487_v42 = vld [vmem:[#allocation8 + $0x200] sm:$0xff]  }
 0x4c1   :  { %11452 = vmatprep.subr.bf16.mxu1 %v13441_v27  ;;  %v11753_v27 = vadd.f32 %v14214_v39, %v1254_v22 }
 0x4c3   :  { %7912 = vmatpush1.bf16.msra.mxu0 %v13438_v29  ;;  %v7985_v29 = vmax.f32 %v11750_v25, 0.0 }
 0x4c4   :  { %11453 = vmatpush3.bf16.msra.mxu1 %v13442_v31  ;;  %7913 = vmatprep.subr.bf16.mxu0 %v13445_v33  ;;  %v13485_v31 = vld [vmem:[#allocation5 + $0x1654] ss:$88 sps:$4 sm:$0xff]   ;;  %v7988_v33 = vmax.f32 %v11753_v27, 0.0 }
 0x4c5   :  { %11460 = vmatprep.subr.bf16.mxu1 %v13446_v34  ;;  %v13483_v34 = vld [vmem:[#allocation5 + $0x1650] ss:$88 sps:$4 sm:$0xff]   ;;  %v8007_v35 = vpack.c.bf16 %v7985_v29, %v7985_v29  ;;  %v13530_v29 = vld [vmem:[#allocation5 + $0x1c84] ss:$88 sps:$4 sm:$0xff]  }
 0x4c6   :  { %v8010_v39 = vpack.c.bf16 %v7988_v33, %v7988_v33  ;;  %v13532_v33 = vld [vmem:[#allocation8 + $0x288] sm:$0xff]  }
 0x4c7   :  { %9551 = vmatmul.mubr.bf16.vlgmr.msra.gmra.mrb[28].mxu1 %v8005_v36  ;;  %7914 = vmatpush1.bf16.msra.mxu0 %v13443_v62  ;;  %v13490_v62 = vld [vmem:[#allocation5 + $0x1704] ss:$88 sps:$4 sm:$0xff]   ;;  %v13488_v36 = vld [vmem:[#allocation5 + $0x1700] ss:$88 sps:$4 sm:$0xff]  }
 0x4c8   :  { %11461 = vmatpush3.bf16.msra.mxu1 %v13447_v41  ;;  %9590 = vmatprep.mubr.bf16.mxu1 %v8008_v44  ;;  %v13491_v41 = vld [vmem:[#allocation8 + $0x248] sm:$0xff]   ;;  %v13496_v44 = vld [vmem:[#allocation8 + $0x250] sm:$0xff]  }
 0x4c9   :  { %7915 = vmatprep.subr.bf16.mxu0 %v13450_v63  ;;  %11462 = vmatprep.subr.bf16.mxu1 %v13451_v0  ;;  %v13492_v63 = vld [vmem:[#allocation8 + $0x208] sm:$0xff]   ;;  %v13495_v0 = vld [vmem:[#allocation5 + $0x17b4] ss:$88 sps:$4 sm:$0xff]  }
 0x4cb   :  { %7916 = vmatpush1.bf16.msra.mxu0 %v13448_v45  ;;  %v13493_v45 = vld [vmem:[#allocation5 + $0x17b0] ss:$88 sps:$4 sm:$0xff]  }
 0x4cc   :  { %11463 = vmatpush3.bf16.msra.mxu1 %v13452_v46  ;;  %7917 = vmatprep.subr.bf16.mxu0 %v13455_v43  ;;  %v13497_v46 = vld [vmem:[#allocation8 + $0x210] sm:$0xff]  }
 0x4cd   :  { %11464 = vmatprep.subr.bf16.mxu1 %v13456_v1  ;;  %v13500_v43 = vld [vmem:[#allocation5 + $0x1864] ss:$88 sps:$4 sm:$0xff]   ;;  %v13501_v1 = vld [vmem:[#allocation8 + $0x258] sm:$0xff]  }
 0x4cf   :  { %7918 = vmatpush1.bf16.msra.mxu0 %v13453_v47  ;;  %v13502_v47 = vld [vmem:[#allocation8 + $0x218] sm:$0xff]  }
 0x4d0   :  { %11465 = vmatpush3.bf16.msra.mxu1 %v13457_v49  ;;  %7919 = vmatprep.subr.bf16.mxu0 %v13460_v50  ;;  %v13505_v49 = vld [vmem:[#allocation5 + $0x1914] ss:$88 sps:$4 sm:$0xff]  }
 0x4d1   :  { %11466 = vmatprep.subr.bf16.mxu1 %v13461_v51  ;;  %v13506_v50 = vld [vmem:[#allocation8 + $0x260] sm:$0xff]   ;;  %v13503_v51 = vld [vmem:[#allocation5 + $0x1910] ss:$88 sps:$4 sm:$0xff]  }
 0x4d3   :  { %7920 = vmatpush1.bf16.msra.mxu0 %v13458_v52  ;;  %v13510_v52 = vld [vmem:[#allocation5 + $0x19c4] ss:$88 sps:$4 sm:$0xff]  }
 0x4d4   :  { %11467 = vmatpush3.bf16.msra.mxu1 %v13462_v53  ;;  %7921 = vmatprep.subr.bf16.mxu0 %v13465_v54  ;;  %v13511_v53 = vld [vmem:[#allocation8 + $0x268] sm:$0xff]  }
 0x4d5   :  { %11468 = vmatprep.subr.bf16.mxu1 %v13466_v5  ;;  %v13508_v54 = vld [vmem:[#allocation5 + $0x19c0] ss:$88 sps:$4 sm:$0xff]  }
 0x4d6   :  { %v13512_v5 = vld [vmem:[#allocation8 + $0x228] sm:$0xff]  }
 0x4d7   :  { %7922 = vmatpush1.bf16.msra.mxu0 %v13463_v55  ;;  %v1250_v55 = vrot.slane %v14285_v60, %v14240_v58 }
 0x4d8   :  { %11469 = vmatpush3.bf16.msra.mxu1 %v13467_v56  ;;  %7923 = vmatprep.subr.bf16.mxu0 %v13470_v48  ;;  %v13515_v56 = vld [vmem:[#allocation5 + $0x1a74] ss:$88 sps:$4 sm:$0xff]  }
 0x4d9   :  { %11470 = vmatprep.subr.bf16.mxu1 %v13471_v30  ;;  %v13516_v48 = vld [vmem:[#allocation8 + $0x270] sm:$0xff]   ;;  %v1262_v30 = vrot.slane %v14285_v60, %v14243_v61  ;;  %v11752_v16 = vadd.f32 %v14210_v37, %v1250_v55  ;;  %v13527_v37 = vld [vmem:[#allocation8 + $0x280] sm:$0xff]  }
 0x4da   :  { %v13560_v55 = vld [vmem:[#allocation5 + $0x20a4] ss:$88 sps:$4 sm:$0xff]  }
 0x4db   :  { %7924 = vmatpush1.bf16.msra.mxu0 %v13468_v2  ;;  %v13513_v2 = vld [vmem:[#allocation5 + $0x1a70] ss:$88 sps:$4 sm:$0xff]   ;;  %v11755_v22 = vadd.f32 %v14216_v40, %v1262_v30  ;;  %v7987_v25 = vmax.f32 %v11752_v16, 0.0 }
 0x4dc   :  { %11471 = vmatpush3.bf16.msra.mxu1 %v13472_v7  ;;  %7925 = vmatprep.subr.bf16.mxu0 %v13475_v20  ;;  %v13517_v7 = vld [vmem:[#allocation8 + $0x230] sm:$0xff]  }
 0x4dd   :  { %11472 = vmatprep.subr.bf16.mxu1 %v13476_v21  ;;  %v13520_v20 = vld [vmem:[#allocation5 + $0x1b24] ss:$88 sps:$4 sm:$0xff]   ;;  %v13521_v21 = vld [vmem:[#allocation8 + $0x278] sm:$0xff]   ;;  %v7990_v27 = vmax.f32 %v11755_v22, 0.0 }
 0x4df   :  { %7926 = vmatpush1.bf16.msra.mxu0 %v13473_v23  ;;  %v13518_v23 = vld [vmem:[#allocation5 + $0x1b20] ss:$88 sps:$4 sm:$0xff]   ;;  %v8012_v40 = vpack.c.bf16 %v7990_v27, %v7990_v27 }
 0x4e0   :  { %11473 = vmatpush3.bf16.msra.mxu1 %v13477_v24  ;;  %7927 = vmatprep.subr.bf16.mxu0 %v13480_v13  ;;  %v13522_v24 = vld [vmem:[#allocation8 + $0x238] sm:$0xff]   ;;  %v13570_v27 = vld [vmem:[#allocation8 + $0x388] sm:$0xff]  }
 0x4e1   :  { %11474 = vmatprep.subr.bf16.mxu1 %v13481_v26  ;;  %v13525_v13 = vld [vmem:[#allocation5 + $0x1bd4] ss:$88 sps:$4 sm:$0xff]  }
 0x4e2   :  { %v13526_v26 = vld [vmem:[#allocation8 + $0x2c0] sm:$0xff]  }
 0x4e3   :  { %7928 = vmatpush1.bf16.msra.mxu0 %v13478_v14  ;;  %v13523_v14 = vld [vmem:[#allocation5 + $0x1bd0] ss:$88 sps:$4 sm:$0xff]  }
 0x4e4   :  { %11475 = vmatpush3.bf16.msra.mxu1 %v13482_v28  ;;  %7938 = vmatprep.subr.bf16.mxu0 %v13485_v31  ;;  %v8009_v28 = vpack.c.bf16 %v7987_v25, %v7987_v25  ;;  %v13531_v31 = vld [vmem:[#allocation8 + $0x2c8] sm:$0xff]  }
 0x4e5   :  { %11482 = vmatprep.subr.bf16.mxu1 %v13486_v32  ;;  %v13528_v32 = vld [vmem:[#allocation5 + $0x1c80] ss:$88 sps:$4 sm:$0xff]  }
 0x4e6   :  { %7930 = vmatmul.mubr.bf16.vlgmr.msra.gmra.mrb[20].mxu0 %v14138_v10  ;;  %v13498_v10 = vld [vmem:[#allocation5 + $0x1860] ss:$88 sps:$4 sm:$0xff]  }
 0x4e7   :  { %9591 = vmatmul.mubr.bf16.vlgmr.msra.gmra.mrb[32].mxu1 %v8007_v35  ;;  %7939 = vmatpush1.bf16.msra.mxu0 %v13483_v34  ;;  %v13535_v34 = vld [vmem:[#allocation5 + $0x1d34] ss:$88 sps:$4 sm:$0xff]   ;;  %v13533_v35 = vld [vmem:[#allocation5 + $0x1d30] ss:$88 sps:$4 sm:$0xff]   ;;  %v13568_v25 = vld [vmem:[#allocation8 + $0x3c8] sm:$0xff]  }
 0x4e8   :  { %11483 = vmatpush3.bf16.msra.mxu1 %v13487_v42  ;;  %9630 = vmatprep.mubr.bf16.mxu1 %v8010_v39  ;;  %v13536_v42 = vld [vmem:[#allocation8 + $0x2d0] sm:$0xff]   ;;  %v13541_v39 = vld [vmem:[#allocation8 + $0x2d8] sm:$0xff]  }
 0x4e9   :  { %7940 = vmatprep.subr.bf16.mxu0 %v13490_v62  ;;  %11484 = vmatprep.subr.bf16.mxu1 %v13491_v41  ;;  %v13537_v62 = vld [vmem:[#allocation8 + $0x290] sm:$0xff]  }
 0x4ea   :  { %7970 = vmatprep.mubr.bf16.mxu0 %v14144_v15  ;;  %v13507_v15 = vld [vmem:[#allocation8 + $0x220] sm:$0xff]  }
 0x4eb   :  { %7941 = vmatpush1.bf16.msra.mxu0 %v13488_v36  ;;  %v13540_v41 = vld [vmem:[#allocation5 + $0x1de4] ss:$88 sps:$4 sm:$0xff]   ;;  %v13538_v36 = vld [vmem:[#allocation5 + $0x1de0] ss:$88 sps:$4 sm:$0xff]  }
 0x4ec   :  { %11485 = vmatpush3.bf16.msra.mxu1 %v13492_v63  ;;  %7942 = vmatprep.subr.bf16.mxu0 %v13495_v0  ;;  %v13542_v63 = vld [vmem:[#allocation8 + $0x298] sm:$0xff]  }
 0x4ed   :  { %11486 = vmatprep.subr.bf16.mxu1 %v13496_v44  ;;  %v13545_v0 = vld [vmem:[#allocation5 + $0x1e94] ss:$88 sps:$4 sm:$0xff]  }
 0x4ee   :  { %v13546_v44 = vld [vmem:[#allocation8 + $0x2e0] sm:$0xff]  }
 0x4ef   :  { %7943 = vmatpush1.bf16.msra.mxu0 %v13493_v45  ;;  %v13543_v45 = vld [vmem:[#allocation5 + $0x1e90] ss:$88 sps:$4 sm:$0xff]  }
 0x4f0   :  { %11487 = vmatpush3.bf16.msra.mxu1 %v13497_v46  ;;  %7944 = vmatprep.subr.bf16.mxu0 %v13500_v43  ;;  %v13547_v46 = vld [vmem:[#allocation8 + $0x2a0] sm:$0xff]  }
 0x4f1   :  { %11488 = vmatprep.subr.bf16.mxu1 %v13501_v1  ;;  %v13550_v43 = vld [vmem:[#allocation5 + $0x1f44] ss:$88 sps:$4 sm:$0xff]  }
 0x4f2   :  { %v13551_v1 = vld [vmem:[#allocation8 + $0x2e8] sm:$0xff]  }
 0x4f3   :  { %7945 = vmatpush1.bf16.msra.mxu0 %v13498_v10  ;;  %v13548_v10 = vld [vmem:[#allocation5 + $0x1f40] ss:$88 sps:$4 sm:$0xff]  }
 0x4f4   :  { %11489 = vmatpush3.bf16.msra.mxu1 %v13502_v47  ;;  %7946 = vmatprep.subr.bf16.mxu0 %v13505_v49  ;;  %v13552_v47 = vld [vmem:[#allocation8 + $0x2a8] sm:$0xff]   ;;  %v1258_v49 = vrot.slane %v14285_v60, %v14260_v3 }
 0x4f5   :  { %11490 = vmatprep.subr.bf16.mxu1 %v13506_v50  ;;  %v13555_v50 = vld [vmem:[#allocation5 + $0x1ff4] ss:$88 sps:$4 sm:$0xff]  }
 0x4f7   :  { %7947 = vmatpush1.bf16.msra.mxu0 %v13503_v51  ;;  %v13556_v51 = vld [vmem:[#allocation8 + $0x2f0] sm:$0xff]  }
 0x4f8   :  { %11491 = vmatpush3.bf16.msra.mxu1 %v13507_v15  ;;  %7948 = vmatprep.subr.bf16.mxu0 %v13510_v52  ;;  %v1270_v15 = vrot.slane %v14285_v60, %v14263_v8  ;;  %v1278_v52 = vrot.slane %v14285_v60, %v1245_v4  ;;  %v13563_v4 = vld [vmem:[#allocation8 + $0x340] sm:$0xff]  }
 0x4f9   :  { %11492 = vmatprep.subr.bf16.mxu1 %v13511_v53  ;;  %v13553_v53 = vld [vmem:[#allocation5 + $0x1ff0] ss:$88 sps:$4 sm:$0xff]  }
 0x4fa   :  { %v11759_v30 = vadd.f32 %v14255_v19, %v1278_v52  ;;  %v13567_v19 = vld [vmem:[#allocation8 + $0x348] sm:$0xff]   ;;  %v13590_v52 = vld [vmem:[#allocation8 + $0x3b0] sm:$0xff]  }
 0x4fb   :  { %7949 = vmatpush1.bf16.msra.mxu0 %v13508_v54  ;;  %v13557_v54 = vld [vmem:[#allocation8 + $0x2b0] sm:$0xff]  }
 0x4fc   :  { %11493 = vmatpush3.bf16.msra.mxu1 %v13512_v5  ;;  %7950 = vmatprep.subr.bf16.mxu0 %v13515_v56  ;;  %v11754_v5 = vadd.f32 %v14212_v38, %v1258_v49  ;;  %v13561_v56 = vld [vmem:[#allocation8 + $0x2f8] sm:$0xff]   ;;  %v7994_v22 = vmax.f32 %v11759_v30, 0.0  ;;  %v13565_v38 = vld [vmem:[#allocation8 + $0x300] sm:$0xff]  }
 0x4fd   :  { %11494 = vmatprep.subr.bf16.mxu1 %v13516_v48  ;;  %v11757_v48 = vadd.f32 %v14253_v17, %v1270_v15  ;;  %v13566_v17 = vld [vmem:[#allocation8 + $0x380] sm:$0xff]   ;;  %v13589_v15 = vld [vmem:[#allocation8 + $0x330] sm:$0xff]  }
 0x4fe   :  { %v7989_v16 = vmax.f32 %v11754_v5, 0.0 }
 0x4ff   :  { %7951 = vmatpush1.bf16.msra.mxu0 %v13513_v2  ;;  %v13558_v2 = vld [vmem:[#allocation5 + $0x20a0] ss:$88 sps:$4 sm:$0xff]  }
 0x500   :  { %11495 = vmatpush3.bf16.msra.mxu1 %v13517_v7  ;;  %7952 = vmatprep.subr.bf16.mxu0 %v13520_v20  ;;  %v13562_v7 = vld [vmem:[#allocation8 + $0x2b8] sm:$0xff]   ;;  %v13564_v20 = vld [vmem:[#allocation8 + $0x3c0] sm:$0xff]  }
 0x501   :  { %11496 = vmatprep.subr.bf16.mxu1 %v13521_v21  ;;  %v7992_v21 = vmax.f32 %v11757_v48, 0.0 }
 0x503   :  { %7953 = vmatpush1.bf16.msra.mxu0 %v13518_v23  ;;  %v8011_v23 = vpack.c.bf16 %v7989_v16, %v7989_v16  ;;  %v13596_v16 = vld [vmem:[#allocation8 + $0x4c0] sm:$0xff]  }
 0x504   :  { %11497 = vmatpush3.bf16.msra.mxu1 %v13522_v24  ;;  %7954 = vmatprep.subr.bf16.mxu0 %v13525_v13  ;;  %v8014_v24 = vpack.c.bf16 %v7992_v21, %v7992_v21  ;;  %v8016_v13 = vpack.c.bf16 %v7994_v22, %v7994_v22  ;;  %v13597_v21 = vld [vmem:[#allocation8 + $0x400] sm:$0xff]  }
 0x505   :  { %11504 = vmatprep.subr.bf16.mxu1 %v13526_v26  ;;  %v13569_v26 = vld [vmem:[#allocation8 + $0x308] sm:$0xff]  }
 0x507   :  { %9631 = vmatmul.mubr.bf16.vlgmr.msra.gmra.mrb[36].mxu1 %v8009_v28  ;;  %7955 = vmatpush1.bf16.msra.mxu0 %v13523_v14  ;;  %v13571_v14 = vld [vmem:[#allocation8 + $0x350] sm:$0xff]  }
 0x508   :  { %11505 = vmatpush3.bf16.msra.mxu1 %v13527_v37  ;;  %9670 = vmatprep.mubr.bf16.mxu1 %v8012_v40  ;;  %v13572_v37 = vld [vmem:[#allocation8 + $0x3d0] sm:$0xff]   ;;  %v13576_v40 = vld [vmem:[#allocation8 + $0x3d8] sm:$0xff]  }
 0x509   :  { %7956 = vmatprep.subr.bf16.mxu0 %v13530_v29  ;;  %11506 = vmatprep.subr.bf16.mxu1 %v13531_v31  ;;  %v13573_v28 = vld [vmem:[#allocation8 + $0x310] sm:$0xff]   ;;  %v13575_v31 = vld [vmem:[#allocation8 + $0x358] sm:$0xff]  }
 0x50a   :  { %v13574_v29 = vld [vmem:[#allocation8 + $0x390] sm:$0xff]  }
 0x50b   :  { %7957 = vmatpush1.bf16.msra.mxu0 %v13528_v32  ;;  %v13578_v32 = vld [vmem:[#allocation8 + $0x398] sm:$0xff]  }
 0x50c   :  { %11507 = vmatpush3.bf16.msra.mxu1 %v13532_v33  ;;  %7958 = vmatprep.subr.bf16.mxu0 %v13535_v34  ;;  %v13579_v33 = vld [vmem:[#allocation8 + $0x360] sm:$0xff]  }
 0x50d   :  { %11508 = vmatprep.subr.bf16.mxu1 %v13536_v42  ;;  %v13580_v34 = vld [vmem:[#allocation8 + $0x3e0] sm:$0xff]  }
 0x50e   :  { %v13581_v42 = vld [vmem:[#allocation8 + $0x320] sm:$0xff]  }
 0x50f   :  { %7959 = vmatpush1.bf16.msra.mxu0 %v13533_v35  ;;  %v13582_v35 = vld [vmem:[#allocation8 + $0x3a0] sm:$0xff]  }
 0x510   :  { %11509 = vmatpush3.bf16.msra.mxu1 %v13537_v62  ;;  %7960 = vmatprep.subr.bf16.mxu0 %v13540_v41  ;;  %v13583_v62 = vld [vmem:[#allocation8 + $0x368] sm:$0xff]  }
 0x511   :  { %11510 = vmatprep.subr.bf16.mxu1 %v13541_v39  ;;  %v13584_v41 = vld [vmem:[#allocation8 + $0x3e8] sm:$0xff]   ;;  %v14313_v39 = vld [vmem:[#allocation7 + $0x10] sm:$0x3f] }
 0x512   :  { %v1294_v49 = vrot.slane %v14313_v39, %v14243_v61  ;;  %v13593_v61 = vld [vmem:[#allocation8 + $0x338] sm:$0xff]  }
 0x513   :  { %7961 = vmatpush1.bf16.msra.mxu0 %v13538_v36  ;;  %v13585_v36 = vld [vmem:[#allocation8 + $0x328] sm:$0xff]  }
 0x514   :  { %11511 = vmatpush3.bf16.msra.mxu1 %v13542_v63  ;;  %7962 = vmatprep.subr.bf16.mxu0 %v13545_v0  ;;  %v1266_v63 = vrot.slane %v14285_v60, %v14274_v59  ;;  %v13586_v0 = vld [vmem:[#allocation8 + $0x3a8] sm:$0xff]  }
 0x515   :  { %11512 = vmatprep.subr.bf16.mxu1 %v13546_v44  ;;  %v13587_v44 = vld [vmem:[#allocation8 + $0x370] sm:$0xff]  }
 0x517   :  { %7963 = vmatpush1.bf16.msra.mxu0 %v13543_v45  ;;  %v1274_v45 = vrot.slane %v14285_v60, %v1241_v57  ;;  %v11756_v57 = vadd.f32 %v14247_v9, %v1266_v63  ;;  %v13619_v63 = vld [vmem:[#allocation8 + $0x470] sm:$0xff]  }
 0x518   :  { %11513 = vmatpush3.bf16.msra.mxu1 %v13547_v46  ;;  %7964 = vmatprep.subr.bf16.mxu0 %v13550_v43  ;;  %v13588_v43 = vld [vmem:[#allocation8 + $0x3f0] sm:$0xff]  }
 0x519   :  { %11514 = vmatprep.subr.bf16.mxu1 %v13551_v1  ;;  %v11758_v5 = vadd.f32 %v14249_v11, %v1274_v45  ;;  %v7991_v30 = vmax.f32 %v11756_v57, 0.0  ;;  %v13598_v11 = vld [vmem:[#allocation8 + $0x480] sm:$0xff]   ;;  %v13620_v45 = vld [vmem:[#allocation8 + $0x4f0] sm:$0xff]  }
 0x51b   :  { %7965 = vmatpush1.bf16.msra.mxu0 %v13548_v10  ;;  %v1286_v10 = vrot.slane %v14313_v39, %v14229_v12  ;;  %v7993_v9 = vmax.f32 %v11758_v5, 0.0  ;;  %v8013_v22 = vpack.c.bf16 %v7991_v30, %v7991_v30  ;;  %v13632_v30 = vld [vmem:[#allocation8 + $0x510] sm:$0xff]  }
 0x51c   :  { %11515 = vmatpush3.bf16.msra.mxu1 %v13552_v47  ;;  %7966 = vmatprep.subr.bf16.mxu0 %v13555_v50 }
 0x51d   :  { %11516 = vmatprep.subr.bf16.mxu1 %v13556_v51 }
 0x51f   :  { %7967 = vmatpush1.bf16.msra.mxu0 %v13553_v53  ;;  %v13591_v53 = vld [vmem:[#allocation8 + $0x378] sm:$0xff]  }
 0x520   :  { %11517 = vmatpush3.bf16.msra.mxu1 %v13557_v54  ;;  %7968 = vmatprep.subr.bf16.mxu0 %v13560_v55  ;;  %v13592_v55 = vld [vmem:[#allocation8 + $0x3f8] sm:$0xff]  }
 0x521   :  { %11518 = vmatprep.subr.bf16.mxu1 %v13561_v56 }
 0x523   :  { %7969 = vmatpush1.bf16.msra.mxu0 %v13558_v2  ;;  %v13594_v2 = vld [vmem:[#allocation8 + $0x3b8] sm:$0xff]  }
 0x524   :  { %11519 = vmatpush3.bf16.msra.mxu1 %v13562_v7  ;;  %11526 = vmatprep.subr.bf16.mxu0 %v13563_v4  ;;  %v13595_v7 = vld [vmem:[#allocation8 + $0x440] sm:$0xff]  }
 0x525   :  { %11548 = vmatprep.subr.bf16.mxu1 %v13564_v20 }
 0x526   :  { %7971 = vmatmul.mubr.bf16.vlgmr.msra.gmra.mrb[20].mxu0 %v14152_v18  ;;  %v13577_v18 = vld [vmem:[#allocation8 + $0x318] sm:$0xff]  }
 0x527   :  { %9671 = vmatmul.mubr.bf16.vlgmr.msra.gmra.mrb[40].mxu1 %v8011_v23  ;;  %11527 = vmatpush3.bf16.msra.mxu0 %v13565_v38  ;;  %v8015_v38 = vpack.c.bf16 %v7993_v9, %v7993_v9  ;;  %v13599_v23 = vld [vmem:[#allocation8 + $0x448] sm:$0xff]   ;;  %v13635_v9 = vld [vmem:[#allocation8 + $0x560] sm:$0xff]  }
 0x528   :  { %9710 = vmatprep.mubr.bf16.mxu0 %v8014_v24  ;;  %11549 = vmatpush3.bf16.msra.mxu1 %v13566_v17  ;;  %v13600_v17 = vld [vmem:[#allocation8 + $0x4c8] sm:$0xff]  }
 0x529   :  { %9750 = vmatprep.mubr.bf16.mxu1 %v8016_v13  ;;  %11528 = vmatprep.subr.bf16.mxu0 %v13567_v19  ;;  %v13602_v13 = vld [vmem:[#allocation8 + $0x488] sm:$0xff]  }
 0x52a   :  { %11550 = vmatprep.subr.bf16.mxu1 %v13568_v25  ;;  %v13601_v25 = vld [vmem:[#allocation8 + $0x408] sm:$0xff]  }
 0x52b   :  { %11529 = vmatpush3.bf16.msra.mxu0 %v13569_v26  ;;  %v13603_v26 = vld [vmem:[#allocation8 + $0x450] sm:$0xff]  }
 0x52c   :  { %11551 = vmatpush3.bf16.msra.mxu1 %v13570_v27  ;;  %11530 = vmatprep.subr.bf16.mxu0 %v13571_v14  ;;  %v13604_v27 = vld [vmem:[#allocation8 + $0x4d0] sm:$0xff]  }
 0x52d   :  { %11552 = vmatprep.subr.bf16.mxu1 %v13572_v37  ;;  %v13605_v14 = vld [vmem:[#allocation8 + $0x410] sm:$0xff]  }
 0x52e   :  { %v13606_v37 = vld [vmem:[#allocation8 + $0x490] sm:$0xff]  }
 0x52f   :  { %11531 = vmatpush3.bf16.msra.mxu0 %v13573_v28  ;;  %v13607_v28 = vld [vmem:[#allocation8 + $0x458] sm:$0xff]  }
 0x530   :  { %11553 = vmatpush3.bf16.msra.mxu1 %v13574_v29  ;;  %11532 = vmatprep.subr.bf16.mxu0 %v13575_v31  ;;  %v13608_v29 = vld [vmem:[#allocation8 + $0x4d8] sm:$0xff]  }
 0x531   :  { %11554 = vmatprep.subr.bf16.mxu1 %v13576_v40  ;;  %v13609_v31 = vld [vmem:[#allocation8 + $0x418] sm:$0xff]  }
 0x532   :  { %v13610_v40 = vld [vmem:[#allocation8 + $0x498] sm:$0xff]  }
 0x533   :  { %11533 = vmatpush3.bf16.msra.mxu0 %v13577_v18  ;;  %v13611_v18 = vld [vmem:[#allocation8 + $0x460] sm:$0xff]  }
 0x534   :  { %11555 = vmatpush3.bf16.msra.mxu1 %v13578_v32  ;;  %11534 = vmatprep.subr.bf16.mxu0 %v13579_v33  ;;  %v13612_v32 = vld [vmem:[#allocation8 + $0x4e0] sm:$0xff]  }
 0x535   :  { %11556 = vmatprep.subr.bf16.mxu1 %v13580_v34  ;;  %v13613_v33 = vld [vmem:[#allocation8 + $0x420] sm:$0xff]  }
 0x536   :  { %v13614_v34 = vld [vmem:[#allocation8 + $0x4a0] sm:$0xff]  }
 0x537   :  { %11535 = vmatpush3.bf16.msra.mxu0 %v13581_v42  ;;  %v13615_v42 = vld [vmem:[#allocation8 + $0x468] sm:$0xff]  }
 0x538   :  { %11557 = vmatpush3.bf16.msra.mxu1 %v13582_v35  ;;  %11536 = vmatprep.subr.bf16.mxu0 %v13583_v62  ;;  %v13616_v35 = vld [vmem:[#allocation8 + $0x4e8] sm:$0xff]  }
 0x539   :  { %v14320_v46 = vpop.f32.mrb[16].mxu0  ;;  %11558 = vmatprep.subr.bf16.mxu1 %v13584_v41  ;;  %v13617_v62 = vld [vmem:[#allocation8 + $0x428] sm:$0xff]   ;;  %v1282_v41 = vrot.slane %v14313_v39, %v14240_v58 }
 0x53a   :  { %v14322_v1 = vpop.f32.mrb[16].mxu1  ;;  %v7728_v47 = vpop.f32.mrb[17].mxu0 }
 0x53b   :  { %v7851_v50 = vpop.f32.mrb[17].mxu1  ;;  %v7730_v51 = vpop.f32.mrb[18].mxu0  ;;  %11537 = vmatpush3.bf16.msra.mxu0 %v13585_v36  ;;  %v11761_v56 = vadd.f32 %v7728_v47, %v1286_v10  ;;  %v13618_v36 = vld [vmem:[#allocation8 + $0x4a8] sm:$0xff]  }
 0x53c   :  { %v7853_v6 = vpop.f32.mrb[18].mxu1  ;;  %11559 = vmatpush3.bf16.msra.mxu1 %v13586_v0  ;;  %v7731_v60 = vpop.f32.mrb[19].mxu0  ;;  %11538 = vmatprep.subr.bf16.mxu0 %v13587_v44  ;;  %v11763_v48 = vadd.f32 %v7851_v50, %v1294_v49  ;;  %v1290_v0 = vrot.slane %v14313_v39, %v14260_v3  ;;  %v13621_v49 = vld [vmem:[#allocation8 + $0x430] sm:$0xff]   ;;  %v11760_v50 = vadd.f32 %v14320_v46, %v1282_v41  ;;  %v13625_v3 = vld [vmem:[#allocation8 + $0x438] sm:$0xff]   ;;  %v13628_v46 = vld [vmem:[#allocation8 + $0x500] sm:$0xff]  }
 0x53d   :  { %v7854_v54 = vpop.f32.mrb[19].mxu1  ;;  %11560 = vmatprep.subr.bf16.mxu1 %v13588_v43  ;;  %v7996_v4 = vmax.f32 %v11761_v56, 0.0  ;;  %v13623_v6 = vld [vmem:[#allocation8 + $0x478] sm:$0xff]   ;;  %v13629_v56 = vld [vmem:[#allocation8 + $0x548] sm:$0xff]  }
 0x53e   :  { %v7998_v20 = vmax.f32 %v11763_v48, 0.0  ;;  %v11762_v57 = vadd.f32 %v14322_v1, %v1290_v0  ;;  %v13624_v60 = vld [vmem:[#allocation8 + $0x4f8] sm:$0xff]   ;;  %v13627_v54 = vld [vmem:[#allocation8 + $0x540] sm:$0xff]   ;;  %v13630_v1 = vld [vmem:[#allocation8 + $0x508] sm:$0xff]  }
 0x53f   :  { %11539 = vmatpush3.bf16.msra.mxu0 %v13589_v15  ;;  %v8018_v24 = vpack.c.bf16 %v7996_v4, %v7996_v4  ;;  %v13622_v15 = vld [vmem:[#allocation8 + $0x4b0] sm:$0xff]   ;;  %v13637_v4 = vld [vmem:[#allocation8 + $0x568] sm:$0xff]   ;;  %v9883_v41 = vld [vmem:[#allocation11 + $0x18] sm:$0xff] }
 0x540   :  { %11561 = vmatpush3.bf16.msra.mxu1 %v13590_v52  ;;  %11540 = vmatprep.subr.bf16.mxu0 %v13591_v53  ;;  %v8020_v19 = vpack.c.bf16 %v7998_v20, %v7998_v20  ;;  %v7995_v52 = vmax.f32 %v11760_v50, 0.0  ;;  %v13626_v53 = vld [vmem:[#allocation8 + $0x4b8] sm:$0xff]   ;;  %v7997_v5 = vmax.f32 %v11762_v57, 0.0  ;;  %v13638_v20 = vld [vmem:[#allocation8 + $0x528] sm:$0xff]  }
 0x541   :  { %11562 = vmatprep.subr.bf16.mxu1 %v13592_v55  ;;  %v9882_v0 = vld [vmem:[#allocation11 + $0x10] sm:$0xff]  ;;  %v9889_v50 = vld [vmem:[#allocation11 + $0x48] sm:$0xff]  ;;  %v9888_v57 = vld [vmem:[#allocation11 + $0x40] sm:$0xff] }
 0x542   :  { %v8017_v55 = vpack.c.bf16 %v7995_v52, %v7995_v52  ;;  %v8019_v48 = vpack.c.bf16 %v7997_v5, %v7997_v5  ;;  %v9895_v52 = vld [vmem:[#allocation11 + $0x78] sm:$0xff]  ;;  %v9892_v5 = vld [vmem:[#allocation11 + $0x60] sm:$0xff] }
 0x543   :  { %11541 = vmatpush3.bf16.msra.mxu0 %v13593_v61  ;;  %v13631_v61 = vld [vmem:[#allocation8 + $0x550] sm:$0xff]  }
 0x544   :  { %11563 = vmatpush3.bf16.msra.mxu1 %v13594_v2  ;;  %11570 = vmatprep.subr.bf16.mxu0 %v13595_v7  ;;  %v13633_v2 = vld [vmem:[#allocation8 + $0x558] sm:$0xff]  }
 0x545   :  { %11592 = vmatprep.subr.bf16.mxu1 %v13596_v16  ;;  %v13634_v7 = vld [vmem:[#allocation8 + $0x518] sm:$0xff]   ;;  %v13636_v16 = vld [vmem:[#allocation8 + $0x520] sm:$0xff]  }
 0x546   :  { %9711 = vmatmul.mubr.bf16.vlgmr.msra.gmra.mrb[24].mxu0 %v8013_v22 }
 0x547   :  { %9751 = vmatmul.mubr.bf16.vlgmr.msra.gmra.mrb[44].mxu1 %v8015_v38  ;;  %11571 = vmatpush3.bf16.msra.mxu0 %v13597_v21  ;;  %v11216_v21 = vld [vmem:[#allocation10] ss:$0 sm:$0xff] }
 0x548   :  { %9790 = vmatprep.mubr.bf16.mxu0 %v8018_v24  ;;  %11593 = vmatpush3.bf16.msra.mxu1 %v13598_v11  ;;  %v13639_v11 = vld [vmem:[#allocation8 + $0x570] sm:$0xff]  }
 0x549   :  { %11572 = vmatprep.subr.bf16.mxu0 %v13599_v23  ;;  %11594 = vmatprep.subr.bf16.mxu1 %v13600_v17 }
 0x54a   :  { %9830 = vmatprep.mubr.bf16.mxu1 %v8020_v19  ;;  %v13640_v19 = vld [vmem:[#allocation8 + $0x530] sm:$0xff]  }
 0x54b   :  { %11573 = vmatpush3.bf16.msra.mxu0 %v13601_v25 }
 0x54c   :  { %11595 = vmatpush3.bf16.msra.mxu1 %v13602_v13  ;;  %11574 = vmatprep.subr.bf16.mxu0 %v13603_v26  ;;  %v13641_v26 = vld [vmem:[#allocation8 + $0x578] sm:$0xff]  }
 0x54d   :  { %11596 = vmatprep.subr.bf16.mxu1 %v13604_v27  ;;  %v13642_v27 = vld [vmem:[#allocation8 + $0x538] sm:$0xff]  }
 0x54f   :  { %11575 = vmatpush3.bf16.msra.mxu0 %v13605_v14 }
 0x550   :  { %11597 = vmatpush3.bf16.msra.mxu1 %v13606_v37  ;;  %11576 = vmatprep.subr.bf16.mxu0 %v13607_v28 }
 0x551   :  { %11598 = vmatprep.subr.bf16.mxu1 %v13608_v29 }
 0x553   :  { %11577 = vmatpush3.bf16.msra.mxu0 %v13609_v31 }
 0x554   :  { %11599 = vmatpush3.bf16.msra.mxu1 %v13610_v40  ;;  %11578 = vmatprep.subr.bf16.mxu0 %v13611_v18 }
 0x555   :  { %11600 = vmatprep.subr.bf16.mxu1 %v13612_v32 }
 0x557   :  { %11579 = vmatpush3.bf16.msra.mxu0 %v13613_v33 }
 0x558   :  { %11601 = vmatpush3.bf16.msra.mxu1 %v13614_v34  ;;  %11580 = vmatprep.subr.bf16.mxu0 %v13615_v42 }
 0x559   :  { %11602 = vmatprep.subr.bf16.mxu1 %v13616_v35 }
 0x55a   :  { %v11410_v44 = vpop.f32.mrb[20].mxu1 }
 0x55b   :  { %v11411_v43 = vpop.f32.mrb[21].mxu1  ;;  %11581 = vmatpush3.bf16.msra.mxu0 %v13617_v62  ;;  %v9881_v62 = vld [vmem:[#allocation11 + $0x8] sm:$0xff] }
 0x55c   :  { %v11412_v10 = vadd.f32 %v11411_v43, %v11410_v44  ;;  %v11413_v47 = vpop.f32.mrb[22].mxu1  ;;  %11603 = vmatpush3.bf16.msra.mxu1 %v13618_v36  ;;  %11582 = vmatprep.subr.bf16.mxu0 %v13619_v63  ;;  %v9880_v36 = vld [vmem:[#allocation11] sm:$0xff]  ;;  %v11688_v63 = vpack.c.bf16 %v9883_v41, %v9881_v62  ;;  %v9885_v44 = vld [vmem:[#allocation11 + $0x28] sm:$0xff] }
 0x55d   :  { %v11414_v51 = vpop.f32.mrb[23].mxu1  ;;  %11604 = vmatprep.subr.bf16.mxu1 %v13620_v45  ;;  %v9887_v45 = vld [vmem:[#allocation11 + $0x38] sm:$0xff]  ;;  %v11690_v43 = vpack.c.bf16 %v9882_v0, %v9880_v36  ;;  %v9884_v47 = vld [vmem:[#allocation11 + $0x20] sm:$0xff] }
 0x55e   :  { %v9473_v23 = vadd.f32 %v11412_v10, %v11216_v21  ;;  %v11692_v10 = vpack.c.bf16 %v9887_v45, %v9885_v44  ;;  %v9891_v51 = vld [vmem:[#allocation11 + $0x58] sm:$0xff] }
 0x55f   :  { %11583 = vmatpush3.bf16.msra.mxu0 %v13621_v49  ;;  %v9886_v49 = vld [vmem:[#allocation11 + $0x30] sm:$0xff] }
 0x560   :  { %11605 = vmatpush3.bf16.msra.mxu1 %v13622_v15  ;;  %11584 = vmatprep.subr.bf16.mxu0 %v13623_v6  ;;  %v11694_v15 = vpack.c.bf16 %v9886_v49, %v9884_v47  ;;  %v11696_v6 = vpack.c.bf16 %v9891_v51, %v9889_v50 }
 0x561   :  { %11606 = vmatprep.subr.bf16.mxu1 %v13624_v60  ;;  %v9890_v60 = vld [vmem:[#allocation11 + $0x50] sm:$0xff] }
 0x563   :  { %11585 = vmatpush3.bf16.msra.mxu0 %v13625_v3  ;;  %v9893_v3 = vld [vmem:[#allocation11 + $0x68] sm:$0xff] }
 0x564   :  { %11607 = vmatpush3.bf16.msra.mxu1 %v13626_v53  ;;  %11614 = vmatprep.subr.bf16.mxu0 %v13627_v54  ;;  %v11698_v53 = vpack.c.bf16 %v9890_v60, %v9888_v57  ;;  %v11700_v54 = vpack.c.bf16 %v9895_v52, %v9893_v3 }
 0x565   :  { %11689 = vmatprep.subr.bf16.mxu1 %v11688_v63 }
 0x566   :  { %9791 = vmatmul.mubr.bf16.vlgmr.msra.gmra.mrb[28].mxu0 %v8017_v55  ;;  %v9897_v55 = vld [vmem:[#allocation11 + $0x88] sm:$0xff] }
 0x567   :  { %9831 = vmatmul.mubr.bf16.vlgmr.msra.gmra.mrb[48].mxu1 %v8019_v48  ;;  %11615 = vmatpush3.bf16.msra.mxu0 %v13628_v46  ;;  %v9894_v46 = vld [vmem:[#allocation11 + $0x70] sm:$0xff] }
 0x568   :  { %11616 = vmatprep.subr.bf16.mxu0 %v13629_v56  ;;  %11691 = vmatpush1.bf16.msra.mxu1 %v11690_v43  ;;  %v9899_v56 = vld [vmem:[#allocation11 + $0x98] sm:$0xff]  ;;  %v11702_v48 = vpack.c.bf16 %v9894_v46, %v9892_v5  ;;  %v9905_v46 = vld [vmem:[#allocation11 + $0xc8] sm:$0xff] }
 0x569   :  { %11693 = vmatprep.subr.bf16.mxu1 %v11692_v10 }
 0x56b   :  { %11617 = vmatpush3.bf16.msra.mxu0 %v13630_v1  ;;  %v11704_v1 = vpack.c.bf16 %v9899_v56, %v9897_v55  ;;  %v9907_v55 = vld [vmem:[#allocation11 + $0xd8] sm:$0xff] }
 0x56c   :  { %11618 = vmatprep.subr.bf16.mxu0 %v13631_v61  ;;  %11695 = vmatpush1.bf16.msra.mxu1 %v11694_v15  ;;  %v9896_v61 = vld [vmem:[#allocation11 + $0x80] sm:$0xff]  ;;  %v11712_v56 = vpack.c.bf16 %v9907_v55, %v9905_v46 }
 0x56d   :  { %11697 = vmatprep.subr.bf16.mxu1 %v11696_v6 }
 0x56f   :  { %11619 = vmatpush3.bf16.msra.mxu0 %v13632_v30  ;;  %v9898_v30 = vld [vmem:[#allocation11 + $0x90] sm:$0xff] }
 0x570   :  { %11620 = vmatprep.subr.bf16.mxu0 %v13633_v2  ;;  %11699 = vmatpush1.bf16.msra.mxu1 %v11698_v53  ;;  %v9901_v2 = vld [vmem:[#allocation11 + $0xa8] sm:$0xff] }
 0x571   :  { %11701 = vmatprep.subr.bf16.mxu1 %v11700_v54 }
 0x573   :  { %11621 = vmatpush3.bf16.msra.mxu0 %v13634_v7  ;;  %v9903_v7 = vld [vmem:[#allocation11 + $0xb8] sm:$0xff] }
 0x574   :  { %11622 = vmatprep.subr.bf16.mxu0 %v13635_v9  ;;  %11703 = vmatpush1.bf16.msra.mxu1 %v11702_v48  ;;  %v11706_v9 = vpack.c.bf16 %v9898_v30, %v9896_v61  ;;  %v9904_v48 = vld [vmem:[#allocation11 + $0xc0] sm:$0xff]  ;;  %v9909_v30 = vld [vmem:[#allocation11 + $0xe8] sm:$0xff] }
 0x575   :  { %11705 = vmatprep.subr.bf16.mxu1 %v11704_v1  ;;  %v9906_v1 = vld [vmem:[#allocation11 + $0xd0] sm:$0xff] }
 0x576   :  { %v11714_v61 = vpack.c.bf16 %v9906_v1, %v9904_v48 }
 0x577   :  { %11623 = vmatpush3.bf16.msra.mxu0 %v13636_v16  ;;  %v11708_v16 = vpack.c.bf16 %v9903_v7, %v9901_v2  ;;  %v9911_v2 = vld [vmem:[#allocation11 + $0xf8] sm:$0xff] }
 0x578   :  { %11624 = vmatprep.subr.bf16.mxu0 %v13637_v4  ;;  %v9900_v4 = vld [vmem:[#allocation11 + $0xa0] sm:$0xff]  ;;  %11707 = vmatpush1.bf16.msra.mxu1 %v11706_v9  ;;  %v11716_v7 = vpack.c.bf16 %v9911_v2, %v9909_v30 }
 0x579   :  { %11709 = vmatprep.subr.bf16.mxu1 %v11708_v16  ;;  %v9908_v9 = vld [vmem:[#allocation11 + $0xe0] sm:$0xff]  ;;  %v9910_v16 = vld [vmem:[#allocation11 + $0xf0] sm:$0xff] }
 0x57a   :  { %v11432_v22 = vpop.f32.mrb[24].mxu1 }
 0x57b   :  { %v11433_v38 = vpop.f32.mrb[25].mxu1  ;;  %11625 = vmatpush3.bf16.msra.mxu0 %v13638_v20  ;;  %v9902_v20 = vld [vmem:[#allocation11 + $0xb0] sm:$0xff] }
 0x57c   :  { %v11434_v17 = vadd.f32 %v11433_v38, %v11432_v22  ;;  %v11435_v24 = vpop.f32.mrb[26].mxu1  ;;  %11626 = vmatprep.subr.bf16.mxu0 %v13639_v11  ;;  %v11710_v21 = vpack.c.bf16 %v9902_v20, %v9900_v4  ;;  %v11718_v4 = vpack.c.bf16 %v9910_v16, %v9908_v9  ;;  %v13946_v20 = vmov 0.0  }
 0x57d   :  { %v11436_v25 = vpop.f32.mrb[27].mxu1  ;;  %9988 = vmatprep.mubr.f32.mxu1 %v13946_v20 }
 0x57e   :  { %v9513_v13 = vadd.f32 %v11434_v17, %v9473_v23  ;;  %11711 = vmatpush1.bf16.msra.mxu1 %v11710_v21  ;;  %v1302_v25 = vrot.slane %v14313_v39, %v14263_v8  ;;  %v9995_v21 = vld [vmem:[#allocation14] sm:$0xff] }
 0x57f   :  { %11627 = vmatpush3.bf16.msra.mxu0 %v13640_v19  ;;  %v1298_v19 = vrot.slane %v14313_v39, %v14274_v59  ;;  %11713 = vmatprep.subr.bf16.mxu1 %v11712_v56 }
 0x580   :  { %11628 = vmatprep.subr.bf16.mxu0 %v13641_v26 }
 0x582   :  { %11715 = vmatpush1.bf16.msra.mxu1 %v11714_v61 }
 0x583   :  { %11629 = vmatpush3.bf16.msra.mxu0 %v13642_v27  ;;  %11717 = vmatprep.subr.bf16.mxu1 %v11716_v7 }
 0x586   :  { %11719 = vmatpush1.bf16.msra.mxu1 %v11718_v4 }
 0x59a   :  { %v11454_v14 = vpop.f32.mrb[28].mxu1 }
 0x59b   :  { %v11455_v37 = vpop.f32.mrb[29].mxu1 }
 0x59c   :  { %v11456_v28 = vadd.f32 %v11455_v37, %v11454_v14  ;;  %v11457_v29 = vpop.f32.mrb[30].mxu1 }
 0x59d   :  { %v11458_v31 = vpop.f32.mrb[31].mxu1 }
 0x59e   :  { %v9553_v40 = vadd.f32 %v11456_v28, %v9513_v13 }
 0x5ba   :  { %v11476_v18 = vpop.f32.mrb[32].mxu1 }
 0x5bb   :  { %v11477_v32 = vpop.f32.mrb[33].mxu1 }
 0x5bc   :  { %v11478_v33 = vadd.f32 %v11477_v32, %v11476_v18  ;;  %v11479_v34 = vpop.f32.mrb[34].mxu1 }
 0x5bd   :  { %v11480_v42 = vpop.f32.mrb[35].mxu1 }
 0x5be   :  { %v9593_v35 = vadd.f32 %v11478_v33, %v9553_v40 }
 0x5da   :  { %v11498_v22 = vpop.f32.mrb[36].mxu1 }
 0x5db   :  { %v11499_v11 = vpop.f32.mrb[37].mxu1 }
 0x5dc   :  { %v11500_v38 = vadd.f32 %v11499_v11, %v11498_v22  ;;  %v11501_v23 = vpop.f32.mrb[38].mxu1  ;;  %v9996_v22 = vld [vmem:[#allocation14 + $0x8] sm:$0xff]  ;;  %v9997_v11 = vld [vmem:[#allocation14 + $0x10] sm:$0xff] }
 0x5dd   :  { %v11502_v17 = vpop.f32.mrb[39].mxu1  ;;  %v11721_v23 = vpack.c.bf16 %v9996_v22, %v9995_v21 }
 0x5de   :  { %v9633_v24 = vadd.f32 %v11500_v38, %v9593_v35  ;;  %v13947_v38 = vmov 0.0|0.0   ;;  %v9998_v17 = vld [vmem:[#allocation14 + $0x18] sm:$0xff] }
 0x5df   :  { %11720 = vmatprep.subr.bf16.mxu0 %v13947_v38 }
 0x5f9   :  { %v7972_v13 = vpop.f32.mrb[20].mxu0 }
 0x5fa   :  { %v11520_v26 = vpop.f32.mrb[40].mxu1  ;;  %v11764_v27 = vadd.f32 %v7972_v13, %v1298_v19  ;;  %v7974_v14 = vpop.f32.mrb[21].mxu0  ;;  %v9999_v19 = vld [vmem:[#allocation14 + $0x20] sm:$0xff] }
 0x5fb   :  { %v11521_v37 = vpop.f32.mrb[41].mxu1  ;;  %v11765_v28 = vadd.f32 %v7974_v14, %v1302_v25  ;;  %v7976_v31 = vpop.f32.mrb[22].mxu0  ;;  %v10000_v25 = vld [vmem:[#allocation14 + $0x28] sm:$0xff] }
 0x5fc   :  { %v11522_v29 = vadd.f32 %v11521_v37, %v11520_v26  ;;  %v11523_v40 = vpop.f32.mrb[42].mxu1  ;;  %v7999_v18 = vmax.f32 %v11764_v27, 0.0  ;;  %v7977_v32 = vpop.f32.mrb[23].mxu0  ;;  %v11727_v13 = vpack.c.bf16 %v10000_v25, %v9999_v19  ;;  %v10001_v26 = vld [vmem:[#allocation14 + $0x30] sm:$0xff]  ;;  %v10002_v27 = vld [vmem:[#allocation14 + $0x38] sm:$0xff]  ;;  %v10003_v37 = vld [vmem:[#allocation14 + $0x40] sm:$0xff] }
 0x5fd   :  { %v11524_v33 = vpop.f32.mrb[43].mxu1  ;;  %v8000_v34 = vmax.f32 %v11765_v28, 0.0  ;;  %v11730_v14 = vpack.c.bf16 %v10002_v27, %v10001_v26  ;;  %v10004_v28 = vld [vmem:[#allocation14 + $0x48] sm:$0xff]  ;;  %v10005_v31 = vld [vmem:[#allocation14 + $0x50] sm:$0xff]  ;;  %v10006_v40 = vld [vmem:[#allocation14 + $0x58] sm:$0xff] }
 0x5fe   :  { %v9673_v42 = vadd.f32 %v11522_v29, %v9633_v24  ;;  %v8021_v62 = vpack.c.bf16 %v7999_v18, %v7999_v18  ;;  %v11724_v24 = vpack.c.bf16 %v9998_v17, %v9997_v11  ;;  %v11733_v29 = vpack.c.bf16 %v10004_v28, %v10003_v37  ;;  %v10007_v32 = vld [vmem:[#allocation14 + $0x60] sm:$0xff]  ;;  %v10008_v33 = vld [vmem:[#allocation14 + $0x68] sm:$0xff] }
 0x5ff   :  { %v8022_v35 = vpack.c.bf16 %v8000_v34, %v8000_v34  ;;  %v11736_v18 = vpack.c.bf16 %v10006_v40, %v10005_v31  ;;  %v11739_v34 = vpack.c.bf16 %v10008_v33, %v10007_v32 }
 0x601   :  { %9870 = vmatprep.mubr.bf16.mxu0 %v8022_v35 }
 0x602   :  { %9871 = vmatmul.mubr.bf16.vlgmr.msra.gmra.mrb[32].mxu0 %v8021_v62 }
 0x603   :  { %11722 = vmatpush3.bf16.msra.mxu0 %v11721_v23  ;;  %11685 = vmatprep.mubr.msk.f32.mxu0 %vm13948_vm0, %v13946_v20 }
 0x604   :  { %11723 = vmatprep.subr.bf16.mxu0 %v13947_v38 }
 0x607   :  { %11725 = vmatpush3.bf16.msra.mxu0 %v11724_v24 }
 0x608   :  { %11726 = vmatprep.subr.bf16.mxu0 %v13947_v38 }
 0x60b   :  { %11728 = vmatpush3.bf16.msra.mxu0 %v11727_v13 }
 0x60c   :  { %11729 = vmatprep.subr.bf16.mxu0 %v13947_v38 }
 0x60f   :  { %11731 = vmatpush3.bf16.msra.mxu0 %v11730_v14 }
 0x610   :  { %11732 = vmatprep.subr.bf16.mxu0 %v13947_v38 }
 0x613   :  { %11734 = vmatpush3.bf16.msra.mxu0 %v11733_v29 }
 0x614   :  { %11735 = vmatprep.subr.bf16.mxu0 %v13947_v38 }
 0x617   :  { %11737 = vmatpush3.bf16.msra.mxu0 %v11736_v18 }
 0x618   :  { %11738 = vmatprep.subr.bf16.mxu0 %v13947_v38 }
 0x619   :  { %v11542_v59 = vpop.f32.mrb[24].mxu0 }
 0x61a   :  { %v11564_v8 = vpop.f32.mrb[44].mxu1  ;;  %v11543_v39 = vpop.f32.mrb[25].mxu0 }
 0x61b   :  { %v11544_v41 = vadd.f32 %v11543_v39, %v11542_v59  ;;  %v11565_v36 = vpop.f32.mrb[45].mxu1  ;;  %v11545_v63 = vpop.f32.mrb[26].mxu0  ;;  %11740 = vmatpush3.bf16.msra.mxu0 %v11739_v34 }
 0x61c   :  { %v11566_v0 = vadd.f32 %v11565_v36, %v11564_v8  ;;  %v11567_v44 = vpop.f32.mrb[46].mxu1  ;;  %v11546_v45 = vpop.f32.mrb[27].mxu0  ;;  %11741 = vmatprep.subr.bf16.mxu0 %v13947_v38  ;;  %v10009_v36 = vld [vmem:[#allocation14 + $0x70] sm:$0xff]  ;;  %v10010_v63 = vld [vmem:[#allocation14 + $0x78] sm:$0xff] }
 0x61d   :  { %v9713_v43 = vadd.f32 %v11544_v41, %v9673_v42  ;;  %v11568_v10 = vpop.f32.mrb[47].mxu1  ;;  %v9912_v44 = vld [vmem:[#allocation13] sm:$0x3] }
 0x61e   :  { %v9921_v45 = vrot.slane %v9912_v44, %v14229_v12 }
 0x61f   :  { %v9753_v47 = vadd.f32 %v11566_v0, %v9713_v43  ;;  %v11742_v0 = vpack.c.bf16 %v10010_v63, %v10009_v36 }
 0x621   :  { %11743 = vmatpush3.bf16.msra.mxu0 %v11742_v0 }
 0x639   :  { %v11586_v49 = vpop.f32.mrb[28].mxu0 }
 0x63a   :  { %v11608_v50 = vpop.f32.mrb[48].mxu1  ;;  %v11587_v51 = vpop.f32.mrb[29].mxu0 }
 0x63b   :  { %v11588_v15 = vadd.f32 %v11587_v51, %v11586_v49  ;;  %v11609_v6 = vpop.f32.mrb[49].mxu1  ;;  %v11589_v57 = vpop.f32.mrb[30].mxu0  ;;  %v11393_v49 = vld [vmem:[#allocation16] ss:$0 sm:$0xff]  ;;  %v9917_v51 = vrot.slane %v9912_v44, %v14240_v58 }
 0x63c   :  { %v11610_v60 = vadd.f32 %v11609_v6, %v11608_v50  ;;  %v11611_v3 = vpop.f32.mrb[50].mxu1  ;;  %v11590_v52 = vpop.f32.mrb[31].mxu0 }
 0x63d   :  { %v9793_v53 = vadd.f32 %v11588_v15, %v9753_v47  ;;  %v11612_v54 = vpop.f32.mrb[51].mxu1 }
 0x63f   :  { %v9833_v5 = vadd.f32 %v11610_v60, %v9793_v53 }
 0x6d5   :  { %v11630_v42 = vpop.f32.mrb[32].mxu0 }
 0x6d6   :  { %v11631_v35 = vpop.f32.mrb[33].mxu0 }
 0x6d7   :  { %v11632_v62 = vadd.f32 %v11631_v35, %v11630_v42  ;;  %v11633_v59 = vpop.f32.mrb[34].mxu0 }
 0x6d8   :  { %v11634_v8 = vpop.f32.mrb[35].mxu0 }
 0x6d9   :  { %v9873_v39 = vadd.f32 %v11632_v62, %v9833_v5 }
 0x6db   :  { %v9878_v41 = vmax.f32 %v9873_v39, 0.0 }
 0x6dd   :  { %9879 = vst [vmem:[#allocation20] sm:$0xff] %v9878_v41  ;;  %9989 = vmatmul.mubr.f32.vlgmr.msra.gmra.mrb[52].mxu1 %v9878_v41 }
 0x7b0   :  { %v9990_v43 = vpop.f32.mrb[52].mxu1 }
 0x7b1   :  { %v9992_v10 = vpop.f32.mrb[53].mxu1  ;;  %v9991_v57 = vadd.f32 %v9990_v43, %v9917_v51 }
 0x7b2   :  { %v9993_v47 = vadd.f32 %v9992_v10, %v9921_v45 }
 0x7b4   :  { %11686 = vmatmul.mubr.f32.vlgmr.msra.gmra.mrb[36].mxu0 %v9993_v47 }
 0x887   :  { %v10084_v50 = vpop.f32.mrb[36].mxu0 }
 0x888   :  { %v10085_v15 = vadd.f32 %v11393_v49, %v10084_v50  ;;  %v11687_v6 = vpop.f32.mrb[37].mxu0 }
 0x88a   :  { %10098 = vmax.xlane.f32.xlu0 %v10085_v15 }
 0x88e   :  { %10088 = vmax.xlane.f32.xlu0 %v9991_v57 }
 0x917   :  { %v10099_v60 = vpop.xlane.xlu0 %10098 }
 0x918   :  { %v10100_v3 = vsub.f32 %v10085_v15, %v10099_v60 }
 0x91a   :  { %v10101_v52 = vmul.f32 1.442695, %v10100_v3 }
 0x91b   :  { %v10089_v53 = vpop.xlane.xlu0 %10088 }
 0x91c   :  { %13643 = vpow2.f32 %v10101_v52  ;;  %v10090_v54 = vsub.f32 %v9991_v57, %v10089_v53 }
 0x91e   :  { %v10091_v12 = vmul.f32 1.442695, %v10090_v54 }
 0x920   :  { %13645 = vpow2.f32 %v10091_v12 }
 0x926   :  { %v13644_v5 = vpop.eup %13643 }
 0x927   :  { %10103 = vadd.xlane.f32.xlu1 %v13644_v5 }
 0x92a   :  { %v13646_v46 = vpop.eup %13645 }
 0x92b   :  { %10093 = vadd.xlane.f32.xlu1 %v13646_v46 }
 0x9b4   :  { %v10104_v55 = vpop.xlane.xlu1 %10103 }
 0x9b5   :  { %13647 = vrcp.f32 %v10104_v55 }
 0x9b8   :  { %v10094_v58 = vpop.xlane.xlu1 %10093 }
 0x9b9   :  { %13649 = vrcp.f32 %v10094_v58 }
 0x9bf   :  { %v13648_v56 = vpop.eup %13647 }
 0x9c0   :  { %v10106_v48 = vmul.f32 %v13648_v56, %v13644_v5 }
 0x9c2   :  { %10107 = vst [vmem:[#allocation18] sm:$0xff] %v10106_v48 }
 0x9c3   :  { %v13650_v1 = vpop.eup %13649 }
 0x9c4   :  { %13860 = shalt.err (!%p13857_p6)
}
 0x9c5   :  { %s13861_s28 = scalar_lea.hbm %s14402_s10, 128 }
 0x9c6   :  { %p13862_p7 = scmp.ne.s32.totalorder %s14402_s10, %s13861_s28  ;;  %p13865_p8 = scmp.lt.u32.totalorder %s13861_s28, %s14402_s10 }
 0x9c8   :  { %p13867_p9 = pnand %p13865_p8, %p13862_p7 }
 0x9ca   :  { %13870 = shalt.err (!%p13867_p9)
}
 0x9cb   :  { %10127 = dma.vmem_to_hbm [thread:$0]  %s10125_s2, 128, %s14402_s10, [#allocation19]   ;;  %v10096_v61 = vmul.f32 %v13650_v1, %v13646_v46 }
 0x9cc   :  { %s13871_s12 = scalar_lea.vmem %s14342_s21, 128  ;;  %p13876_p11 = scmp.lt.s32.totalorder %s14342_s21, %s14342_s21 }
 0x9cd   :  { %p13872_p10 = scmp.ne.s32.totalorder %s14342_s21, %s13871_s12  ;;  %p13877_p12 = scmp.lt.s32.totalorder %s13871_s12, %s13871_s12 }
 0x9cf   :  { %p13878_p13 = por %p13877_p12, %p13876_p11 }
 0x9d1   :  { %p13879_p0 = pnand %p13878_p13, %p13872_p10 }
 0x9d3   :  { %13882 = shalt.err (!%p13879_p0)
}
 0x9d4   :  { %s13883_s13 = scalar_lea.hbm %s14403_s11, 128 }
 0x9d5   :  { %p13884_p1 = scmp.ne.s32.totalorder %s14403_s11, %s13883_s13  ;;  %p13887_p2 = scmp.lt.u32.totalorder %s13883_s13, %s14403_s11 }
 0x9d7   :  { %p13889_p3 = pnand %p13887_p2, %p13884_p1 }
 0x9d9   :  { %13892 = shalt.err (!%p13889_p3)
}
 0x9da   :  { %10137 = dma.vmem_to_hbm [thread:$0]  %s14342_s21, 128, %s14403_s11, [#allocation19]   ;;  %10097 = vst [vmem:[#allocation17] sm:$0xff] %v10096_v61 }
 0x9db   :  { %s13893_s6 = scalar_lea.vmem %s14344_s23, 128  ;;  %p13898_p5 = scmp.lt.s32.totalorder %s14344_s23, %s14344_s23 }
 0x9dc   :  { %p13894_p4 = scmp.ne.s32.totalorder %s14344_s23, %s13893_s6  ;;  %p13899_p6 = scmp.lt.s32.totalorder %s13893_s6, %s13893_s6 }
 0x9de   :  { %p13900_p7 = por %p13899_p6, %p13898_p5 }
 0x9e0   :  { %p13901_p8 = pnand %p13900_p7, %p13894_p4 }
 0x9e2   :  { %13904 = shalt.err (!%p13901_p8)
}
 0x9e3   :  { %s13905_s8 = scalar_lea.hbm %s14401_s9, 128 }
 0x9e4   :  { %p13906_p9 = scmp.ne.s32.totalorder %s14401_s9, %s13905_s8  ;;  %p13909_p10 = scmp.lt.u32.totalorder %s13905_s8, %s14401_s9 }
 0x9e6   :  { %p13911_p11 = pnand %p13909_p10, %p13906_p9 }
 0x9e8   :  { %13914 = shalt.err (!%p13911_p11)
}
 0x9e9   :  { %10117 = dma.vmem_to_hbm [thread:$0]  %s14344_s23, 128, %s14401_s9, [#allocation4]  }
 0x9ea   :  { %13925 = dma.done.wait [#allocation4], 128  }
 0x9eb   :  { %13926 = vsyncadd [#allocation4], 4294967168 }
 0x9ec   :  { %13927 = dma.done.wait [#allocation19], 256  }
 0x9ed   :  { %13928 = vsyncadd [#allocation19], 4294967040 }
 0x9ee   :  { %10147 = vsyncpa [#allocation3], 1 }
 0x9ef   :  { %10148 = vsyncpa [#allocation6], 1 }
 0x9f0   :  { %10149 = vsyncpa [#allocation9], 1 }
 0x9f1   :  { %10150 = vsyncpa [#allocation12], 1 }
 0x9f2   :  { %10151 = vsyncpa [#allocation15], 1 }
 0x9f3   :  { %10152 = vsyncpa [#allocation4], 1 }
 0x9f4   :  { %10153 = vsyncpa [#allocation19], 1 }

</bundles_post_ra>
